<compile_context>
chip_gen: v7x
topology: tpu7x:2x2x1
jax: 0.10.0
libtpu: 0.0.40
codegen_flags: <defaults>
</compile_context>

<pallas_src>
import functools

import jax
import jax.numpy as jnp
from jax.experimental import pallas as pl
from jax.experimental.pallas import tpu as pltpu


def _residual_kernel(x_ref, w1_ref, b1_ref, w2_ref, b2_ref, o_ref):
    # lin1: bf16 MXU matmul, f32 accumulation; bias in f32 (VPU).
    h = jnp.dot(x_ref[...].astype(jnp.bfloat16), w1_ref[...],
                preferred_element_type=jnp.float32) + b1_ref[...]
    # SiLU in single-EUP-op tanh form: x*sigmoid(x) == 0.5*x*(1 + tanh(0.5*x)).
    h = 0.5 * h * (1.0 + jnp.tanh(0.5 * h))
    # lin2 + SiLU.
    y = jnp.dot(h.astype(jnp.bfloat16), w2_ref[...],
                preferred_element_type=jnp.float32) + b2_ref[...]
    y = 0.5 * y * (1.0 + jnp.tanh(0.5 * y))
    # Residual add: re-read x from the (already resident) VMEM input block so the
    # f32 tile is not held in vregs across both matmuls (lower spill pressure).
    o_ref[...] = (x_ref[...] + y).astype(o_ref.dtype)


@functools.partial(jax.jit, static_argnames=("tile_m",))
def _residual_pallas(x, w1, b1, w2, b2, *, tile_m):
    n, h = x.shape
    grid = (pl.cdiv(n, tile_m),)

    return pl.pallas_call(
        _residual_kernel,
        out_shape=jax.ShapeDtypeStruct((n, h), x.dtype),
        grid_spec=pltpu.PrefetchScalarGridSpec(
            num_scalar_prefetch=0,
            grid=grid,
            in_specs=[
                pl.BlockSpec((tile_m, h), lambda i: (i, 0)),   # x row-tile
                pl.BlockSpec((h, h), lambda i: (0, 0)),        # W1 (bf16, resident)
                pl.BlockSpec((1, h), lambda i: (0, 0)),        # b1 (f32)
                pl.BlockSpec((h, h), lambda i: (0, 0)),        # W2 (bf16, resident)
                pl.BlockSpec((1, h), lambda i: (0, 0)),        # b2 (f32)
            ],
            out_specs=pl.BlockSpec((tile_m, h), lambda i: (i, 0)),
        ),
        compiler_params=pltpu.CompilerParams(
            dimension_semantics=("parallel",)),
    )(x, w1, b1, w2, b2)


def _pick_tile_m(n, *, max_tile=1024, align=256):
    """Largest `align`-multiple row tile <= max_tile keeping the grid >= 2 blocks."""
    if n <= 2 * align:
        # Tiny input: one full-extent block (full array dims are always legal).
        return n
    tile = min(max_tile, (n // 2) // align * align)
    return max(tile, align)


def residual_layer(x, w1, b1, w2, b2, *, tile_m=None):
    """x: (N, H) f32; w1/w2: (H, H) bf16 (pre-transposed, x @ W); b1/b2: (1, H) f32."""
    n, _ = x.shape
    if tile_m is None:
        tile_m = _pick_tile_m(n)
    # Ragged last block (n % tile_m != 0) is handled by Pallas edge masking on the
    # output store; row-wise-independent math keeps out-of-range rows harmless.
    return _residual_pallas(x, w1, b1, w2, b2, tile_m=tile_m)


def _glorot_orthogonal(key, shape, scale=2.0):
    # Deterministic stand-in for torch_geometric's glorot_orthogonal init:
    # orthogonal matrix rescaled so that Var(W) = scale / (fan_in + fan_out).
    fan_out, fan_in = shape  # PyTorch Linear weight layout (out, in)
    w = jax.random.orthogonal(key, max(shape)).astype(jnp.float32)[:fan_out, :fan_in]
    var = jnp.var(w)
    w = w * jnp.sqrt(scale / ((fan_in + fan_out) * var))
    return w


def residual_layer_reference(x, w1, b1, w2, b2):
    def silu(v):
        return v * jax.nn.sigmoid(v)
    return x + silu(silu(x @ w1 + b1) @ w2 + b2)


if __name__ == "__main__":
    hidden = 128   # DimeNet default hidden_channels (lane-dense: multiple of 128)
    n = 2048       # rows ("edges") fed through the residual block

    key = jax.random.PRNGKey(0)
    kx, k1, k2 = jax.random.split(key, 3)

    x = jax.random.normal(kx, (n, hidden), dtype=jnp.float32)

    # PyTorch weights are (out, in); store transposed (in, out) for x @ W and
    # cast to bf16 for the MXU (accumulation stays f32 inside the kernel).
    w1 = _glorot_orthogonal(k1, (hidden, hidden), scale=2.0).T.astype(jnp.bfloat16)
    w2 = _glorot_orthogonal(k2, (hidden, hidden), scale=2.0).T.astype(jnp.bfloat16)
    b1 = jnp.zeros((1, hidden), dtype=jnp.float32)   # bias.data.fill_(0)
    b2 = jnp.zeros((1, hidden), dtype=jnp.float32)

    out = residual_layer(x, w1, b1, w2, b2)          # tile_m auto: 1024, grid=(2,)
    out = jax.block_until_ready(out)

    ref = residual_layer_reference(x, w1.astype(jnp.float32), b1,
                                   w2.astype(jnp.float32), b2)
    assert out.shape == x.shape and out.dtype == x.dtype
    # bf16 MXU operands -> relaxed tolerance vs the f32 reference.
    assert jnp.allclose(out, ref, atol=3e-2, rtol=3e-2), "mismatch vs reference"

    print("KERNEL_OK")
</pallas_src>

<mosaic_0001>
module attributes {stable_mosaic.version = 11 : i64} {
  func.func @_residual_kernel(%arg0: i32, %arg1: memref<1024x128xf32, #tpu.memory_space<vmem>>, %arg2: memref<128x128xbf16, #tpu.memory_space<vmem>>, %arg3: memref<1x128xf32, #tpu.memory_space<vmem>>, %arg4: memref<128x128xbf16, #tpu.memory_space<vmem>>, %arg5: memref<1x128xf32, #tpu.memory_space<vmem>>, %arg6: memref<1024x128xf32, #tpu.memory_space<vmem>>) attributes {dimension_semantics = [#tpu.dimension_semantics<parallel>], iteration_bounds = array<i64: 2>, scalar_prefetch = 0 : i64, scratch_operands = 0 : i64, tpu.core_type = #tpu.core_type<tc>, window_params = [{transform_indices = @transform_0, window_bounds = array<i64: 1024, 128>}, {pipeline_mode = #tpu.pipeline_mode<synchronous>, transform_indices = @transform_1, window_bounds = array<i64: 128, 128>}, {pipeline_mode = #tpu.pipeline_mode<synchronous>, transform_indices = @transform_2, window_bounds = array<i64: 1, 128>}, {pipeline_mode = #tpu.pipeline_mode<synchronous>, transform_indices = @transform_3, window_bounds = array<i64: 128, 128>}, {pipeline_mode = #tpu.pipeline_mode<synchronous>, transform_indices = @transform_4, window_bounds = array<i64: 1, 128>}, {transform_indices = @transform_5, window_bounds = array<i64: 1024, 128>}]} {
    %c0 = arith.constant 0 : index
    %c0_0 = arith.constant 0 : index
    %0 = vector.load %arg1[%c0, %c0_0] : memref<1024x128xf32, #tpu.memory_space<vmem>>, vector<1024x128xf32>
    %1 = arith.truncf %0 : vector<1024x128xf32> to vector<1024x128xbf16>
    %c0_1 = arith.constant 0 : index
    %c0_2 = arith.constant 0 : index
    %2 = vector.load %arg2[%c0_1, %c0_2] : memref<128x128xbf16, #tpu.memory_space<vmem>>, vector<128x128xbf16>
    %cst = arith.constant dense<0.000000e+00> : vector<1024x128xf32>
    %3 = tpu.matmul %1, %2, %cst {dimension_numbers = #tpu.dot_dimension_numbers<[1], [0], [0], [1], [0, 0, 1, 1], [], []>} : vector<1024x128xbf16>, vector<128x128xbf16>, vector<1024x128xf32> -> vector<1024x128xf32>
    %c0_3 = arith.constant 0 : index
    %c0_4 = arith.constant 0 : index
    %4 = vector.load %arg3[%c0_3, %c0_4] : memref<1x128xf32, #tpu.memory_space<vmem>>, vector<1x128xf32>
    %5 = vector.broadcast %4 : vector<1x128xf32> to vector<1024x128xf32>
    %6 = arith.addf %3, %5 : vector<1024x128xf32>
    %cst_5 = arith.constant 5.000000e-01 : f32
    %7 = vector.broadcast %cst_5 : f32 to vector<1024x128xf32>
    %8 = arith.mulf %7, %6 : vector<1024x128xf32>
    %cst_6 = arith.constant 5.000000e-01 : f32
    %9 = vector.broadcast %cst_6 : f32 to vector<1024x128xf32>
    %10 = arith.mulf %9, %6 : vector<1024x128xf32>
    %11 = math.tanh %10 : vector<1024x128xf32>
    %cst_7 = arith.constant 1.000000e+00 : f32
    %12 = vector.broadcast %cst_7 : f32 to vector<1024x128xf32>
    %13 = arith.addf %12, %11 : vector<1024x128xf32>
    %14 = arith.mulf %8, %13 : vector<1024x128xf32>
    %15 = arith.truncf %14 : vector<1024x128xf32> to vector<1024x128xbf16>
    %c0_8 = arith.constant 0 : index
    %c0_9 = arith.constant 0 : index
    %16 = vector.load %arg4[%c0_8, %c0_9] : memref<128x128xbf16, #tpu.memory_space<vmem>>, vector<128x128xbf16>
    %cst_10 = arith.constant dense<0.000000e+00> : vector<1024x128xf32>
    %17 = tpu.matmul %15, %16, %cst_10 {dimension_numbers = #tpu.dot_dimension_numbers<[1], [0], [0], [1], [0, 0, 1, 1], [], []>} : vector<1024x128xbf16>, vector<128x128xbf16>, vector<1024x128xf32> -> vector<1024x128xf32>
    %c0_11 = arith.constant 0 : index
    %c0_12 = arith.constant 0 : index
    %18 = vector.load %arg5[%c0_11, %c0_12] : memref<1x128xf32, #tpu.memory_space<vmem>>, vector<1x128xf32>
    %19 = vector.broadcast %18 : vector<1x128xf32> to vector<1024x128xf32>
    %20 = arith.addf %17, %19 : vector<1024x128xf32>
    %cst_13 = arith.constant 5.000000e-01 : f32
    %21 = vector.broadcast %cst_13 : f32 to vector<1024x128xf32>
    %22 = arith.mulf %21, %20 : vector<1024x128xf32>
    %cst_14 = arith.constant 5.000000e-01 : f32
    %23 = vector.broadcast %cst_14 : f32 to vector<1024x128xf32>
    %24 = arith.mulf %23, %20 : vector<1024x128xf32>
    %25 = math.tanh %24 : vector<1024x128xf32>
    %cst_15 = arith.constant 1.000000e+00 : f32
    %26 = vector.broadcast %cst_15 : f32 to vector<1024x128xf32>
    %27 = arith.addf %26, %25 : vector<1024x128xf32>
    %28 = arith.mulf %22, %27 : vector<1024x128xf32>
    %c0_16 = arith.constant 0 : index
    %c0_17 = arith.constant 0 : index
    %29 = vector.load %arg1[%c0_16, %c0_17] : memref<1024x128xf32, #tpu.memory_space<vmem>>, vector<1024x128xf32>
    %30 = arith.addf %29, %28 : vector<1024x128xf32>
    %c0_18 = arith.constant 0 : index
    %c0_19 = arith.constant 0 : index
    %31 = vector.load %arg6[%c0_18, %c0_19] : memref<1024x128xf32, #tpu.memory_space<vmem>>, vector<1024x128xf32>
    tpu.vector_store %arg6[%c0_18, %c0_19], %30 {strides = array<i32>} : memref<1024x128xf32, #tpu.memory_space<vmem>>, vector<1024x128xf32>,
    return
  }
  func.func @transform_0(%arg0: i32) -> (i32, i32) {
    %c0_i32 = arith.constant 0 : i32
    %c0_i32_0 = arith.constant 0 : i32
    return %arg0, %c0_i32 : i32, i32
  }
  func.func @transform_1(%arg0: i32) -> (i32, i32) {
    %c0_i32 = arith.constant 0 : i32
    %c0_i32_0 = arith.constant 0 : i32
    %c0_i32_1 = arith.constant 0 : i32
    return %c0_i32, %c0_i32_0 : i32, i32
  }
  func.func @transform_2(%arg0: i32) -> (i32, i32) {
    %c0_i32 = arith.constant 0 : i32
    %c0_i32_0 = arith.constant 0 : i32
    %c0_i32_1 = arith.constant 0 : i32
    return %c0_i32, %c0_i32_0 : i32, i32
  }
  func.func @transform_3(%arg0: i32) -> (i32, i32) {
    %c0_i32 = arith.constant 0 : i32
    %c0_i32_0 = arith.constant 0 : i32
    %c0_i32_1 = arith.constant 0 : i32
    return %c0_i32, %c0_i32_0 : i32, i32
  }
  func.func @transform_4(%arg0: i32) -> (i32, i32) {
    %c0_i32 = arith.constant 0 : i32
    %c0_i32_0 = arith.constant 0 : i32
    %c0_i32_1 = arith.constant 0 : i32
    return %c0_i32, %c0_i32_0 : i32, i32
  }
  func.func @transform_5(%arg0: i32) -> (i32, i32) {
    %c0_i32 = arith.constant 0 : i32
    %c0_i32_0 = arith.constant 0 : i32
    return %arg0, %c0_i32 : i32, i32
  }
}

</mosaic_0001>

<bundles_post_ra>
// kernel: _residual_pallas.1
= control target key start
LH: loop header
LB: loop body
LE: loop exit
PB: predicated region body
PF: predicated region fallthrough
CT: control target
= control target key end

     0   :  { %10 = vsyncpa [#allocation3], 0  ;;  %s6241_s0 = inlined_call_operand.hbm [shape: f32[2048,128], index: 0, kind: input, shape index: {}]   ;;  %s6242_s1 = inlined_call_operand.hbm [shape: bf16[128,128], index: 1, kind: input, shape index: {}]   ;;  %s6243_s2 = inlined_call_operand.vmem [shape: f32[1,128], index: 2, kind: input, shape index: {}]   ;;  %s6244_s3 = inlined_call_operand.hbm [shape: bf16[128,128], index: 3, kind: input, shape index: {}]   ;;  %s6245_s4 = inlined_call_operand.vmem [shape: f32[1,128], index: 4, kind: input, shape index: {}]   ;;  %s6246_s5 = inlined_call_operand.hbm [shape: f32[2048,128], index: 5, kind: output, shape index: {}]  }
   0x1   :  { %12 = vsyncpa [#allocation3 + $0x1], 0 }
   0x2   :  { %13 = vsyncpa [#allocation6], 0 }
   0x3   :  { %14 = vsyncpa [#allocation4], 0 }
   0x4   :  { %16 = vsyncpa [#allocation4 + $0x1], 0  ;;  %s4550_s18 = smov 0   ;;  %s4552_s19 = smov 0  }
   0x5   :  { %s4554_s20 = smov 0   ;;  %s4556_s21 = smov 0  }
   0x6 LB: > { %s4571_s22 = sadd.s32 4294967295, %s4508_s21   ;;  %s3149_s23 = sadd.s32 4294967294, %s4508_s21   ;;  %s4508_s21 = sphi %s4556_s21, %s6266_s21   ;;  %s4504_s20 = sphi %s4554_s20, %s6265_s20   ;;  %s4500_s19 = sphi %s4552_s19, %s6264_s19   ;;  %s4496_s18 = sphi %s4550_s18, %s6263_s18  }
   0x7   : > { %p42_p0 = scmp.ne.s32.totalorder %s4500_s19, %s4496_s18  ;;  %p6247_p1 = scmp.eq.s32.totalorder %s4571_s22, 0 }
   0x8   : > { %p156_p3 = scmp.eq.s32.totalorder %s3149_s23, 1  ;;  %p3150_p5 = scmp.ge.s32.totalorder %s4508_s21, 1 }
   0x9   : > { %p4580_p4 = por %p6247_p1, %p42_p0  ;;  %p163_p7 = scmp.lt.s32.totalorder %s4508_s21, 3 }
   0xa   : > { %p4585_p6 = por %p156_p3, %p42_p0  ;;  %s4510_s27 = smov [#allocation5]  }
   0xb   : > { %s6250_s24 = scalar_select %p4580_p4, 1, 0 }
   0xc   : > { %s6251_s25 = scalar_select %p4585_p6, 1, 0 }
   0xd   : > { %p4590_p8 = pnand %p3150_p5, %p163_p7  ;;  %s175_s28 = sshll.u32 %s4510_s27, 4  ;;  %s4594_s28 = int_to_ptr.vmem [resolvable:$true] %s175_s28 }
   0xe   : > { %s4511_s30 = smov [#allocation7]   ;;  %s4352_s9 = scalar_lea.hbm %s6242_s1, 1024 }
   0xf   : > { %p3631_p9 = pneg %p4590_p8  ;;  %s191_s6 = sshll.u32 %s4511_s30, 4  ;;  %s4605_s6 = int_to_ptr.vmem [resolvable:$true] %s191_s6 }
  0x10   : > { %p4353_p12 = scmp.ne.s32.totalorder %s6242_s1, %s4352_s9  ;;  %p4359_p5 = scmp.lt.u32.totalorder %s4352_s9, %s6242_s1 }
  0x11   : > { %p4601_p11 = pnand %p3631_p9, %p6247_p1 }
  0x13   : > { %p4354_p13 = pneg %p4601_p11 }
  0x15   : > { %p4355_p0 = pnand %p4354_p13, %p4353_p12 }
  0x17   : > { %p4356_p3 = pneg %p4355_p0 }
  0x19   : > { %p4361_p7 = pnand %p4359_p5, %p4356_p3 }
  0x1b   : > { %4364 = shalt.err (!%p4361_p7)
}
  0x1c   : > { %s4365_s14 = scalar_lea.vmem %s4594_s28, 1024  ;;  %p4373_p2 = scmp.lt.s32.totalorder %s4594_s28, %s4594_s28 }
  0x1d   : > { %p4366_p9 = scmp.ne.s32.totalorder %s4594_s28, %s4365_s14  ;;  %p4374_p12 = scmp.lt.s32.totalorder %s4365_s14, %s4365_s14 }
  0x1f   : > { %p4368_p10 = pnand %p4366_p9, %p4354_p13  ;;  %p4375_p0 = por %p4374_p12, %p4373_p2 }
  0x21   : > { %p4369_p1 = pneg %p4368_p10 }
  0x23   : > { %p4376_p6 = pnand %p4375_p0, %p4369_p1 }
  0x25   : > { %4379 = shalt.err (!%p4376_p6)
}
  0x26   : > { %s4512_s15 = smov 64   ;;  %s4513_s16 = smov 4  }
  0x27   : > { %3634 = dma.hbm_to_vmem [thread:$0]  (!%p4601_p11), %s6242_s1, 1024, %s4594_s28, [#allocation6], %s4512_s15, %s4512_s15, %s4513_s16  }
  0x28   : > { %s4380_s7 = scalar_lea.hbm %s6244_s3, 1024 }
  0x29   : > { %p4381_p2 = scmp.ne.s32.totalorder %s6244_s3, %s4380_s7  ;;  %p4387_p10 = scmp.lt.u32.totalorder %s4380_s7, %s6244_s3 }
  0x2b   : > { %p4383_p1 = pnand %p4381_p2, %p4354_p13 }
  0x2d   : > { %p4384_p6 = pneg %p4383_p1 }
  0x2f   : > { %p4389_p3 = pnand %p4387_p10, %p4384_p6 }
  0x31   : > { %4392 = shalt.err (!%p4389_p3)
}
  0x32   : > { %s4393_s28 = scalar_lea.vmem %s4605_s6, 1024  ;;  %p4401_p12 = scmp.lt.s32.totalorder %s4605_s6, %s4605_s6 }
  0x33   : > { %p4394_p5 = scmp.ne.s32.totalorder %s4605_s6, %s4393_s28  ;;  %p4402_p0 = scmp.lt.s32.totalorder %s4393_s28, %s4393_s28 }
  0x35   : > { %p4396_p7 = pnand %p4394_p5, %p4354_p13  ;;  %p4403_p2 = por %p4402_p0, %p4401_p12 }
  0x37   : > { %p4397_p9 = pneg %p4396_p7 }
  0x39   : > { %p4404_p1 = pnand %p4403_p2, %p4397_p9 }
  0x3b   : > { %4407 = shalt.err (!%p4404_p1)
}
  0x3c   : > { %3637 = dma.hbm_to_vmem [thread:$0]  (!%p4601_p11), %s6244_s3, 1024, %s4605_s6, [#allocation6], %s4512_s15, %s4512_s15, %s4513_s16  }
  0x3d   : > { %s4660_s14 = sadd.s32 1, %s4508_s21   ;;  %s29_s29 = sadd.s32 1, %s4504_s20 }
  0x3e   : > { %s26_s17 = ssub.s32 %s4508_s21, %s4660_s14  ;;  %p36_p13 = scmp.ne.s32.totalorder %s4504_s20, %s4500_s19 }
  0x3f   : > { %p27_p6 = scmp.eq.s32.totalorder %s26_s17, 0  ;;  %p37_p10 = scmp.eq.s32.totalorder %s4508_s21, 0 }
  0x40   : > { %p6254_p3 = scmp.eq.s32.totalorder %s4571_s22, 1  ;;  %p3648_p7 = scmp.lt.s32.totalorder %s4508_s21, 2 }
  0x41   : > { %s4676_s27 = scalar_select %p27_p6, %s4504_s20, %s29_s29  }
  0x42   : > { %p4670_p5 = por %p6254_p3, %p36_p13  ;;  %p38_p9 = por %p37_p10, %p36_p13 }
  0x43   : > { %s208_s30 = sand.u32 1, %s4504_s20   ;;  %s3185_s6 = sshll.u32 %s4508_s21, 14 }
  0x44   : > { %s6255_s23 = scalar_select %p4670_p5, 1, 0 }
  0x45   : > { %s3154_s7 = sshll.u32 %s208_s30, 10  ;;  %s4683_s8 = scalar_lea.hbm %s6241_s0, %s3185_s6 }
  0x46   : > { %s212_s9 = scalar_lea.vmem [#allocation2], %s3154_s7  ;;  %p4687_p11 = pnand %p3648_p7, %p38_p9 }
  0x47   : > { %s219_s10 = sshll.u32 %s212_s9, 4  ;;  %s4691_s28 = scalar_lea.sflag [#allocation3], %s208_s30  ;;  %s4685_s10 = int_to_ptr.vmem [resolvable:$true] %s219_s10 }
  0x48   : > { %s4408_s12 = scalar_lea.hbm %s4683_s8, 16384  ;;  %p4410_p0 = pneg %p4687_p11 }
  0x49   : > { %p4409_p12 = scmp.ne.s32.totalorder %s4683_s8, %s4408_s12  ;;  %s4413_s17 = scalar_lea.hbm %s6241_s0, 32768 }
  0x4a   : > { %p4414_p13 = scmp.lt.u32.totalorder %s4683_s8, %s6241_s0  ;;  %p4415_p6 = scmp.lt.u32.totalorder %s4413_s17, %s4408_s12 }
  0x4b   : > { %p4411_p2 = pnand %p4410_p0, %p4409_p12  ;;  %p4417_p3 = scmp.lt.u32.totalorder %s4408_s12, %s4683_s8 }
  0x4c   : > { %p4416_p10 = por %p4415_p6, %p4414_p13 }
  0x4d   : > { %p4412_p1 = pneg %p4411_p2 }
  0x4e   : > { %p4418_p7 = por %p4417_p3, %p4416_p10 }
  0x50   : > { %p4419_p9 = pnand %p4418_p7, %p4412_p1 }
  0x52   : > { %4422 = shalt.err (!%p4419_p9)
}
  0x53   : > { %s4423_s30 = scalar_lea.vmem %s4685_s10, 16384  ;;  %s4514_s15 = smov [#allocation2]  }
  0x54   : > { %p4424_p12 = scmp.ne.s32.totalorder %s4685_s10, %s4423_s30  ;;  %s4428_s16 = sshll.u32 %s4514_s15, 4  ;;  %s4429_s16 = int_to_ptr.vmem [resolvable:$false] %s4428_s16 }
  0x55   : > { %s4430_s9 = scalar_lea.vmem %s4429_s16, 32768  ;;  %p4431_p4 = scmp.lt.s32.totalorder %s4685_s10, %s4429_s16 }
  0x56   : > { %p4426_p2 = pnand %p4424_p12, %p4410_p0  ;;  %p4432_p13 = scmp.lt.s32.totalorder %s4430_s9, %s4423_s30 }
  0x58   : > { %p4427_p5 = pneg %p4426_p2  ;;  %p4433_p6 = por %p4432_p13, %p4431_p4 }
  0x5a   : > { %p4434_p10 = pnand %p4433_p6, %p4427_p5 }
  0x5c   : > { %4437 = shalt.err (!%p4434_p10)
}
  0x5d   : > { %s4515_s12 = smov 128   ;;  %s4516_s13 = smov 8  }
  0x5e   : > { %3641 = dma.hbm_to_vmem [thread:$0]  (!%p4687_p11), %s4683_s8, 16384, %s4685_s10, %s4691_s28, %s4515_s12, %s4515_s12, %s4516_s13  }
  0x5f   : > { %231 = sbr.rel (%p4590_p8) target bundleno = 884 (0x374), region = 40  ;;  %s4722_s29 = sand.u32 (!%p4590_p8), 1, %s4500_s19  }
  0x60   : > { %s3158_s17 = sshll.u32 (!%p4590_p8), %s4722_s29, 10  ;;  %s234_s7 = scalar_lea.sflag (!%p4590_p8), [#allocation3], %s4722_s29 }
  0x61   : > { %s4728_s6 = scalar_lea.vmem (!%p4590_p8), [#allocation2], %s3158_s17  ;;  %p6257_p4 = scmp.ne.s32.totalorder (!%p4590_p8), %s6250_s24, 0 }
  0x66   : > { %4483 = dma.done.wait (%p6257_p4), %s234_s7, 16384  }
  0x67   : > { %4485 = vsyncadd (%p6257_p4), %s234_s7, 4294950912  ;;  %p6258_p5 = scmp.eq.s32.totalorder %s4571_s22, 0 }
  0x69   : > { %4487 = dma.done.wait (%p6258_p5), [#allocation6], 2048   ;;  %p6259_p8 = pmov %p6258_p5 }
  0x6a   : > { %v3692_v0 = vld [vmem:[#allocation5] sm:$0xff]   ;;  %v3693_v1 = vld [vmem:[#allocation5 + $0x8] sm:$0xff]   ;;  %v3694_v2 = vld [vmem:[#allocation5 + $0x10] sm:$0xff]   ;;  %s5359_s16 = scalar_lea.vmem [#allocation8], %s3158_s17  ;;  %s3186_s7 = sshll.u32 %s4571_s22, 14 }
  0x6b   : > { %4489 = vsyncadd (%p6259_p8), [#allocation6], 4294965248  ;;  %3331 = vmatprep.subr.bf16.mxu0 %v3692_v0  ;;  %v3695_v3 = vld [vmem:[#allocation5 + $0x18] sm:$0xff]   ;;  %v275_v4 = vld [vmem:[%s4728_s6] sm:$0xff]  ;;  %s3057_s24 = sshll.u32 %s5359_s16, 4  ;;  %s6191_s10 = scalar_lea.hbm %s6246_s5, %s3186_s7  ;;  %s6193_s24 = int_to_ptr.vmem [resolvable:$true] %s3057_s24 }
  0x6c   : > { %3332 = vmatpush3.bf16.msra.mxu0 %v3692_v0  ;;  %v276_v5 = vld [vmem:[%s4728_s6 + $0x8] sm:$0xff]  ;;  %v3696_v7 = vld [vmem:[#allocation5 + $0x20] sm:$0xff]   ;;  %v3698_v9 = vld [vmem:[#allocation5 + $0x30] sm:$0xff]   ;;  %s3044_s22 = scalar_lea.sflag [#allocation4], %s4722_s29  ;;  %s4438_s11 = scalar_lea.vmem %s6193_s24, 16384 }
  0x6d   : > { %3333 = vmatprep.subr.bf16.mxu0 %v3693_v1  ;;  %v403_v6 = vpack.c.bf16 %v276_v5, %v275_v4  ;;  %v3697_v8 = vld [vmem:[#allocation5 + $0x28] sm:$0xff]   ;;  %v3699_v10 = vld [vmem:[#allocation5 + $0x38] sm:$0xff]   ;;  %v277_v11 = vld [vmem:[%s4728_s6 + $0x10] sm:$0xff]  ;;  %p4439_p11 = scmp.ne.s32.totalorder %s6193_s24, %s4438_s11  ;;  %p6260_p0 = scmp.ne.s32.totalorder %s6255_s23, 0 }
  0x6e   : > { %v278_v12 = vld [vmem:[%s4728_s6 + $0x18] sm:$0xff]  ;;  %v279_v13 = vld [vmem:[%s4728_s6 + $0x20] sm:$0xff]  ;;  %v280_v14 = vld [vmem:[%s4728_s6 + $0x28] sm:$0xff]  ;;  %s4517_s28 = smov [#allocation8]  }
  0x6f   : > { %3347 = vmatprep.mubr.bf16.mxu0 %v403_v6  ;;  %v404_v15 = vpack.c.bf16 %v278_v12, %v277_v11  ;;  %v405_v16 = vpack.c.bf16 %v280_v14, %v279_v13  ;;  %v281_v17 = vld [vmem:[%s4728_s6 + $0x30] sm:$0xff]  ;;  %v282_v18 = vld [vmem:[%s4728_s6 + $0x38] sm:$0xff]  ;;  %v283_v19 = vld [vmem:[%s4728_s6 + $0x40] sm:$0xff]  ;;  %p4440_p1 = pnand %p4439_p11, %p6260_p0  ;;  %s4442_s30 = sshll.u32 %s4517_s28, 4  ;;  %s4443_s30 = int_to_ptr.vmem [resolvable:$false] %s4442_s30 }
  0x70   : > { %3334 = vmatpush3.bf16.msra.mxu0 %v3693_v1  ;;  %v284_v20 = vld [vmem:[%s4728_s6 + $0x48] sm:$0xff]  ;;  %v406_v21 = vpack.c.bf16 %v282_v18, %v281_v17  ;;  %v285_v23 = vld [vmem:[%s4728_s6 + $0x50] sm:$0xff]  ;;  %v286_v24 = vld [vmem:[%s4728_s6 + $0x58] sm:$0xff]  ;;  %s4444_s15 = scalar_lea.vmem %s4443_s30, 32768  ;;  %p4445_p7 = scmp.lt.s32.totalorder %s6193_s24, %s4443_s30 }
  0x71   : > { %3335 = vmatprep.subr.bf16.mxu0 %v3694_v2  ;;  %v407_v22 = vpack.c.bf16 %v284_v20, %v283_v19  ;;  %v287_v25 = vld [vmem:[%s4728_s6 + $0x60] sm:$0xff]  ;;  %v288_v26 = vld [vmem:[%s4728_s6 + $0x68] sm:$0xff]  ;;  %v408_v27 = vpack.c.bf16 %v286_v24, %v285_v23  ;;  %v289_v29 = vld [vmem:[%s4728_s6 + $0x70] sm:$0xff]  ;;  %p4441_p3 = pneg %p4440_p1  ;;  %p4446_p9 = scmp.lt.s32.totalorder %s4444_s15, %s4438_s11 }
  0x72   : > { %v409_v28 = vpack.c.bf16 %v288_v26, %v287_v25  ;;  %v290_v30 = vld [vmem:[%s4728_s6 + $0x78] sm:$0xff]  ;;  %v291_v31 = vld [vmem:[%s4728_s6 + $0x80] sm:$0xff]  ;;  %v292_v32 = vld [vmem:[%s4728_s6 + $0x88] sm:$0xff] }
  0x73   : > { %v410_v33 = vpack.c.bf16 %v290_v30, %v289_v29  ;;  %v411_v34 = vpack.c.bf16 %v292_v32, %v291_v31  ;;  %v293_v35 = vld [vmem:[%s4728_s6 + $0x90] sm:$0xff]  ;;  %v294_v36 = vld [vmem:[%s4728_s6 + $0x98] sm:$0xff]  ;;  %v295_v37 = vld [vmem:[%s4728_s6 + $0xa0] sm:$0xff]  ;;  %p4447_p12 = por %p4446_p9, %p4445_p7 }
  0x74   : > { %3336 = vmatpush3.bf16.msra.mxu0 %v3694_v2  ;;  %v296_v38 = vld [vmem:[%s4728_s6 + $0xa8] sm:$0xff]  ;;  %v412_v39 = vpack.c.bf16 %v294_v36, %v293_v35  ;;  %v297_v41 = vld [vmem:[%s4728_s6 + $0xb0] sm:$0xff]  ;;  %v298_v42 = vld [vmem:[%s4728_s6 + $0xb8] sm:$0xff] }
  0x75   : > { %3337 = vmatprep.subr.bf16.mxu0 %v3695_v3  ;;  %v413_v40 = vpack.c.bf16 %v296_v38, %v295_v37  ;;  %v299_v43 = vld [vmem:[%s4728_s6 + $0xc0] sm:$0xff]  ;;  %v300_v44 = vld [vmem:[%s4728_s6 + $0xc8] sm:$0xff]  ;;  %v414_v45 = vpack.c.bf16 %v298_v42, %v297_v41  ;;  %v301_v47 = vld [vmem:[%s4728_s6 + $0xd0] sm:$0xff]  ;;  %p4448_p2 = pnand %p4447_p12, %p4441_p3 }
  0x76   : > { %v415_v46 = vpack.c.bf16 %v300_v44, %v299_v43  ;;  %v302_v48 = vld [vmem:[%s4728_s6 + $0xd8] sm:$0xff]  ;;  %v303_v49 = vld [vmem:[%s4728_s6 + $0xe0] sm:$0xff]  ;;  %v304_v50 = vld [vmem:[%s4728_s6 + $0xe8] sm:$0xff] }
  0x77   : > { %v416_v51 = vpack.c.bf16 %v302_v48, %v301_v47  ;;  %v417_v52 = vpack.c.bf16 %v304_v50, %v303_v49  ;;  %v305_v53 = vld [vmem:[%s4728_s6 + $0xf0] sm:$0xff]  ;;  %v306_v54 = vld [vmem:[%s4728_s6 + $0xf8] sm:$0xff]  ;;  %v307_v55 = vld [vmem:[%s4728_s6 + $0x100] sm:$0xff] }
  0x78   : > { %3338 = vmatpush3.bf16.msra.mxu0 %v3695_v3  ;;  %v308_v56 = vld [vmem:[%s4728_s6 + $0x108] sm:$0xff]  ;;  %v418_v57 = vpack.c.bf16 %v306_v54, %v305_v53  ;;  %v309_v59 = vld [vmem:[%s4728_s6 + $0x110] sm:$0xff]  ;;  %v310_v60 = vld [vmem:[%s4728_s6 + $0x118] sm:$0xff] }
  0x79   : > { %3339 = vmatprep.subr.bf16.mxu0 %v3696_v7  ;;  %v419_v58 = vpack.c.bf16 %v308_v56, %v307_v55  ;;  %v311_v61 = vld [vmem:[%s4728_s6 + $0x120] sm:$0xff]  ;;  %v312_v62 = vld [vmem:[%s4728_s6 + $0x128] sm:$0xff]  ;;  %v420_v63 = vpack.c.bf16 %v310_v60, %v309_v59  ;;  %v313_v1 = vld [vmem:[%s4728_s6 + $0x130] sm:$0xff] }
  0x7a   : > { %v421_v0 = vpack.c.bf16 %v312_v62, %v311_v61  ;;  %v314_v2 = vld [vmem:[%s4728_s6 + $0x138] sm:$0xff]  ;;  %v315_v3 = vld [vmem:[%s4728_s6 + $0x140] sm:$0xff]  ;;  %v316_v4 = vld [vmem:[%s4728_s6 + $0x148] sm:$0xff] }
  0x7b   : > { %v422_v5 = vpack.c.bf16 %v314_v2, %v313_v1  ;;  %v423_v6 = vpack.c.bf16 %v316_v4, %v315_v3  ;;  %v320_v11 = vld [vmem:[%s4728_s6 + $0x168] sm:$0xff]  ;;  %v323_v17 = vld [vmem:[%s4728_s6 + $0x180] sm:$0xff]  ;;  %v3702_v19 = vld [vmem:[#allocation7 + $0x10] sm:$0xff]  }
  0x7c   : > { %3340 = vmatpush3.bf16.msra.mxu0 %v3696_v7  ;;  %v3700_v7 = vld [vmem:[#allocation7] sm:$0xff]   ;;  %v3701_v14 = vld [vmem:[#allocation7 + $0x8] sm:$0xff]   ;;  %v325_v23 = vld [vmem:[%s4728_s6 + $0x190] sm:$0xff] }
  0x7d   : > { %3341 = vmatprep.subr.bf16.mxu0 %v3697_v8  ;;  %3475 = vmatprep.subr.bf16.mxu1 %v3700_v7  ;;  %v324_v18 = vld [vmem:[%s4728_s6 + $0x188] sm:$0xff]  ;;  %v326_v24 = vld [vmem:[%s4728_s6 + $0x198] sm:$0xff]  ;;  %v327_v25 = vld [vmem:[%s4728_s6 + $0x1a0] sm:$0xff] }
  0x7e   : > { %3476 = vmatpush3.bf16.msra.mxu1 %v3700_v7  ;;  %v328_v26 = vld [vmem:[%s4728_s6 + $0x1a8] sm:$0xff]  ;;  %v329_v31 = vld [vmem:[%s4728_s6 + $0x1b0] sm:$0xff]  ;;  %v330_v32 = vld [vmem:[%s4728_s6 + $0x1b8] sm:$0xff] }
  0x7f   : > { %3477 = vmatprep.subr.bf16.mxu1 %v3701_v14  ;;  %v429_v29 = vpack.c.bf16 %v328_v26, %v327_v25  ;;  %v3705_v30 = vld [vmem:[#allocation7 + $0x28] sm:$0xff]   ;;  %v3706_v35 = vld [vmem:[#allocation7 + $0x30] sm:$0xff]   ;;  %v430_v36 = vpack.c.bf16 %v330_v32, %v329_v31  ;;  %v3707_v38 = vld [vmem:[#allocation7 + $0x38] sm:$0xff]  }
  0x80   : > { %3342 = vmatpush3.bf16.msra.mxu0 %v3697_v8  ;;  %v317_v8 = vld [vmem:[%s4728_s6 + $0x150] sm:$0xff]  ;;  %v335_v41 = vld [vmem:[%s4728_s6 + $0x1e0] sm:$0xff]  ;;  %v336_v42 = vld [vmem:[%s4728_s6 + $0x1e8] sm:$0xff] }
  0x81   : > { %3343 = vmatprep.subr.bf16.mxu0 %v3698_v9  ;;  %v433_v44 = vpack.c.bf16 %v336_v42, %v335_v41  ;;  %v339_v47 = vld [vmem:[%s4728_s6 + $0x200] sm:$0xff]  ;;  %v340_v48 = vld [vmem:[%s4728_s6 + $0x208] sm:$0xff]  ;;  %v377_v41 = vld [vmem:[%s4728_s6 + $0x330] sm:$0xff] }
  0x82   : > { %3478 = vmatpush3.bf16.msra.mxu1 %v3701_v14  ;;  %v435_v50 = vpack.c.bf16 %v340_v48, %v339_v47  ;;  %v343_v53 = vld [vmem:[%s4728_s6 + $0x220] sm:$0xff]  ;;  %v344_v54 = vld [vmem:[%s4728_s6 + $0x228] sm:$0xff]  ;;  %v378_v42 = vld [vmem:[%s4728_s6 + $0x338] sm:$0xff] }
  0x83   : > { %3479 = vmatprep.subr.bf16.mxu1 %v3702_v19  ;;  %v437_v56 = vpack.c.bf16 %v344_v54, %v343_v53  ;;  %v347_v59 = vld [vmem:[%s4728_s6 + $0x240] sm:$0xff]  ;;  %v348_v60 = vld [vmem:[%s4728_s6 + $0x248] sm:$0xff]  ;;  %v381_v47 = vld [vmem:[%s4728_s6 + $0x350] sm:$0xff] }
  0x84   : > { %3344 = vmatpush3.bf16.msra.mxu0 %v3698_v9  ;;  %v318_v9 = vld [vmem:[%s4728_s6 + $0x158] sm:$0xff]  ;;  %v439_v62 = vpack.c.bf16 %v348_v60, %v347_v59  ;;  %v351_v1 = vld [vmem:[%s4728_s6 + $0x260] sm:$0xff]  ;;  %v352_v2 = vld [vmem:[%s4728_s6 + $0x268] sm:$0xff] }
  0x85   : > { %3345 = vmatprep.subr.bf16.mxu0 %v3699_v10  ;;  %v424_v12 = vpack.c.bf16 %v318_v9, %v317_v8  ;;  %v441_v4 = vpack.c.bf16 %v352_v2, %v351_v1  ;;  %v355_v7 = vld [vmem:[%s4728_s6 + $0x280] sm:$0xff]  ;;  %v356_v8 = vld [vmem:[%s4728_s6 + $0x288] sm:$0xff]  ;;  %v382_v48 = vld [vmem:[%s4728_s6 + $0x358] sm:$0xff] }
  0x86   : > { %3480 = vmatpush3.bf16.msra.mxu1 %v3702_v19  ;;  %v360_v14 = vld [vmem:[%s4728_s6 + $0x2a8] sm:$0xff]  ;;  %v363_v19 = vld [vmem:[%s4728_s6 + $0x2c0] sm:$0xff]  ;;  %v385_v54 = vld [vmem:[%s4728_s6 + $0x370] sm:$0xff] }
  0x87   : > { %v367_v25 = vld [vmem:[%s4728_s6 + $0x2e0] sm:$0xff]  ;;  %v368_v26 = vld [vmem:[%s4728_s6 + $0x2e8] sm:$0xff] }
  0x88   : > { %3346 = vmatpush3.bf16.msra.mxu0 %v3699_v10  ;;  %v319_v10 = vld [vmem:[%s4728_s6 + $0x160] sm:$0xff]  ;;  %v372_v32 = vld [vmem:[%s4728_s6 + $0x308] sm:$0xff] }
  0x89   : > { %v425_v13 = vpack.c.bf16 %v320_v11, %v319_v10  ;;  %v443_v10 = vpack.c.bf16 %v356_v8, %v355_v7  ;;  %v357_v11 = vld [vmem:[%s4728_s6 + $0x290] sm:$0xff]  ;;  %v371_v31 = vld [vmem:[%s4728_s6 + $0x300] sm:$0xff] }
  0x8a   : > { %v4851_v53 = vld [vmem:[%s6243_s2] ss:$0 sm:$0xff]  ;;  %v389_v8 = vld [vmem:[%s4728_s6 + $0x390] sm:$0xff] }
  0x8b   : > { %3348 = vmatmul.mubr.bf16.vlgmr.msra.gmra.mrb[0].mxu0 %v404_v15  ;;  %v321_v15 = vld [vmem:[%s4728_s6 + $0x170] sm:$0xff] }
  0x8c   : > { %3351 = vmatprep.mubr.bf16.mxu0 %v405_v16  ;;  %v322_v16 = vld [vmem:[%s4728_s6 + $0x178] sm:$0xff] }
  0x8d   : > { %v426_v20 = vpack.c.bf16 %v322_v16, %v321_v15 }
  0x93   : > { %3352 = vmatmul.mubr.bf16.gmra.mrb[4].mxu0 %v406_v21  ;;  %v427_v21 = vpack.c.bf16 %v324_v18, %v323_v17  ;;  %v361_v17 = vld [vmem:[%s4728_s6 + $0x2b0] sm:$0xff]  ;;  %v362_v18 = vld [vmem:[%s4728_s6 + $0x2b8] sm:$0xff] }
  0x94   : > { %3355 = vmatprep.mubr.bf16.mxu0 %v407_v22  ;;  %v3703_v22 = vld [vmem:[#allocation7 + $0x18] sm:$0xff]  }
  0x95   : > { %3481 = vmatprep.subr.bf16.mxu1 %v3703_v22 }
  0x96   : > { %3482 = vmatpush3.bf16.msra.mxu1 %v3703_v22 }
  0x9b   : > { %3356 = vmatmul.mubr.bf16.gmra.mrb[8].mxu0 %v408_v27  ;;  %v3704_v27 = vld [vmem:[#allocation7 + $0x20] sm:$0xff]  }
  0x9c   : > { %3359 = vmatprep.mubr.bf16.mxu0 %v409_v28  ;;  %v428_v28 = vpack.c.bf16 %v326_v24, %v325_v23  ;;  %3483 = vmatprep.subr.bf16.mxu1 %v3704_v27  ;;  %v365_v23 = vld [vmem:[%s4728_s6 + $0x2d0] sm:$0xff]  ;;  %v366_v24 = vld [vmem:[%s4728_s6 + $0x2d8] sm:$0xff] }
  0x9d   : > { %3484 = vmatpush3.bf16.msra.mxu1 %v3704_v27  ;;  %v448_v27 = vpack.c.bf16 %v366_v24, %v365_v23 }
  0x9e   : > { %3485 = vmatprep.subr.bf16.mxu1 %v3705_v30 }
  0xa1   : > { %3486 = vmatpush3.bf16.msra.mxu1 %v3705_v30  ;;  %v370_v30 = vld [vmem:[%s4728_s6 + $0x2f8] sm:$0xff] }
  0xa2   : > { %3487 = vmatprep.subr.bf16.mxu1 %v3706_v35 }
  0xa3   : > { %3360 = vmatmul.mubr.bf16.gmra.mrb[12].mxu0 %v410_v33  ;;  %v331_v33 = vld [vmem:[%s4728_s6 + $0x1c0] sm:$0xff] }
  0xa4   : > { %3363 = vmatprep.mubr.bf16.mxu0 %v411_v34  ;;  %v332_v34 = vld [vmem:[%s4728_s6 + $0x1c8] sm:$0xff] }
  0xa5   : > { %v431_v37 = vpack.c.bf16 %v332_v34, %v331_v33  ;;  %3488 = vmatpush3.bf16.msra.mxu1 %v3706_v35  ;;  %v451_v34 = vpack.c.bf16 %v372_v32, %v371_v31  ;;  %v373_v35 = vld [vmem:[%s4728_s6 + $0x310] sm:$0xff] }
  0xa6   : > { %3489 = vmatprep.subr.bf16.mxu1 %v3707_v38 }
  0xa9   : > { %3490 = vmatpush3.bf16.msra.mxu1 %v3707_v38  ;;  %v376_v38 = vld [vmem:[%s4728_s6 + $0x328] sm:$0xff] }
  0xab   : > { %3364 = vmatmul.mubr.bf16.gmra.mrb[16].mxu0 %v412_v39  ;;  %v333_v39 = vld [vmem:[%s4728_s6 + $0x1d0] sm:$0xff] }
  0xac   : > { %3367 = vmatprep.mubr.bf16.mxu0 %v413_v40  ;;  %v334_v40 = vld [vmem:[%s4728_s6 + $0x1d8] sm:$0xff] }
  0xad   : > { %v432_v43 = vpack.c.bf16 %v334_v40, %v333_v39 }
  0xb3   : > { %3368 = vmatmul.mubr.bf16.gmra.mrb[20].mxu0 %v414_v45  ;;  %v337_v45 = vld [vmem:[%s4728_s6 + $0x1f0] sm:$0xff] }
  0xb4   : > { %3371 = vmatprep.mubr.bf16.mxu0 %v415_v46  ;;  %v338_v46 = vld [vmem:[%s4728_s6 + $0x1f8] sm:$0xff] }
  0xb5   : > { %v434_v49 = vpack.c.bf16 %v338_v46, %v337_v45  ;;  %v454_v45 = vpack.c.bf16 %v378_v42, %v377_v41 }
  0xbb   : > { %3372 = vmatmul.mubr.bf16.gmra.mrb[24].mxu0 %v416_v51  ;;  %v341_v51 = vld [vmem:[%s4728_s6 + $0x210] sm:$0xff] }
  0xbc   : > { %3375 = vmatprep.mubr.bf16.mxu0 %v417_v52  ;;  %v342_v52 = vld [vmem:[%s4728_s6 + $0x218] sm:$0xff] }
  0xbd   : > { %v436_v55 = vpack.c.bf16 %v342_v52, %v341_v51  ;;  %v456_v51 = vpack.c.bf16 %v382_v48, %v381_v47 }
  0xc3   : > { %3376 = vmatmul.mubr.bf16.gmra.mrb[28].mxu0 %v418_v57  ;;  %v345_v57 = vld [vmem:[%s4728_s6 + $0x230] sm:$0xff] }
  0xc4   : > { %3379 = vmatprep.mubr.bf16.mxu0 %v419_v58  ;;  %v346_v58 = vld [vmem:[%s4728_s6 + $0x238] sm:$0xff] }
  0xc5   : > { %v438_v61 = vpack.c.bf16 %v346_v58, %v345_v57  ;;  %v388_v57 = vld [vmem:[%s4728_s6 + $0x388] sm:$0xff] }
  0xcb   : > { %3380 = vmatmul.mubr.bf16.gmra.mrb[32].mxu0 %v420_v63  ;;  %v349_v63 = vld [vmem:[%s4728_s6 + $0x250] sm:$0xff] }
  0xcc   : > { %3383 = vmatprep.mubr.bf16.mxu0 %v421_v0  ;;  %v350_v0 = vld [vmem:[%s4728_s6 + $0x258] sm:$0xff] }
  0xcd   : > { %v440_v3 = vpack.c.bf16 %v350_v0, %v349_v63 }
  0xd3   : > { %3384 = vmatmul.mubr.bf16.gmra.mrb[36].mxu0 %v422_v5  ;;  %v353_v5 = vld [vmem:[%s4728_s6 + $0x270] sm:$0xff] }
  0xd4   : > { %3387 = vmatprep.mubr.bf16.mxu0 %v423_v6  ;;  %v354_v6 = vld [vmem:[%s4728_s6 + $0x278] sm:$0xff] }
  0xd5   : > { %v442_v9 = vpack.c.bf16 %v354_v6, %v353_v5 }
  0xdb   : > { %3388 = vmatmul.mubr.bf16.gmra.mrb[40].mxu0 %v424_v12  ;;  %v358_v12 = vld [vmem:[%s4728_s6 + $0x298] sm:$0xff] }
  0xdc   : > { %3391 = vmatprep.mubr.bf16.mxu0 %v425_v13  ;;  %v359_v13 = vld [vmem:[%s4728_s6 + $0x2a0] sm:$0xff]  ;;  %v444_v15 = vpack.c.bf16 %v358_v12, %v357_v11  ;;  %v392_v11 = vld [vmem:[%s4728_s6 + $0x3a8] sm:$0xff] }
  0xdd   : > { %v445_v16 = vpack.c.bf16 %v360_v14, %v359_v13 }
  0xe3   : > { %3392 = vmatmul.mubr.bf16.gmra.mrb[44].mxu0 %v426_v20  ;;  %v364_v20 = vld [vmem:[%s4728_s6 + $0x2c8] sm:$0xff] }
  0xe4   : > { %3395 = vmatprep.mubr.bf16.mxu0 %v427_v21  ;;  %v446_v21 = vpack.c.bf16 %v362_v18, %v361_v17  ;;  %v447_v22 = vpack.c.bf16 %v364_v20, %v363_v19 }
  0xeb   : > { %3396 = vmatmul.mubr.bf16.gmra.mrb[48].mxu0 %v428_v28  ;;  %v449_v28 = vpack.c.bf16 %v368_v26, %v367_v25  ;;  %v393_v26 = vld [vmem:[%s4728_s6 + $0x3b0] sm:$0xff] }
  0xec   : > { %3399 = vmatprep.mubr.bf16.mxu0 %v429_v29  ;;  %v369_v29 = vld [vmem:[%s4728_s6 + $0x2f0] sm:$0xff] }
  0xed   : > { %v450_v33 = vpack.c.bf16 %v370_v30, %v369_v29  ;;  %v395_v29 = vld [vmem:[%s4728_s6 + $0x3c0] sm:$0xff]  ;;  %v396_v30 = vld [vmem:[%s4728_s6 + $0x3c8] sm:$0xff] }
  0xf3   : > { %3400 = vmatmul.mubr.bf16.gmra.mrb[52].mxu0 %v430_v36  ;;  %v374_v36 = vld [vmem:[%s4728_s6 + $0x318] sm:$0xff] }
  0xf4   : > { %3403 = vmatprep.mubr.bf16.mxu0 %v431_v37  ;;  %v375_v37 = vld [vmem:[%s4728_s6 + $0x320] sm:$0xff]  ;;  %v452_v39 = vpack.c.bf16 %v374_v36, %v373_v35 }
  0xf5   : > { %v453_v40 = vpack.c.bf16 %v376_v38, %v375_v37 }
  0xfb   : > { %3404 = vmatmul.mubr.bf16.gmra.mrb[56].mxu0 %v432_v43  ;;  %v379_v43 = vld [vmem:[%s4728_s6 + $0x340] sm:$0xff] }
  0xfc   : > { %3407 = vmatprep.mubr.bf16.mxu0 %v433_v44  ;;  %v380_v44 = vld [vmem:[%s4728_s6 + $0x348] sm:$0xff] }
  0xfd   : > { %v455_v46 = vpack.c.bf16 %v380_v44, %v379_v43  ;;  %v463_v43 = vpack.c.bf16 %v396_v30, %v395_v29  ;;  %v402_v29 = vld [vmem:[%s4728_s6 + $0x3f8] sm:$0xff] }
 0x103   : > { %3408 = vmatmul.mubr.bf16.gmra.mrb[60].mxu0 %v434_v49  ;;  %v383_v49 = vld [vmem:[%s4728_s6 + $0x360] sm:$0xff] }
 0x104   : > { %3411 = vmatprep.mubr.bf16.mxu0 %v435_v50  ;;  %v384_v50 = vld [vmem:[%s4728_s6 + $0x368] sm:$0xff] }
 0x105   : > { %v457_v52 = vpack.c.bf16 %v384_v50, %v383_v49 }
 0x10b   : > { %3412 = vmatmul.mubr.bf16.gmra.mrb[64].mxu0 %v436_v55  ;;  %v386_v55 = vld [vmem:[%s4728_s6 + $0x378] sm:$0xff] }
 0x10c   : > { %3415 = vmatprep.mubr.bf16.mxu0 %v437_v56  ;;  %v387_v56 = vld [vmem:[%s4728_s6 + $0x380] sm:$0xff] }
 0x10d   : > { %v459_v0 = vpack.c.bf16 %v388_v57, %v387_v56 }
 0x113   : > { %3416 = vmatmul.mubr.bf16.gmra.mrb[68].mxu0 %v438_v61  ;;  %v458_v61 = vpack.c.bf16 %v386_v55, %v385_v54 }
 0x114   : > { %3419 = vmatprep.mubr.bf16.mxu0 %v439_v62 }
 0x11b   : > { %3420 = vmatmul.mubr.bf16.gmra.mrb[72].mxu0 %v440_v3 }
 0x11c   : > { %3423 = vmatprep.mubr.bf16.mxu0 %v441_v4 }
 0x123   : > { %3424 = vmatmul.mubr.bf16.gmra.mrb[76].mxu0 %v442_v9  ;;  %v390_v9 = vld [vmem:[%s4728_s6 + $0x398] sm:$0xff] }
 0x124   : > { %3427 = vmatprep.mubr.bf16.mxu0 %v443_v10  ;;  %v391_v10 = vld [vmem:[%s4728_s6 + $0x3a0] sm:$0xff] }
 0x125   : > { %v461_v18 = vpack.c.bf16 %v392_v11, %v391_v10 }
 0x12b   : > { %3428 = vmatmul.mubr.bf16.gmra.mrb[80].mxu0 %v444_v15  ;;  %v460_v15 = vpack.c.bf16 %v390_v9, %v389_v8 }
 0x12c   : > { %3431 = vmatprep.mubr.bf16.mxu0 %v445_v16 }
 0x133   : > { %3432 = vmatmul.mubr.bf16.gmra.mrb[84].mxu0 %v446_v21 }
 0x134   : > { %3435 = vmatprep.mubr.bf16.mxu0 %v447_v22 }
 0x13b   : > { %3436 = vmatmul.mubr.bf16.gmra.mrb[88].mxu0 %v448_v27  ;;  %v394_v27 = vld [vmem:[%s4728_s6 + $0x3b8] sm:$0xff] }
 0x13c   : > { %3439 = vmatprep.mubr.bf16.mxu0 %v449_v28  ;;  %v462_v37 = vpack.c.bf16 %v394_v27, %v393_v26 }
 0x143   : > { %3440 = vmatmul.mubr.bf16.gmra.mrb[92].mxu0 %v450_v33 }
 0x144   : > { %3443 = vmatprep.mubr.bf16.mxu0 %v451_v34 }
 0x14b   : > { %3444 = vmatmul.mubr.bf16.gmra.mrb[96].mxu0 %v452_v39 }
 0x14c   : > { %3447 = vmatprep.mubr.bf16.mxu0 %v453_v40 }
 0x153   : > { %3448 = vmatmul.mubr.bf16.gmra.mrb[100].mxu0 %v454_v45 }
 0x154   : > { %3451 = vmatprep.mubr.bf16.mxu0 %v455_v46 }
 0x15b   : > { %3452 = vmatmul.mubr.bf16.gmra.mrb[104].mxu0 %v456_v51 }
 0x15c   : > { %3455 = vmatprep.mubr.bf16.mxu0 %v457_v52 }
 0x15e   : > { %v3349_v58 = vpop.f32.mrb[0].mxu0 }
 0x15f   : > { %v581_v59 = vadd.f32 %v3349_v58, %v4851_v53  ;;  %v572_v60 = vpop.f32.mrb[1].mxu0  ;;  %v397_v58 = vld [vmem:[%s4728_s6 + $0x3d0] sm:$0xff] }
 0x160   : > { %v573_v62 = vadd.f32 %v4851_v53, %v572_v60  ;;  %v3350_v63 = vpop.f32.mrb[2].mxu0 }
 0x161   : > { %v1085_v1 = vmul.f32 0.5, %v581_v59  ;;  %v584_v2 = vadd.f32 %v3350_v63, %v4851_v53  ;;  %v575_v3 = vpop.f32.mrb[3].mxu0  ;;  %v398_v59 = vld [vmem:[%s4728_s6 + $0x3d8] sm:$0xff]  ;;  %v400_v63 = vld [vmem:[%s4728_s6 + $0x3e8] sm:$0xff] }
 0x162   : > { %v4860_v4 = vmul.f32 0.5, %v573_v62  ;;  %v576_v5 = vadd.f32 %v4851_v53, %v575_v3  ;;  %v399_v62 = vld [vmem:[%s4728_s6 + $0x3e0] sm:$0xff] }
 0x163   : > { %3708 = vtanh.f32 %v1085_v1  ;;  %v1086_v6 = vmul.f32 0.5, %v584_v2  ;;  %3456 = vmatmul.mubr.bf16.gmra.mrb[108].mxu0 %v458_v61 }
 0x164   : > { %3710 = vtanh.f32 %v4860_v4  ;;  %v1084_v7 = vmul.f32 0.5, %v576_v5  ;;  %3459 = vmatprep.mubr.bf16.mxu0 %v459_v0 }
 0x165   : > { %3712 = vtanh.f32 %v1086_v6 }
 0x166   : > { %3714 = vtanh.f32 %v1084_v7  ;;  %v3353_v12 = vpop.f32.mrb[4].mxu0 }
 0x167   : > { %v597_v13 = vadd.f32 %v3353_v12, %v4851_v53  ;;  %v588_v14 = vpop.f32.mrb[5].mxu0  ;;  %v465_v12 = vpack.c.bf16 %v400_v63, %v399_v62 }
 0x168   : > { %v589_v16 = vadd.f32 %v4851_v53, %v588_v14  ;;  %v3354_v17 = vpop.f32.mrb[6].mxu0 }
 0x169   : > { %v4870_v19 = vmul.f32 0.5, %v597_v13  ;;  %v600_v20 = vadd.f32 %v3354_v17, %v4851_v53  ;;  %v591_v21 = vpop.f32.mrb[7].mxu0 }
 0x16a   : > { %v4873_v22 = vmul.f32 0.5, %v589_v16  ;;  %v592_v23 = vadd.f32 %v4851_v53, %v591_v21 }
 0x16b   : > { %3716 = vtanh.f32 %v4870_v19  ;;  %v4877_v24 = vmul.f32 0.5, %v600_v20  ;;  %3460 = vmatmul.mubr.bf16.gmra.mrb[112].mxu0 %v460_v15 }
 0x16c   : > { %3718 = vtanh.f32 %v4873_v22  ;;  %v4880_v25 = vmul.f32 0.5, %v592_v23  ;;  %3463 = vmatprep.mubr.bf16.mxu0 %v461_v18 }
 0x16d   : > { %v3709_v28 = vpop.eup %3708  ;;  %3720 = vtanh.f32 %v4877_v24 }
 0x16e   : > { %v3711_v31 = vpop.eup %3710  ;;  %v1341_v32 = vadd.f32 1.0, %v3709_v28  ;;  %3722 = vtanh.f32 %v4880_v25  ;;  %v3357_v33 = vpop.f32.mrb[8].mxu0 }
 0x16f   : > { %v3713_v34 = vpop.eup %3712  ;;  %v613_v35 = vadd.f32 %v3357_v33, %v4851_v53  ;;  %v604_v36 = vpop.f32.mrb[9].mxu0  ;;  %v1339_v38 = vadd.f32 1.0, %v3711_v31 }
 0x170   : > { %v3715_v39 = vpop.eup %3714  ;;  %v1342_v40 = vadd.f32 1.0, %v3713_v34  ;;  %v605_v41 = vadd.f32 %v4851_v53, %v604_v36  ;;  %v3358_v42 = vpop.f32.mrb[10].mxu0  ;;  %v1469_v48 = vmul.f32 %v1341_v32, %v1085_v1 }
 0x171   : > { %v4890_v44 = vmul.f32 0.5, %v613_v35  ;;  %v616_v45 = vadd.f32 %v3358_v42, %v4851_v53  ;;  %v607_v46 = vpop.f32.mrb[11].mxu0  ;;  %v1340_v47 = vadd.f32 1.0, %v3715_v39  ;;  %v1467_v54 = vmul.f32 %v1339_v38, %v4860_v4 }
 0x172   : > { %v1470_v49 = vmul.f32 %v1342_v40, %v1086_v6  ;;  %v4893_v50 = vmul.f32 0.5, %v605_v41  ;;  %v608_v51 = vadd.f32 %v4851_v53, %v607_v46 }
 0x173   : > { %3724 = vtanh.f32 %v4890_v44  ;;  %v4897_v52 = vmul.f32 0.5, %v616_v45  ;;  %3464 = vmatmul.mubr.bf16.gmra.mrb[116].mxu0 %v462_v37  ;;  %v1468_v55 = vmul.f32 %v1340_v47, %v1084_v7  ;;  %v464_v7 = vpack.c.bf16 %v398_v59, %v397_v58 }
 0x174   : > { %3726 = vtanh.f32 %v4893_v50  ;;  %v4901_v56 = vmul.f32 0.5, %v608_v51  ;;  %v1596_v57 = vpack.c.bf16 %v1470_v49, %v1469_v48  ;;  %3467 = vmatprep.mubr.bf16.mxu0 %v463_v43 }
 0x175   : > { %v3717_v60 = vpop.eup %3716  ;;  %3728 = vtanh.f32 %v4897_v52  ;;  %v1595_v61 = vpack.c.bf16 %v1468_v55, %v1467_v54 }
 0x176   : > { %v3719_v0 = vpop.eup %3718  ;;  %v1345_v1 = vadd.f32 1.0, %v3717_v60  ;;  %3730 = vtanh.f32 %v4901_v56  ;;  %v3361_v2 = vpop.f32.mrb[12].mxu0 }
 0x177   : > { %v3721_v3 = vpop.eup %3720  ;;  %v1343_v4 = vadd.f32 1.0, %v3719_v0  ;;  %v629_v5 = vadd.f32 %v3361_v2, %v4851_v53  ;;  %v620_v6 = vpop.f32.mrb[13].mxu0  ;;  %3491 = vmatprep.mubr.bf16.mxu1 %v1595_v61 }
 0x178   : > { %v3723_v8 = vpop.eup %3722  ;;  %v1346_v9 = vadd.f32 1.0, %v3721_v3  ;;  %v621_v10 = vadd.f32 %v4851_v53, %v620_v6  ;;  %v3362_v11 = vpop.f32.mrb[14].mxu0  ;;  %3492 = vmatmul.mubr.bf16.vlgmr.msra.gmra.mrb[0].mxu1 %v1596_v57  ;;  %v1473_v17 = vmul.f32 %v1345_v1, %v4870_v19 }
 0x179   : > { %v1344_v13 = vadd.f32 1.0, %v3723_v8  ;;  %v4911_v14 = vmul.f32 0.5, %v629_v5  ;;  %v632_v15 = vadd.f32 %v3362_v11, %v4851_v53  ;;  %v623_v16 = vpop.f32.mrb[15].mxu0  ;;  %v1471_v23 = vmul.f32 %v1343_v4, %v4873_v22 }
 0x17a   : > { %v1474_v18 = vmul.f32 %v1346_v9, %v4877_v24  ;;  %v4916_v20 = vmul.f32 0.5, %v621_v10  ;;  %v624_v21 = vadd.f32 %v4851_v53, %v623_v16  ;;  %v401_v24 = vld [vmem:[%s4728_s6 + $0x3f0] sm:$0xff] }
 0x17b   : > { %v1472_v26 = vmul.f32 %v1344_v13, %v4880_v25  ;;  %3732 = vtanh.f32 %v4911_v14  ;;  %v4922_v27 = vmul.f32 0.5, %v632_v15  ;;  %3468 = vmatmul.mubr.bf16.gmra.mrb[120].mxu0 %v464_v7  ;;  %v466_v37 = vpack.c.bf16 %v402_v29, %v401_v24 }
 0x17c   : > { %3734 = vtanh.f32 %v4916_v20  ;;  %v4925_v28 = vmul.f32 0.5, %v624_v21  ;;  %v1598_v19 = vpack.c.bf16 %v1474_v18, %v1473_v17  ;;  %3471 = vmatprep.mubr.bf16.mxu0 %v465_v12 }
 0x17d   : > { %v3725_v30 = vpop.eup %3724  ;;  %3736 = vtanh.f32 %v4922_v27  ;;  %v1597_v31 = vpack.c.bf16 %v1472_v26, %v1471_v23 }
 0x17e   : > { %v3727_v22 = vpop.eup %3726  ;;  %v1349_v32 = vadd.f32 1.0, %v3725_v30  ;;  %3738 = vtanh.f32 %v4925_v28  ;;  %v3365_v25 = vpop.f32.mrb[16].mxu0 }
 0x17f   : > { %v3729_v33 = vpop.eup %3728  ;;  %v1347_v34 = vadd.f32 1.0, %v3727_v22  ;;  %v645_v35 = vadd.f32 %v3365_v25, %v4851_v53  ;;  %v636_v36 = vpop.f32.mrb[17].mxu0  ;;  %3495 = vmatprep.mubr.bf16.mxu1 %v1597_v31 }
 0x180   : > { %v3731_v38 = vpop.eup %3730  ;;  %v1350_v39 = vadd.f32 1.0, %v3729_v33  ;;  %v637_v40 = vadd.f32 %v4851_v53, %v636_v36  ;;  %v3366_v41 = vpop.f32.mrb[18].mxu0  ;;  %3496 = vmatmul.mubr.bf16.gmra.mrb[4].mxu1 %v1598_v19  ;;  %v1477_v47 = vmul.f32 %v1349_v32, %v4890_v44 }
 0x181   : > { %v1348_v42 = vadd.f32 1.0, %v3731_v38  ;;  %v4933_v43 = vmul.f32 0.5, %v645_v35  ;;  %v648_v45 = vadd.f32 %v3366_v41, %v4851_v53  ;;  %v639_v46 = vpop.f32.mrb[19].mxu0  ;;  %v1475_v54 = vmul.f32 %v1347_v34, %v4893_v50 }
 0x182   : > { %v1478_v48 = vmul.f32 %v1350_v39, %v4897_v52  ;;  %v4938_v49 = vmul.f32 0.5, %v637_v40  ;;  %v640_v51 = vadd.f32 %v4851_v53, %v639_v46 }
 0x183   : > { %v1476_v55 = vmul.f32 %v1348_v42, %v4901_v56  ;;  %3740 = vtanh.f32 %v4933_v43  ;;  %v1102_v57 = vmul.f32 0.5, %v648_v45  ;;  %3472 = vmatmul.mubr.bf16.gmra.mrb[124].mxu0 %v466_v37 }
 0x184   : > { %3742 = vtanh.f32 %v4938_v49  ;;  %v1100_v58 = vmul.f32 0.5, %v640_v51  ;;  %v1600_v59 = vpack.c.bf16 %v1478_v48, %v1477_v47 }
 0x185   : > { %v3733_v60 = vpop.eup %3732  ;;  %3744 = vtanh.f32 %v1102_v57  ;;  %v1599_v44 = vpack.c.bf16 %v1476_v55, %v1475_v54 }
 0x186   : > { %v3735_v52 = vpop.eup %3734  ;;  %v1353_v61 = vadd.f32 1.0, %v3733_v60  ;;  %3746 = vtanh.f32 %v1100_v58  ;;  %v3369_v62 = vpop.f32.mrb[20].mxu0 }
 0x187   : > { %v3737_v63 = vpop.eup %3736  ;;  %v1351_v0 = vadd.f32 1.0, %v3735_v52  ;;  %v661_v50 = vadd.f32 %v3369_v62, %v4851_v53  ;;  %v652_v56 = vpop.f32.mrb[21].mxu0  ;;  %3499 = vmatprep.mubr.bf16.mxu1 %v1599_v44 }
 0x188   : > { %v3739_v1 = vpop.eup %3738  ;;  %v1354_v2 = vadd.f32 1.0, %v3737_v63  ;;  %v653_v3 = vadd.f32 %v4851_v53, %v652_v56  ;;  %v3370_v4 = vpop.f32.mrb[22].mxu0  ;;  %3500 = vmatmul.mubr.bf16.gmra.mrb[8].mxu1 %v1600_v59  ;;  %v1481_v9 = vmul.f32 %v1353_v61, %v4911_v14 }
 0x189   : > { %v1352_v5 = vadd.f32 1.0, %v3739_v1  ;;  %v4947_v6 = vmul.f32 0.5, %v661_v50  ;;  %v664_v7 = vadd.f32 %v3370_v4, %v4851_v53  ;;  %v655_v8 = vpop.f32.mrb[23].mxu0  ;;  %v1479_v13 = vmul.f32 %v1351_v0, %v4916_v20 }
 0x18a   : > { %v1482_v10 = vmul.f32 %v1354_v2, %v4922_v27  ;;  %v4952_v11 = vmul.f32 0.5, %v653_v3  ;;  %v656_v12 = vadd.f32 %v4851_v53, %v655_v8 }
 0x18b   : > { %v1480_v15 = vmul.f32 %v1352_v5, %v4925_v28  ;;  %3748 = vtanh.f32 %v4947_v6  ;;  %v1106_v16 = vmul.f32 0.5, %v664_v7 }
 0x18c   : > { %3750 = vtanh.f32 %v4952_v11  ;;  %v1104_v17 = vmul.f32 0.5, %v656_v12  ;;  %v1602_v18 = vpack.c.bf16 %v1482_v10, %v1481_v9 }
 0x18d   : > { %v3741_v21 = vpop.eup %3740  ;;  %3752 = vtanh.f32 %v1106_v16  ;;  %v1601_v14 = vpack.c.bf16 %v1480_v15, %v1479_v13 }
 0x18e   : > { %v3743_v23 = vpop.eup %3742  ;;  %v1357_v26 = vadd.f32 1.0, %v3741_v21  ;;  %3754 = vtanh.f32 %v1104_v17  ;;  %v3373_v27 = vpop.f32.mrb[24].mxu0 }
 0x18f   : > { %v3745_v19 = vpop.eup %3744  ;;  %v1355_v24 = vadd.f32 1.0, %v3743_v23  ;;  %v677_v20 = vadd.f32 %v3373_v27, %v4851_v53  ;;  %v668_v29 = vpop.f32.mrb[25].mxu0  ;;  %3503 = vmatprep.mubr.bf16.mxu1 %v1601_v14 }
 0x190   : > { %v3747_v28 = vpop.eup %3746  ;;  %v1358_v30 = vadd.f32 1.0, %v3745_v19  ;;  %v669_v31 = vadd.f32 %v4851_v53, %v668_v29  ;;  %v3374_v22 = vpop.f32.mrb[26].mxu0  ;;  %3504 = vmatmul.mubr.bf16.gmra.mrb[12].mxu1 %v1602_v18  ;;  %v1485_v35 = vmul.f32 %v1357_v26, %v4933_v43 }
 0x191   : > { %v1356_v32 = vadd.f32 1.0, %v3747_v28  ;;  %v4961_v25 = vmul.f32 0.5, %v677_v20  ;;  %v680_v33 = vadd.f32 %v3374_v22, %v4851_v53  ;;  %v671_v34 = vpop.f32.mrb[27].mxu0  ;;  %v1483_v39 = vmul.f32 %v1355_v24, %v4938_v49 }
 0x192   : > { %v1486_v36 = vmul.f32 %v1358_v30, %v1102_v57  ;;  %v4965_v37 = vmul.f32 0.5, %v669_v31  ;;  %v672_v38 = vadd.f32 %v4851_v53, %v671_v34 }
 0x193   : > { %v1484_v40 = vmul.f32 %v1356_v32, %v1100_v58  ;;  %3756 = vtanh.f32 %v4961_v25  ;;  %v1110_v41 = vmul.f32 0.5, %v680_v33 }
 0x194   : > { %3758 = vtanh.f32 %v4965_v37  ;;  %v1108_v42 = vmul.f32 0.5, %v672_v38  ;;  %v1604_v45 = vpack.c.bf16 %v1486_v36, %v1485_v35 }
 0x195   : > { %v3749_v46 = vpop.eup %3748  ;;  %3760 = vtanh.f32 %v1110_v41  ;;  %v1603_v47 = vpack.c.bf16 %v1484_v40, %v1483_v39 }
 0x196   : > { %v3751_v48 = vpop.eup %3750  ;;  %v1361_v43 = vadd.f32 1.0, %v3749_v46  ;;  %3762 = vtanh.f32 %v1108_v42  ;;  %v3377_v51 = vpop.f32.mrb[28].mxu0 }
 0x197   : > { %v3753_v54 = vpop.eup %3752  ;;  %v1359_v55 = vadd.f32 1.0, %v3751_v48  ;;  %v693_v57 = vadd.f32 %v3377_v51, %v4851_v53  ;;  %v684_v49 = vpop.f32.mrb[29].mxu0  ;;  %3507 = vmatprep.mubr.bf16.mxu1 %v1603_v47 }
 0x198   : > { %v3755_v58 = vpop.eup %3754  ;;  %v1362_v59 = vadd.f32 1.0, %v3753_v54  ;;  %v685_v60 = vadd.f32 %v4851_v53, %v684_v49  ;;  %v3378_v44 = vpop.f32.mrb[30].mxu0  ;;  %3508 = vmatmul.mubr.bf16.gmra.mrb[16].mxu1 %v1604_v45  ;;  %v1489_v0 = vmul.f32 %v1361_v43, %v4947_v6 }
 0x199   : > { %v1360_v52 = vadd.f32 1.0, %v3755_v58  ;;  %v4973_v61 = vmul.f32 0.5, %v693_v57  ;;  %v696_v62 = vadd.f32 %v3378_v44, %v4851_v53  ;;  %v687_v63 = vpop.f32.mrb[31].mxu0  ;;  %v1487_v2 = vmul.f32 %v1359_v55, %v4952_v11 }
 0x19a   : > { %v1490_v50 = vmul.f32 %v1362_v59, %v1106_v16  ;;  %v4977_v56 = vmul.f32 0.5, %v685_v60  ;;  %v688_v1 = vadd.f32 %v4851_v53, %v687_v63 }
 0x19b   : > { %v1488_v3 = vmul.f32 %v1360_v52, %v1104_v17  ;;  %3764 = vtanh.f32 %v4973_v61  ;;  %v1114_v4 = vmul.f32 0.5, %v696_v62 }
 0x19c   : > { %3766 = vtanh.f32 %v4977_v56  ;;  %v1112_v5 = vmul.f32 0.5, %v688_v1  ;;  %v1606_v7 = vpack.c.bf16 %v1490_v50, %v1489_v0 }
 0x19d   : > { %v3757_v8 = vpop.eup %3756  ;;  %3768 = vtanh.f32 %v1114_v4  ;;  %v1605_v9 = vpack.c.bf16 %v1488_v3, %v1487_v2 }
 0x19e   : > { %v3759_v10 = vpop.eup %3758  ;;  %v1365_v6 = vadd.f32 1.0, %v3757_v8  ;;  %3770 = vtanh.f32 %v1112_v5  ;;  %v3381_v12 = vpop.f32.mrb[32].mxu0 }
 0x19f   : > { %v3761_v13 = vpop.eup %3760  ;;  %v1363_v15 = vadd.f32 1.0, %v3759_v10  ;;  %v709_v16 = vadd.f32 %v3381_v12, %v4851_v53  ;;  %v700_v11 = vpop.f32.mrb[33].mxu0  ;;  %3511 = vmatprep.mubr.bf16.mxu1 %v1605_v9 }
 0x1a0   : > { %v3763_v17 = vpop.eup %3762  ;;  %v1366_v18 = vadd.f32 1.0, %v3761_v13  ;;  %v701_v21 = vadd.f32 %v4851_v53, %v700_v11  ;;  %v3382_v14 = vpop.f32.mrb[34].mxu0  ;;  %3512 = vmatmul.mubr.bf16.gmra.mrb[20].mxu1 %v1606_v7  ;;  %v1493_v24 = vmul.f32 %v1365_v6, %v4961_v25 }
 0x1a1   : > { %v1364_v23 = vadd.f32 1.0, %v3763_v17  ;;  %v4985_v26 = vmul.f32 0.5, %v709_v16  ;;  %v712_v27 = vadd.f32 %v3382_v14, %v4851_v53  ;;  %v703_v19 = vpop.f32.mrb[35].mxu0  ;;  %v1491_v30 = vmul.f32 %v1363_v15, %v4965_v37 }
 0x1a2   : > { %v1494_v20 = vmul.f32 %v1366_v18, %v1110_v41  ;;  %v4989_v29 = vmul.f32 0.5, %v701_v21  ;;  %v704_v28 = vadd.f32 %v4851_v53, %v703_v19 }
 0x1a3   : > { %v1492_v31 = vmul.f32 %v1364_v23, %v1108_v42  ;;  %3772 = vtanh.f32 %v4985_v26  ;;  %v1118_v22 = vmul.f32 0.5, %v712_v27 }
 0x1a4   : > { %3774 = vtanh.f32 %v4989_v29  ;;  %v1116_v32 = vmul.f32 0.5, %v704_v28  ;;  %v1608_v33 = vpack.c.bf16 %v1494_v20, %v1493_v24 }
 0x1a5   : > { %v3765_v34 = vpop.eup %3764  ;;  %3776 = vtanh.f32 %v1118_v22  ;;  %v1607_v35 = vpack.c.bf16 %v1492_v31, %v1491_v30 }
 0x1a6   : > { %v3767_v36 = vpop.eup %3766  ;;  %v1369_v25 = vadd.f32 1.0, %v3765_v34  ;;  %3778 = vtanh.f32 %v1116_v32  ;;  %v3385_v38 = vpop.f32.mrb[36].mxu0 }
 0x1a7   : > { %v3769_v39 = vpop.eup %3768  ;;  %v1367_v40 = vadd.f32 1.0, %v3767_v36  ;;  %v725_v41 = vadd.f32 %v3385_v38, %v4851_v53  ;;  %v716_v37 = vpop.f32.mrb[37].mxu0  ;;  %3515 = vmatprep.mubr.bf16.mxu1 %v1607_v35 }
 0x1a8   : > { %v3771_v42 = vpop.eup %3770  ;;  %v1370_v45 = vadd.f32 1.0, %v3769_v39  ;;  %v717_v46 = vadd.f32 %v4851_v53, %v716_v37  ;;  %v3386_v47 = vpop.f32.mrb[38].mxu0  ;;  %3516 = vmatmul.mubr.bf16.gmra.mrb[24].mxu1 %v1608_v33  ;;  %v1497_v55 = vmul.f32 %v1369_v25, %v4973_v61 }
 0x1a9   : > { %v1368_v48 = vadd.f32 1.0, %v3771_v42  ;;  %v4997_v43 = vmul.f32 0.5, %v725_v41  ;;  %v728_v51 = vadd.f32 %v3386_v47, %v4851_v53  ;;  %v719_v54 = vpop.f32.mrb[39].mxu0  ;;  %v1495_v59 = vmul.f32 %v1367_v40, %v4977_v56 }
 0x1aa   : > { %v1498_v57 = vmul.f32 %v1370_v45, %v1114_v4  ;;  %v5001_v49 = vmul.f32 0.5, %v717_v46  ;;  %v720_v58 = vadd.f32 %v4851_v53, %v719_v54 }
 0x1ab   : > { %v1496_v60 = vmul.f32 %v1368_v48, %v1112_v5  ;;  %3780 = vtanh.f32 %v4997_v43  ;;  %v1122_v44 = vmul.f32 0.5, %v728_v51 }
 0x1ac   : > { %3782 = vtanh.f32 %v5001_v49  ;;  %v1120_v52 = vmul.f32 0.5, %v720_v58  ;;  %v1610_v62 = vpack.c.bf16 %v1498_v57, %v1497_v55 }
 0x1ad   : > { %v3773_v63 = vpop.eup %3772  ;;  %3784 = vtanh.f32 %v1122_v44  ;;  %v1609_v0 = vpack.c.bf16 %v1496_v60, %v1495_v59 }
 0x1ae   : > { %v3775_v50 = vpop.eup %3774  ;;  %v1373_v61 = vadd.f32 1.0, %v3773_v63  ;;  %3786 = vtanh.f32 %v1120_v52  ;;  %v3389_v1 = vpop.f32.mrb[40].mxu0 }
 0x1af   : > { %v3777_v2 = vpop.eup %3776  ;;  %v1371_v3 = vadd.f32 1.0, %v3775_v50  ;;  %v741_v4 = vadd.f32 %v3389_v1, %v4851_v53  ;;  %v732_v56 = vpop.f32.mrb[41].mxu0  ;;  %3519 = vmatprep.mubr.bf16.mxu1 %v1609_v0 }
 0x1b0   : > { %v3779_v5 = vpop.eup %3778  ;;  %v1374_v7 = vadd.f32 1.0, %v3777_v2  ;;  %v733_v8 = vadd.f32 %v4851_v53, %v732_v56  ;;  %v3390_v9 = vpop.f32.mrb[42].mxu0  ;;  %3520 = vmatmul.mubr.bf16.gmra.mrb[28].mxu1 %v1610_v62  ;;  %v1501_v15 = vmul.f32 %v1373_v61, %v4985_v26 }
 0x1b1   : > { %v1372_v10 = vadd.f32 1.0, %v3779_v5  ;;  %v5009_v6 = vmul.f32 0.5, %v741_v4  ;;  %v744_v12 = vadd.f32 %v3390_v9, %v4851_v53  ;;  %v735_v13 = vpop.f32.mrb[43].mxu0  ;;  %v1499_v18 = vmul.f32 %v1371_v3, %v4989_v29 }
 0x1b2   : > { %v1502_v16 = vmul.f32 %v1374_v7, %v1118_v22  ;;  %v5013_v11 = vmul.f32 0.5, %v733_v8  ;;  %v736_v17 = vadd.f32 %v4851_v53, %v735_v13 }
 0x1b3   : > { %v1500_v21 = vmul.f32 %v1372_v10, %v1116_v32  ;;  %3788 = vtanh.f32 %v5009_v6  ;;  %v1126_v14 = vmul.f32 0.5, %v744_v12 }
 0x1b4   : > { %3790 = vtanh.f32 %v5013_v11  ;;  %v1124_v23 = vmul.f32 0.5, %v736_v17  ;;  %v1612_v27 = vpack.c.bf16 %v1502_v16, %v1501_v15 }
 0x1b5   : > { %v3781_v19 = vpop.eup %3780  ;;  %3792 = vtanh.f32 %v1126_v14  ;;  %v1611_v24 = vpack.c.bf16 %v1500_v21, %v1499_v18 }
 0x1b6   : > { %v3783_v20 = vpop.eup %3782  ;;  %v1377_v26 = vadd.f32 1.0, %v3781_v19  ;;  %3794 = vtanh.f32 %v1124_v23  ;;  %v3393_v28 = vpop.f32.mrb[44].mxu0 }
 0x1b7   : > { %v3785_v30 = vpop.eup %3784  ;;  %v1375_v31 = vadd.f32 1.0, %v3783_v20  ;;  %v757_v22 = vadd.f32 %v3393_v28, %v4851_v53  ;;  %v748_v29 = vpop.f32.mrb[45].mxu0  ;;  %3523 = vmatprep.mubr.bf16.mxu1 %v1611_v24 }
 0x1b8   : > { %v3787_v32 = vpop.eup %3786  ;;  %v1378_v33 = vadd.f32 1.0, %v3785_v30  ;;  %v749_v34 = vadd.f32 %v4851_v53, %v748_v29  ;;  %v3394_v35 = vpop.f32.mrb[46].mxu0  ;;  %3524 = vmatmul.mubr.bf16.gmra.mrb[32].mxu1 %v1612_v27  ;;  %v1505_v40 = vmul.f32 %v1377_v26, %v4997_v43 }
 0x1b9   : > { %v1376_v36 = vadd.f32 1.0, %v3787_v32  ;;  %v5021_v25 = vmul.f32 0.5, %v757_v22  ;;  %v760_v38 = vadd.f32 %v3394_v35, %v4851_v53  ;;  %v751_v39 = vpop.f32.mrb[47].mxu0  ;;  %v1503_v45 = vmul.f32 %v1375_v31, %v5001_v49 }
 0x1ba   : > { %v1506_v41 = vmul.f32 %v1378_v33, %v1122_v44  ;;  %v5025_v37 = vmul.f32 0.5, %v749_v34  ;;  %v752_v42 = vadd.f32 %v4851_v53, %v751_v39 }
 0x1bb   : > { %v1504_v46 = vmul.f32 %v1376_v36, %v1120_v52  ;;  %3796 = vtanh.f32 %v5021_v25  ;;  %v1130_v47 = vmul.f32 0.5, %v760_v38 }
 0x1bc   : > { %3798 = vtanh.f32 %v5025_v37  ;;  %v1128_v48 = vmul.f32 0.5, %v752_v42  ;;  %v1614_v51 = vpack.c.bf16 %v1506_v41, %v1505_v40 }
 0x1bd   : > { %v3789_v54 = vpop.eup %3788  ;;  %3800 = vtanh.f32 %v1130_v47  ;;  %v1613_v55 = vpack.c.bf16 %v1504_v46, %v1503_v45 }
 0x1be   : > { %v3791_v57 = vpop.eup %3790  ;;  %v1381_v43 = vadd.f32 1.0, %v3789_v54  ;;  %3802 = vtanh.f32 %v1128_v48  ;;  %v3397_v58 = vpop.f32.mrb[48].mxu0 }
 0x1bf   : > { %v3793_v59 = vpop.eup %3792  ;;  %v1379_v60 = vadd.f32 1.0, %v3791_v57  ;;  %v773_v44 = vadd.f32 %v3397_v58, %v4851_v53  ;;  %v764_v49 = vpop.f32.mrb[49].mxu0  ;;  %3527 = vmatprep.mubr.bf16.mxu1 %v1613_v55 }
 0x1c0   : > { %v3795_v52 = vpop.eup %3794  ;;  %v1382_v62 = vadd.f32 1.0, %v3793_v59  ;;  %v765_v63 = vadd.f32 %v4851_v53, %v764_v49  ;;  %v3398_v0 = vpop.f32.mrb[50].mxu0  ;;  %3528 = vmatmul.mubr.bf16.gmra.mrb[36].mxu1 %v1614_v51  ;;  %v1509_v3 = vmul.f32 %v1381_v43, %v5009_v6 }
 0x1c1   : > { %v1380_v50 = vadd.f32 1.0, %v3795_v52  ;;  %v5033_v61 = vmul.f32 0.5, %v773_v44  ;;  %v776_v1 = vadd.f32 %v3398_v0, %v4851_v53  ;;  %v767_v2 = vpop.f32.mrb[51].mxu0  ;;  %v1507_v7 = vmul.f32 %v1379_v60, %v5013_v11 }
 0x1c2   : > { %v1510_v4 = vmul.f32 %v1382_v62, %v1126_v14  ;;  %v5037_v56 = vmul.f32 0.5, %v765_v63  ;;  %v768_v5 = vadd.f32 %v4851_v53, %v767_v2 }
 0x1c3   : > { %v1508_v8 = vmul.f32 %v1380_v50, %v1124_v23  ;;  %3804 = vtanh.f32 %v5033_v61  ;;  %v1134_v9 = vmul.f32 0.5, %v776_v1 }
 0x1c4   : > { %3806 = vtanh.f32 %v5037_v56  ;;  %v1132_v10 = vmul.f32 0.5, %v768_v5  ;;  %v1616_v12 = vpack.c.bf16 %v1510_v4, %v1509_v3 }
 0x1c5   : > { %v3797_v13 = vpop.eup %3796  ;;  %3808 = vtanh.f32 %v1134_v9  ;;  %v1615_v15 = vpack.c.bf16 %v1508_v8, %v1507_v7 }
 0x1c6   : > { %v3799_v16 = vpop.eup %3798  ;;  %v1385_v6 = vadd.f32 1.0, %v3797_v13  ;;  %3810 = vtanh.f32 %v1132_v10  ;;  %v3401_v17 = vpop.f32.mrb[52].mxu0 }
 0x1c7   : > { %v3801_v18 = vpop.eup %3800  ;;  %v1383_v21 = vadd.f32 1.0, %v3799_v16  ;;  %v789_v14 = vadd.f32 %v3401_v17, %v4851_v53  ;;  %v780_v11 = vpop.f32.mrb[53].mxu0  ;;  %3531 = vmatprep.mubr.bf16.mxu1 %v1615_v15 }
 0x1c8   : > { %v3803_v23 = vpop.eup %3802  ;;  %v1386_v27 = vadd.f32 1.0, %v3801_v18  ;;  %v781_v19 = vadd.f32 %v4851_v53, %v780_v11  ;;  %v3402_v24 = vpop.f32.mrb[54].mxu0  ;;  %3532 = vmatmul.mubr.bf16.gmra.mrb[40].mxu1 %v1616_v12  ;;  %v1513_v31 = vmul.f32 %v1385_v6, %v5021_v25 }
 0x1c9   : > { %v1384_v20 = vadd.f32 1.0, %v3803_v23  ;;  %v5045_v26 = vmul.f32 0.5, %v789_v14  ;;  %v792_v28 = vadd.f32 %v3402_v24, %v4851_v53  ;;  %v783_v30 = vpop.f32.mrb[55].mxu0  ;;  %v1511_v33 = vmul.f32 %v1383_v21, %v5025_v37 }
 0x1ca   : > { %v1514_v22 = vmul.f32 %v1386_v27, %v1130_v47  ;;  %v5049_v29 = vmul.f32 0.5, %v781_v19  ;;  %v784_v32 = vadd.f32 %v4851_v53, %v783_v30 }
 0x1cb   : > { %v1512_v34 = vmul.f32 %v1384_v20, %v1128_v48  ;;  %3812 = vtanh.f32 %v5045_v26  ;;  %v1138_v35 = vmul.f32 0.5, %v792_v28 }
 0x1cc   : > { %3814 = vtanh.f32 %v5049_v29  ;;  %v1136_v36 = vmul.f32 0.5, %v784_v32  ;;  %v1618_v38 = vpack.c.bf16 %v1514_v22, %v1513_v31 }
 0x1cd   : > { %v3805_v39 = vpop.eup %3804  ;;  %3816 = vtanh.f32 %v1138_v35  ;;  %v1617_v40 = vpack.c.bf16 %v1512_v34, %v1511_v33 }
 0x1ce   : > { %v3807_v41 = vpop.eup %3806  ;;  %v1389_v25 = vadd.f32 1.0, %v3805_v39  ;;  %3818 = vtanh.f32 %v1136_v36  ;;  %v3405_v42 = vpop.f32.mrb[56].mxu0 }
 0x1cf   : > { %v3809_v45 = vpop.eup %3808  ;;  %v1387_v46 = vadd.f32 1.0, %v3807_v41  ;;  %v805_v47 = vadd.f32 %v3405_v42, %v4851_v53  ;;  %v796_v37 = vpop.f32.mrb[57].mxu0  ;;  %3535 = vmatprep.mubr.bf16.mxu1 %v1617_v40 }
 0x1d0   : > { %v3811_v48 = vpop.eup %3810  ;;  %v1390_v51 = vadd.f32 1.0, %v3809_v45  ;;  %v797_v54 = vadd.f32 %v4851_v53, %v796_v37  ;;  %v3406_v55 = vpop.f32.mrb[58].mxu0  ;;  %3536 = vmatmul.mubr.bf16.gmra.mrb[44].mxu1 %v1618_v38  ;;  %v1517_v60 = vmul.f32 %v1389_v25, %v5033_v61 }
 0x1d1   : > { %v1388_v57 = vadd.f32 1.0, %v3811_v48  ;;  %v5057_v43 = vmul.f32 0.5, %v805_v47  ;;  %v808_v58 = vadd.f32 %v3406_v55, %v4851_v53  ;;  %v799_v59 = vpop.f32.mrb[59].mxu0  ;;  %v1515_v62 = vmul.f32 %v1387_v46, %v5037_v56 }
 0x1d2   : > { %v1518_v44 = vmul.f32 %v1390_v51, %v1134_v9  ;;  %v5061_v49 = vmul.f32 0.5, %v797_v54  ;;  %v800_v52 = vadd.f32 %v4851_v53, %v799_v59 }
 0x1d3   : > { %v1516_v63 = vmul.f32 %v1388_v57, %v1132_v10  ;;  %3820 = vtanh.f32 %v5057_v43  ;;  %v1142_v0 = vmul.f32 0.5, %v808_v58 }
 0x1d4   : > { %3822 = vtanh.f32 %v5061_v49  ;;  %v1140_v50 = vmul.f32 0.5, %v800_v52  ;;  %v1620_v1 = vpack.c.bf16 %v1518_v44, %v1517_v60 }
 0x1d5   : > { %v3813_v2 = vpop.eup %3812  ;;  %3824 = vtanh.f32 %v1142_v0  ;;  %v1619_v3 = vpack.c.bf16 %v1516_v63, %v1515_v62 }
 0x1d6   : > { %v3815_v4 = vpop.eup %3814  ;;  %v1393_v61 = vadd.f32 1.0, %v3813_v2  ;;  %3826 = vtanh.f32 %v1140_v50  ;;  %v3409_v5 = vpop.f32.mrb[60].mxu0 }
 0x1d7   : > { %v3817_v7 = vpop.eup %3816  ;;  %v1391_v8 = vadd.f32 1.0, %v3815_v4  ;;  %v821_v9 = vadd.f32 %v3409_v5, %v4851_v53  ;;  %v812_v56 = vpop.f32.mrb[61].mxu0  ;;  %3539 = vmatprep.mubr.bf16.mxu1 %v1619_v3 }
 0x1d8   : > { %v3819_v10 = vpop.eup %3818  ;;  %v1394_v12 = vadd.f32 1.0, %v3817_v7  ;;  %v813_v13 = vadd.f32 %v4851_v53, %v812_v56  ;;  %v3410_v15 = vpop.f32.mrb[62].mxu0  ;;  %3540 = vmatmul.mubr.bf16.gmra.mrb[48].mxu1 %v1620_v1  ;;  %v1521_v21 = vmul.f32 %v1393_v61, %v5045_v26 }
 0x1d9   : > { %v1392_v16 = vadd.f32 1.0, %v3819_v10  ;;  %v5069_v6 = vmul.f32 0.5, %v821_v9  ;;  %v824_v17 = vadd.f32 %v3410_v15, %v4851_v53  ;;  %v815_v18 = vpop.f32.mrb[63].mxu0  ;;  %v1519_v27 = vmul.f32 %v1391_v8, %v5049_v29 }
 0x1da   : > { %v1522_v14 = vmul.f32 %v1394_v12, %v1138_v35  ;;  %v5073_v11 = vmul.f32 0.5, %v813_v13  ;;  %v816_v23 = vadd.f32 %v4851_v53, %v815_v18  ;;  %v5082_v53 = vld [vmem:[%s6243_s2] ss:$0 sm:$0xff] }
 0x1db   : > { %v1520_v19 = vmul.f32 %v1392_v16, %v1136_v36  ;;  %3828 = vtanh.f32 %v5069_v6  ;;  %v1146_v24 = vmul.f32 0.5, %v824_v17 }
 0x1dc   : > { %3830 = vtanh.f32 %v5073_v11  ;;  %v1144_v20 = vmul.f32 0.5, %v816_v23  ;;  %v1622_v28 = vpack.c.bf16 %v1522_v14, %v1521_v21 }
 0x1dd   : > { %v3821_v30 = vpop.eup %3820  ;;  %3832 = vtanh.f32 %v1146_v24  ;;  %v1621_v31 = vpack.c.bf16 %v1520_v19, %v1519_v27 }
 0x1de   : > { %v3823_v22 = vpop.eup %3822  ;;  %v1397_v26 = vadd.f32 1.0, %v3821_v30  ;;  %3834 = vtanh.f32 %v1144_v20  ;;  %v3413_v32 = vpop.f32.mrb[64].mxu0 }
 0x1df   : > { %v3825_v33 = vpop.eup %3824  ;;  %v1395_v34 = vadd.f32 1.0, %v3823_v22  ;;  %v837_v29 = vadd.f32 %v5082_v53, %v3413_v32  ;;  %v828_v35 = vpop.f32.mrb[65].mxu0  ;;  %3543 = vmatprep.mubr.bf16.mxu1 %v1621_v31 }
 0x1e0   : > { %v3827_v36 = vpop.eup %3826  ;;  %v1398_v38 = vadd.f32 1.0, %v3825_v33  ;;  %v829_v39 = vadd.f32 %v5082_v53, %v828_v35  ;;  %v3414_v40 = vpop.f32.mrb[66].mxu0  ;;  %3544 = vmatmul.mubr.bf16.gmra.mrb[52].mxu1 %v1622_v28  ;;  %v1525_v46 = vmul.f32 %v1397_v26, %v5057_v43 }
 0x1e1   : > { %v1396_v41 = vadd.f32 1.0, %v3827_v36  ;;  %v5086_v25 = vmul.f32 0.5, %v837_v29  ;;  %v840_v42 = vadd.f32 %v5082_v53, %v3414_v40  ;;  %v831_v45 = vpop.f32.mrb[67].mxu0  ;;  %v1523_v51 = vmul.f32 %v1395_v34, %v5061_v49 }
 0x1e2   : > { %v1526_v47 = vmul.f32 %v1398_v38, %v1142_v0  ;;  %v5090_v37 = vmul.f32 0.5, %v829_v39  ;;  %v832_v48 = vadd.f32 %v5082_v53, %v831_v45 }
 0x1e3   : > { %v1524_v54 = vmul.f32 %v1396_v41, %v1140_v50  ;;  %3836 = vtanh.f32 %v5086_v25  ;;  %v1150_v55 = vmul.f32 0.5, %v840_v42 }
 0x1e4   : > { %3838 = vtanh.f32 %v5090_v37  ;;  %v1148_v57 = vmul.f32 0.5, %v832_v48  ;;  %v1624_v58 = vpack.c.bf16 %v1526_v47, %v1525_v46 }
 0x1e5   : > { %v3829_v59 = vpop.eup %3828  ;;  %3840 = vtanh.f32 %v1150_v55  ;;  %v1623_v60 = vpack.c.bf16 %v1524_v54, %v1523_v51 }
 0x1e6   : > { %v3831_v44 = vpop.eup %3830  ;;  %v1401_v43 = vadd.f32 1.0, %v3829_v59  ;;  %3842 = vtanh.f32 %v1148_v57  ;;  %v3417_v52 = vpop.f32.mrb[68].mxu0 }
 0x1e7   : > { %v3833_v62 = vpop.eup %3832  ;;  %v1399_v63 = vadd.f32 1.0, %v3831_v44  ;;  %v853_v0 = vadd.f32 %v5082_v53, %v3417_v52  ;;  %v844_v49 = vpop.f32.mrb[69].mxu0  ;;  %3547 = vmatprep.mubr.bf16.mxu1 %v1623_v60 }
 0x1e8   : > { %v3835_v50 = vpop.eup %3834  ;;  %v1402_v1 = vadd.f32 1.0, %v3833_v62  ;;  %v845_v2 = vadd.f32 %v5082_v53, %v844_v49  ;;  %v3418_v3 = vpop.f32.mrb[70].mxu0  ;;  %3548 = vmatmul.mubr.bf16.gmra.mrb[56].mxu1 %v1624_v58  ;;  %v1529_v8 = vmul.f32 %v1401_v43, %v5069_v6 }
 0x1e9   : > { %v1400_v4 = vadd.f32 1.0, %v3835_v50  ;;  %v5098_v61 = vmul.f32 0.5, %v853_v0  ;;  %v856_v5 = vadd.f32 %v5082_v53, %v3418_v3  ;;  %v847_v7 = vpop.f32.mrb[71].mxu0  ;;  %v1527_v12 = vmul.f32 %v1399_v63, %v5073_v11 }
 0x1ea   : > { %v1530_v9 = vmul.f32 %v1402_v1, %v1146_v24  ;;  %v5102_v56 = vmul.f32 0.5, %v845_v2  ;;  %v848_v10 = vadd.f32 %v5082_v53, %v847_v7 }
 0x1eb   : > { %v1528_v13 = vmul.f32 %v1400_v4, %v1144_v20  ;;  %3844 = vtanh.f32 %v5098_v61  ;;  %v1154_v15 = vmul.f32 0.5, %v856_v5 }
 0x1ec   : > { %3846 = vtanh.f32 %v5102_v56  ;;  %v1152_v16 = vmul.f32 0.5, %v848_v10  ;;  %v1626_v17 = vpack.c.bf16 %v1530_v9, %v1529_v8 }
 0x1ed   : > { %v3837_v18 = vpop.eup %3836  ;;  %3848 = vtanh.f32 %v1154_v15  ;;  %v1625_v21 = vpack.c.bf16 %v1528_v13, %v1527_v12 }
 0x1ee   : > { %v3839_v14 = vpop.eup %3838  ;;  %v1405_v6 = vadd.f32 1.0, %v3837_v18  ;;  %3850 = vtanh.f32 %v1152_v16  ;;  %v3421_v23 = vpop.f32.mrb[72].mxu0 }
 0x1ef   : > { %v3841_v27 = vpop.eup %3840  ;;  %v1403_v19 = vadd.f32 1.0, %v3839_v14  ;;  %v869_v24 = vadd.f32 %v5082_v53, %v3421_v23  ;;  %v860_v11 = vpop.f32.mrb[73].mxu0  ;;  %3551 = vmatprep.mubr.bf16.mxu1 %v1625_v21 }
 0x1f0   : > { %v3843_v20 = vpop.eup %3842  ;;  %v1406_v28 = vadd.f32 1.0, %v3841_v27  ;;  %v861_v30 = vadd.f32 %v5082_v53, %v860_v11  ;;  %v3422_v31 = vpop.f32.mrb[74].mxu0  ;;  %3552 = vmatmul.mubr.bf16.gmra.mrb[60].mxu1 %v1626_v17  ;;  %v1533_v34 = vmul.f32 %v1405_v6, %v5086_v25 }
 0x1f1   : > { %v1404_v22 = vadd.f32 1.0, %v3843_v20  ;;  %v5110_v26 = vmul.f32 0.5, %v869_v24  ;;  %v872_v32 = vadd.f32 %v5082_v53, %v3422_v31  ;;  %v863_v33 = vpop.f32.mrb[75].mxu0  ;;  %v1531_v38 = vmul.f32 %v1403_v19, %v5090_v37 }
 0x1f2   : > { %v1534_v29 = vmul.f32 %v1406_v28, %v1150_v55  ;;  %v5114_v35 = vmul.f32 0.5, %v861_v30  ;;  %v864_v36 = vadd.f32 %v5082_v53, %v863_v33 }
 0x1f3   : > { %v1532_v39 = vmul.f32 %v1404_v22, %v1148_v57  ;;  %3852 = vtanh.f32 %v5110_v26  ;;  %v1158_v40 = vmul.f32 0.5, %v872_v32 }
 0x1f4   : > { %3854 = vtanh.f32 %v5114_v35  ;;  %v1156_v41 = vmul.f32 0.5, %v864_v36  ;;  %v1628_v42 = vpack.c.bf16 %v1534_v29, %v1533_v34 }
 0x1f5   : > { %v3845_v45 = vpop.eup %3844  ;;  %3856 = vtanh.f32 %v1158_v40  ;;  %v1627_v46 = vpack.c.bf16 %v1532_v39, %v1531_v38 }
 0x1f6   : > { %v3847_v47 = vpop.eup %3846  ;;  %v1409_v25 = vadd.f32 1.0, %v3845_v45  ;;  %3858 = vtanh.f32 %v1156_v41  ;;  %v3425_v48 = vpop.f32.mrb[76].mxu0 }
 0x1f7   : > { %v3849_v51 = vpop.eup %3848  ;;  %v1407_v54 = vadd.f32 1.0, %v3847_v47  ;;  %v885_v55 = vadd.f32 %v5082_v53, %v3425_v48  ;;  %v876_v37 = vpop.f32.mrb[77].mxu0  ;;  %3555 = vmatprep.mubr.bf16.mxu1 %v1627_v46 }
 0x1f8   : > { %v3851_v57 = vpop.eup %3850  ;;  %v1410_v58 = vadd.f32 1.0, %v3849_v51  ;;  %v877_v59 = vadd.f32 %v5082_v53, %v876_v37  ;;  %v3426_v60 = vpop.f32.mrb[78].mxu0  ;;  %3556 = vmatmul.mubr.bf16.gmra.mrb[64].mxu1 %v1628_v42  ;;  %v1537_v63 = vmul.f32 %v1409_v25, %v5098_v61 }
 0x1f9   : > { %v1408_v44 = vadd.f32 1.0, %v3851_v57  ;;  %v5122_v43 = vmul.f32 0.5, %v885_v55  ;;  %v888_v52 = vadd.f32 %v5082_v53, %v3426_v60  ;;  %v879_v62 = vpop.f32.mrb[79].mxu0  ;;  %v1535_v1 = vmul.f32 %v1407_v54, %v5102_v56 }
 0x1fa   : > { %v1538_v0 = vmul.f32 %v1410_v58, %v1154_v15  ;;  %v5126_v49 = vmul.f32 0.5, %v877_v59  ;;  %v880_v50 = vadd.f32 %v5082_v53, %v879_v62 }
 0x1fb   : > { %v1536_v2 = vmul.f32 %v1408_v44, %v1152_v16  ;;  %3860 = vtanh.f32 %v5122_v43  ;;  %v1162_v3 = vmul.f32 0.5, %v888_v52 }
 0x1fc   : > { %3862 = vtanh.f32 %v5126_v49  ;;  %v1160_v4 = vmul.f32 0.5, %v880_v50  ;;  %v1630_v5 = vpack.c.bf16 %v1538_v0, %v1537_v63 }
 0x1fd   : > { %v3853_v7 = vpop.eup %3852  ;;  %3864 = vtanh.f32 %v1162_v3  ;;  %v1629_v8 = vpack.c.bf16 %v1536_v2, %v1535_v1 }
 0x1fe   : > { %v3855_v9 = vpop.eup %3854  ;;  %v1413_v61 = vadd.f32 1.0, %v3853_v7  ;;  %3866 = vtanh.f32 %v1160_v4  ;;  %v3429_v10 = vpop.f32.mrb[80].mxu0 }
 0x1ff   : > { %v3857_v12 = vpop.eup %3856  ;;  %v1411_v13 = vadd.f32 1.0, %v3855_v9  ;;  %v901_v15 = vadd.f32 %v5082_v53, %v3429_v10  ;;  %v892_v56 = vpop.f32.mrb[81].mxu0  ;;  %3559 = vmatprep.mubr.bf16.mxu1 %v1629_v8 }
 0x200   : > { %v3859_v16 = vpop.eup %3858  ;;  %v1414_v17 = vadd.f32 1.0, %v3857_v12  ;;  %v893_v18 = vadd.f32 %v5082_v53, %v892_v56  ;;  %v3430_v21 = vpop.f32.mrb[82].mxu0  ;;  %3560 = vmatmul.mubr.bf16.gmra.mrb[68].mxu1 %v1630_v5  ;;  %v1541_v19 = vmul.f32 %v1413_v61, %v5110_v26 }
 0x201   : > { %v1412_v14 = vadd.f32 1.0, %v3859_v16  ;;  %v5134_v6 = vmul.f32 0.5, %v901_v15  ;;  %v904_v23 = vadd.f32 %v5082_v53, %v3430_v21  ;;  %v895_v27 = vpop.f32.mrb[83].mxu0  ;;  %v1539_v28 = vmul.f32 %v1411_v13, %v5114_v35 }
 0x202   : > { %v1542_v24 = vmul.f32 %v1414_v17, %v1158_v40  ;;  %v5138_v11 = vmul.f32 0.5, %v893_v18  ;;  %v896_v20 = vadd.f32 %v5082_v53, %v895_v27 }
 0x203   : > { %v1540_v30 = vmul.f32 %v1412_v14, %v1156_v41  ;;  %3868 = vtanh.f32 %v5134_v6  ;;  %v1166_v31 = vmul.f32 0.5, %v904_v23 }
 0x204   : > { %3870 = vtanh.f32 %v5138_v11  ;;  %v1164_v22 = vmul.f32 0.5, %v896_v20  ;;  %v1632_v32 = vpack.c.bf16 %v1542_v24, %v1541_v19 }
 0x205   : > { %v3861_v33 = vpop.eup %3860  ;;  %3872 = vtanh.f32 %v1166_v31  ;;  %v1631_v34 = vpack.c.bf16 %v1540_v30, %v1539_v28 }
 0x206   : > { %v3863_v29 = vpop.eup %3862  ;;  %v1417_v26 = vadd.f32 1.0, %v3861_v33  ;;  %3874 = vtanh.f32 %v1164_v22  ;;  %v3433_v36 = vpop.f32.mrb[84].mxu0 }
 0x207   : > { %v3865_v38 = vpop.eup %3864  ;;  %v1415_v39 = vadd.f32 1.0, %v3863_v29  ;;  %v917_v40 = vadd.f32 %v5082_v53, %v3433_v36  ;;  %v908_v35 = vpop.f32.mrb[85].mxu0  ;;  %3563 = vmatprep.mubr.bf16.mxu1 %v1631_v34 }
 0x208   : > { %v3867_v41 = vpop.eup %3866  ;;  %v1418_v42 = vadd.f32 1.0, %v3865_v38  ;;  %v909_v45 = vadd.f32 %v5082_v53, %v908_v35  ;;  %v3434_v46 = vpop.f32.mrb[86].mxu0  ;;  %3564 = vmatmul.mubr.bf16.gmra.mrb[72].mxu1 %v1632_v32  ;;  %v1545_v54 = vmul.f32 %v1417_v26, %v5122_v43 }
 0x209   : > { %v1416_v47 = vadd.f32 1.0, %v3867_v41  ;;  %v5146_v25 = vmul.f32 0.5, %v917_v40  ;;  %v920_v48 = vadd.f32 %v5082_v53, %v3434_v46  ;;  %v911_v51 = vpop.f32.mrb[87].mxu0  ;;  %v1543_v58 = vmul.f32 %v1415_v39, %v5126_v49 }
 0x20a   : > { %v1546_v55 = vmul.f32 %v1418_v42, %v1162_v3  ;;  %v5150_v37 = vmul.f32 0.5, %v909_v45  ;;  %v912_v57 = vadd.f32 %v5082_v53, %v911_v51 }
 0x20b   : > { %v1544_v59 = vmul.f32 %v1416_v47, %v1160_v4  ;;  %3876 = vtanh.f32 %v5146_v25  ;;  %v1170_v60 = vmul.f32 0.5, %v920_v48 }
 0x20c   : > { %3878 = vtanh.f32 %v5150_v37  ;;  %v1168_v44 = vmul.f32 0.5, %v912_v57  ;;  %v1634_v52 = vpack.c.bf16 %v1546_v55, %v1545_v54 }
 0x20d   : > { %v3869_v62 = vpop.eup %3868  ;;  %3880 = vtanh.f32 %v1170_v60  ;;  %v1633_v63 = vpack.c.bf16 %v1544_v59, %v1543_v58 }
 0x20e   : > { %v3871_v0 = vpop.eup %3870  ;;  %v1421_v43 = vadd.f32 1.0, %v3869_v62  ;;  %3882 = vtanh.f32 %v1168_v44  ;;  %v3437_v50 = vpop.f32.mrb[88].mxu0 }
 0x20f   : > { %v3873_v1 = vpop.eup %3872  ;;  %v1419_v2 = vadd.f32 1.0, %v3871_v0  ;;  %v933_v3 = vadd.f32 %v5082_v53, %v3437_v50  ;;  %v924_v49 = vpop.f32.mrb[89].mxu0  ;;  %3567 = vmatprep.mubr.bf16.mxu1 %v1633_v63 }
 0x210   : > { %v3875_v4 = vpop.eup %3874  ;;  %v1422_v5 = vadd.f32 1.0, %v3873_v1  ;;  %v925_v7 = vadd.f32 %v5082_v53, %v924_v49  ;;  %v3438_v8 = vpop.f32.mrb[90].mxu0  ;;  %3568 = vmatmul.mubr.bf16.gmra.mrb[76].mxu1 %v1634_v52  ;;  %v1549_v13 = vmul.f32 %v1421_v43, %v5134_v6 }
 0x211   : > { %v1420_v9 = vadd.f32 1.0, %v3875_v4  ;;  %v5158_v61 = vmul.f32 0.5, %v933_v3  ;;  %v936_v10 = vadd.f32 %v5082_v53, %v3438_v8  ;;  %v927_v12 = vpop.f32.mrb[91].mxu0  ;;  %v1547_v17 = vmul.f32 %v1419_v2, %v5138_v11 }
 0x212   : > { %v1550_v15 = vmul.f32 %v1422_v5, %v1166_v31  ;;  %v5162_v56 = vmul.f32 0.5, %v925_v7  ;;  %v928_v16 = vadd.f32 %v5082_v53, %v927_v12 }
 0x213   : > { %v1548_v18 = vmul.f32 %v1420_v9, %v1164_v22  ;;  %3884 = vtanh.f32 %v5158_v61  ;;  %v1174_v21 = vmul.f32 0.5, %v936_v10 }
 0x214   : > { %3886 = vtanh.f32 %v5162_v56  ;;  %v1172_v14 = vmul.f32 0.5, %v928_v16  ;;  %v1636_v23 = vpack.c.bf16 %v1550_v15, %v1549_v13 }
 0x215   : > { %v3877_v27 = vpop.eup %3876  ;;  %3888 = vtanh.f32 %v1174_v21  ;;  %v1635_v19 = vpack.c.bf16 %v1548_v18, %v1547_v17 }
 0x216   : > { %v3879_v24 = vpop.eup %3878  ;;  %v1425_v6 = vadd.f32 1.0, %v3877_v27  ;;  %3890 = vtanh.f32 %v1172_v14  ;;  %v3441_v20 = vpop.f32.mrb[92].mxu0 }
 0x217   : > { %v3881_v28 = vpop.eup %3880  ;;  %v1423_v30 = vadd.f32 1.0, %v3879_v24  ;;  %v949_v31 = vadd.f32 %v5082_v53, %v3441_v20  ;;  %v940_v11 = vpop.f32.mrb[93].mxu0  ;;  %3571 = vmatprep.mubr.bf16.mxu1 %v1635_v19 }
 0x218   : > { %v3883_v22 = vpop.eup %3882  ;;  %v1426_v32 = vadd.f32 1.0, %v3881_v28  ;;  %v941_v33 = vadd.f32 %v5082_v53, %v940_v11  ;;  %v3442_v34 = vpop.f32.mrb[94].mxu0  ;;  %3572 = vmatmul.mubr.bf16.gmra.mrb[80].mxu1 %v1636_v23  ;;  %v1553_v39 = vmul.f32 %v1425_v6, %v5146_v25 }
 0x219   : > { %v1424_v29 = vadd.f32 1.0, %v3883_v22  ;;  %v5170_v26 = vmul.f32 0.5, %v949_v31  ;;  %v952_v36 = vadd.f32 %v5082_v53, %v3442_v34  ;;  %v943_v38 = vpop.f32.mrb[95].mxu0  ;;  %v1551_v42 = vmul.f32 %v1423_v30, %v5150_v37 }
 0x21a   : > { %v1554_v40 = vmul.f32 %v1426_v32, %v1170_v60  ;;  %v5174_v35 = vmul.f32 0.5, %v941_v33  ;;  %v944_v41 = vadd.f32 %v5082_v53, %v943_v38 }
 0x21b   : > { %v1552_v45 = vmul.f32 %v1424_v29, %v1168_v44  ;;  %3892 = vtanh.f32 %v5170_v26  ;;  %v1178_v46 = vmul.f32 0.5, %v952_v36 }
 0x21c   : > { %3894 = vtanh.f32 %v5174_v35  ;;  %v1176_v47 = vmul.f32 0.5, %v944_v41  ;;  %v1638_v48 = vpack.c.bf16 %v1554_v40, %v1553_v39 }
 0x21d   : > { %v3885_v51 = vpop.eup %3884  ;;  %3896 = vtanh.f32 %v1178_v46  ;;  %v1637_v54 = vpack.c.bf16 %v1552_v45, %v1551_v42 }
 0x21e   : > { %v3887_v55 = vpop.eup %3886  ;;  %v1429_v25 = vadd.f32 1.0, %v3885_v51  ;;  %3898 = vtanh.f32 %v1176_v47  ;;  %v3445_v57 = vpop.f32.mrb[96].mxu0 }
 0x21f   : > { %v3889_v58 = vpop.eup %3888  ;;  %v1427_v59 = vadd.f32 1.0, %v3887_v55  ;;  %v965_v60 = vadd.f32 %v5082_v53, %v3445_v57  ;;  %v956_v37 = vpop.f32.mrb[97].mxu0  ;;  %3575 = vmatprep.mubr.bf16.mxu1 %v1637_v54 }
 0x220   : > { %v3891_v44 = vpop.eup %3890  ;;  %v1430_v52 = vadd.f32 1.0, %v3889_v58  ;;  %v957_v62 = vadd.f32 %v5082_v53, %v956_v37  ;;  %v3446_v63 = vpop.f32.mrb[98].mxu0  ;;  %3576 = vmatmul.mubr.bf16.gmra.mrb[84].mxu1 %v1638_v48  ;;  %v1557_v2 = vmul.f32 %v1429_v25, %v5158_v61 }
 0x221   : > { %v1428_v0 = vadd.f32 1.0, %v3891_v44  ;;  %v5182_v43 = vmul.f32 0.5, %v965_v60  ;;  %v968_v50 = vadd.f32 %v5082_v53, %v3446_v63  ;;  %v959_v1 = vpop.f32.mrb[99].mxu0  ;;  %v1555_v5 = vmul.f32 %v1427_v59, %v5162_v56 }
 0x222   : > { %v1558_v3 = vmul.f32 %v1430_v52, %v1174_v21  ;;  %v5186_v49 = vmul.f32 0.5, %v957_v62  ;;  %v960_v4 = vadd.f32 %v5082_v53, %v959_v1 }
 0x223   : > { %v1556_v7 = vmul.f32 %v1428_v0, %v1172_v14  ;;  %3900 = vtanh.f32 %v5182_v43  ;;  %v1182_v8 = vmul.f32 0.5, %v968_v50 }
 0x224   : > { %3902 = vtanh.f32 %v5186_v49  ;;  %v1180_v9 = vmul.f32 0.5, %v960_v4  ;;  %v1640_v10 = vpack.c.bf16 %v1558_v3, %v1557_v2 }
 0x225   : > { %v3893_v12 = vpop.eup %3892  ;;  %3904 = vtanh.f32 %v1182_v8  ;;  %v1639_v13 = vpack.c.bf16 %v1556_v7, %v1555_v5 }
 0x226   : > { %v3895_v15 = vpop.eup %3894  ;;  %v1433_v61 = vadd.f32 1.0, %v3893_v12  ;;  %3906 = vtanh.f32 %v1180_v9  ;;  %v3449_v16 = vpop.f32.mrb[100].mxu0 }
 0x227   : > { %v3897_v17 = vpop.eup %3896  ;;  %v1431_v18 = vadd.f32 1.0, %v3895_v15  ;;  %v981_v21 = vadd.f32 %v5082_v53, %v3449_v16  ;;  %v972_v56 = vpop.f32.mrb[101].mxu0  ;;  %3579 = vmatprep.mubr.bf16.mxu1 %v1639_v13 }
 0x228   : > { %v3899_v14 = vpop.eup %3898  ;;  %v1434_v23 = vadd.f32 1.0, %v3897_v17  ;;  %v973_v27 = vadd.f32 %v5082_v53, %v972_v56  ;;  %v3450_v19 = vpop.f32.mrb[102].mxu0  ;;  %3580 = vmatmul.mubr.bf16.gmra.mrb[88].mxu1 %v1640_v10  ;;  %v1561_v30 = vmul.f32 %v1433_v61, %v5170_v26 }
 0x229   : > { %v1432_v24 = vadd.f32 1.0, %v3899_v14  ;;  %v5194_v6 = vmul.f32 0.5, %v981_v21  ;;  %v984_v20 = vadd.f32 %v5082_v53, %v3450_v19  ;;  %v975_v28 = vpop.f32.mrb[103].mxu0  ;;  %v1559_v32 = vmul.f32 %v1431_v18, %v5174_v35 }
 0x22a   : > { %v1562_v31 = vmul.f32 %v1434_v23, %v1178_v46  ;;  %v5198_v11 = vmul.f32 0.5, %v973_v27  ;;  %v976_v22 = vadd.f32 %v5082_v53, %v975_v28 }
 0x22b   : > { %v1560_v33 = vmul.f32 %v1432_v24, %v1176_v47  ;;  %3908 = vtanh.f32 %v5194_v6  ;;  %v1186_v34 = vmul.f32 0.5, %v984_v20 }
 0x22c   : > { %3910 = vtanh.f32 %v5198_v11  ;;  %v1184_v29 = vmul.f32 0.5, %v976_v22  ;;  %v1642_v36 = vpack.c.bf16 %v1562_v31, %v1561_v30 }
 0x22d   : > { %v3901_v38 = vpop.eup %3900  ;;  %3912 = vtanh.f32 %v1186_v34  ;;  %v1641_v39 = vpack.c.bf16 %v1560_v33, %v1559_v32 }
 0x22e   : > { %v3903_v40 = vpop.eup %3902  ;;  %v1437_v26 = vadd.f32 1.0, %v3901_v38  ;;  %3914 = vtanh.f32 %v1184_v29  ;;  %v3453_v41 = vpop.f32.mrb[104].mxu0 }
 0x22f   : > { %v3905_v42 = vpop.eup %3904  ;;  %v1435_v45 = vadd.f32 1.0, %v3903_v40  ;;  %v997_v46 = vadd.f32 %v5082_v53, %v3453_v41  ;;  %v988_v35 = vpop.f32.mrb[105].mxu0  ;;  %3583 = vmatprep.mubr.bf16.mxu1 %v1641_v39 }
 0x230   : > { %v3907_v47 = vpop.eup %3906  ;;  %v1438_v48 = vadd.f32 1.0, %v3905_v42  ;;  %v989_v51 = vadd.f32 %v5082_v53, %v988_v35  ;;  %v3454_v54 = vpop.f32.mrb[106].mxu0  ;;  %3584 = vmatmul.mubr.bf16.gmra.mrb[92].mxu1 %v1642_v36  ;;  %v1565_v59 = vmul.f32 %v1437_v26, %v5182_v43 }
 0x231   : > { %v1436_v55 = vadd.f32 1.0, %v3907_v47  ;;  %v5206_v25 = vmul.f32 0.5, %v997_v46  ;;  %v1000_v57 = vadd.f32 %v5082_v53, %v3454_v54  ;;  %v991_v58 = vpop.f32.mrb[107].mxu0  ;;  %v1563_v52 = vmul.f32 %v1435_v45, %v5186_v49 }
 0x232   : > { %v1566_v60 = vmul.f32 %v1438_v48, %v1182_v8  ;;  %v5210_v37 = vmul.f32 0.5, %v989_v51  ;;  %v992_v44 = vadd.f32 %v5082_v53, %v991_v58 }
 0x233   : > { %v1564_v62 = vmul.f32 %v1436_v55, %v1180_v9  ;;  %3916 = vtanh.f32 %v5206_v25  ;;  %v1190_v63 = vmul.f32 0.5, %v1000_v57 }
 0x234   : > { %3918 = vtanh.f32 %v5210_v37  ;;  %v1188_v0 = vmul.f32 0.5, %v992_v44  ;;  %v1644_v50 = vpack.c.bf16 %v1566_v60, %v1565_v59 }
 0x235   : > { %v3909_v1 = vpop.eup %3908  ;;  %3920 = vtanh.f32 %v1190_v63  ;;  %v1643_v2 = vpack.c.bf16 %v1564_v62, %v1563_v52 }
 0x236   : > { %v3911_v3 = vpop.eup %3910  ;;  %v1441_v43 = vadd.f32 1.0, %v3909_v1  ;;  %3922 = vtanh.f32 %v1188_v0  ;;  %v3457_v4 = vpop.f32.mrb[108].mxu0 }
 0x237   : > { %v3913_v5 = vpop.eup %3912  ;;  %v1439_v7 = vadd.f32 1.0, %v3911_v3  ;;  %v1013_v8 = vadd.f32 %v5082_v53, %v3457_v4  ;;  %v1004_v49 = vpop.f32.mrb[109].mxu0  ;;  %3587 = vmatprep.mubr.bf16.mxu1 %v1643_v2 }
 0x238   : > { %v3915_v9 = vpop.eup %3914  ;;  %v1442_v10 = vadd.f32 1.0, %v3913_v5  ;;  %v1005_v12 = vadd.f32 %v5082_v53, %v1004_v49  ;;  %v3458_v13 = vpop.f32.mrb[110].mxu0  ;;  %3588 = vmatmul.mubr.bf16.gmra.mrb[96].mxu1 %v1644_v50  ;;  %v1569_v18 = vmul.f32 %v1441_v43, %v5194_v6 }
 0x239   : > { %v1440_v15 = vadd.f32 1.0, %v3915_v9  ;;  %v5218_v61 = vmul.f32 0.5, %v1013_v8  ;;  %v1016_v16 = vadd.f32 %v5082_v53, %v3458_v13  ;;  %v1007_v17 = vpop.f32.mrb[111].mxu0  ;;  %v1567_v23 = vmul.f32 %v1439_v7, %v5198_v11  ;;  %v5254_v7 = vld [vmem:[%s6245_s4] ss:$0 sm:$0xff] }
 0x23a   : > { %v1570_v21 = vmul.f32 %v1442_v10, %v1186_v34  ;;  %v5222_v56 = vmul.f32 0.5, %v1005_v12  ;;  %v1008_v14 = vadd.f32 %v5082_v53, %v1007_v17 }
 0x23b   : > { %v1568_v27 = vmul.f32 %v1440_v15, %v1184_v29  ;;  %3924 = vtanh.f32 %v5218_v61  ;;  %v1194_v19 = vmul.f32 0.5, %v1016_v16 }
 0x23c   : > { %3926 = vtanh.f32 %v5222_v56  ;;  %v1192_v24 = vmul.f32 0.5, %v1008_v14  ;;  %v1646_v20 = vpack.c.bf16 %v1570_v21, %v1569_v18 }
 0x23d   : > { %v3917_v28 = vpop.eup %3916  ;;  %3928 = vtanh.f32 %v1194_v19  ;;  %v1645_v30 = vpack.c.bf16 %v1568_v27, %v1567_v23 }
 0x23e   : > { %v3919_v31 = vpop.eup %3918  ;;  %v1445_v6 = vadd.f32 1.0, %v3917_v28  ;;  %3930 = vtanh.f32 %v1192_v24  ;;  %v3461_v22 = vpop.f32.mrb[112].mxu0 }
 0x23f   : > { %v3921_v32 = vpop.eup %3920  ;;  %v1443_v33 = vadd.f32 1.0, %v3919_v31  ;;  %v1029_v34 = vadd.f32 %v5082_v53, %v3461_v22  ;;  %v1020_v11 = vpop.f32.mrb[113].mxu0  ;;  %3591 = vmatprep.mubr.bf16.mxu1 %v1645_v30 }
 0x240   : > { %v3923_v29 = vpop.eup %3922  ;;  %v1446_v36 = vadd.f32 1.0, %v3921_v32  ;;  %v1021_v38 = vadd.f32 %v5082_v53, %v1020_v11  ;;  %v3462_v39 = vpop.f32.mrb[114].mxu0  ;;  %3592 = vmatmul.mubr.bf16.gmra.mrb[100].mxu1 %v1646_v20  ;;  %v1573_v45 = vmul.f32 %v1445_v6, %v5206_v25 }
 0x241   : > { %v1444_v40 = vadd.f32 1.0, %v3923_v29  ;;  %v5230_v26 = vmul.f32 0.5, %v1029_v34  ;;  %v1032_v41 = vadd.f32 %v5082_v53, %v3462_v39  ;;  %v1023_v42 = vpop.f32.mrb[115].mxu0  ;;  %v1571_v48 = vmul.f32 %v1443_v33, %v5210_v37 }
 0x242   : > { %v1574_v46 = vmul.f32 %v1446_v36, %v1190_v63  ;;  %v5234_v35 = vmul.f32 0.5, %v1021_v38  ;;  %v1024_v47 = vadd.f32 %v5082_v53, %v1023_v42 }
 0x243   : > { %v1572_v51 = vmul.f32 %v1444_v40, %v1188_v0  ;;  %3932 = vtanh.f32 %v5230_v26  ;;  %v5239_v54 = vmul.f32 0.5, %v1032_v41 }
 0x244   : > { %3934 = vtanh.f32 %v5234_v35  ;;  %v5242_v55 = vmul.f32 0.5, %v1024_v47  ;;  %v1648_v57 = vpack.c.bf16 %v1574_v46, %v1573_v45 }
 0x245   : > { %v3925_v58 = vpop.eup %3924  ;;  %3936 = vtanh.f32 %v5239_v54  ;;  %v1647_v25 = vpack.c.bf16 %v1572_v51, %v1571_v48 }
 0x246   : > { %v3927_v59 = vpop.eup %3926  ;;  %v1449_v60 = vadd.f32 1.0, %v3925_v58  ;;  %3938 = vtanh.f32 %v5242_v55  ;;  %v3465_v44 = vpop.f32.mrb[116].mxu0 }
 0x247   : > { %v3929_v37 = vpop.eup %3928  ;;  %v1447_v52 = vadd.f32 1.0, %v3927_v59  ;;  %v1045_v62 = vadd.f32 %v5082_v53, %v3465_v44  ;;  %v1036_v63 = vpop.f32.mrb[117].mxu0  ;;  %3595 = vmatprep.mubr.bf16.mxu1 %v1647_v25 }
 0x248   : > { %v3931_v0 = vpop.eup %3930  ;;  %v1450_v50 = vadd.f32 1.0, %v3929_v37  ;;  %v1037_v1 = vadd.f32 %v5082_v53, %v1036_v63  ;;  %v3466_v2 = vpop.f32.mrb[118].mxu0  ;;  %3596 = vmatmul.mubr.bf16.gmra.mrb[104].mxu1 %v1648_v57  ;;  %v1577_v8 = vmul.f32 %v1449_v60, %v5218_v61 }
 0x249   : > { %v1448_v3 = vadd.f32 1.0, %v3931_v0  ;;  %v5248_v43 = vmul.f32 0.5, %v1045_v62  ;;  %v1048_v4 = vadd.f32 %v5082_v53, %v3466_v2  ;;  %v1039_v5 = vpop.f32.mrb[119].mxu0  ;;  %v1575_v12 = vmul.f32 %v1447_v52, %v5222_v56 }
 0x24a   : > { %v1578_v49 = vmul.f32 %v1450_v50, %v1194_v19  ;;  %v5257_v9 = vmul.f32 0.5, %v1037_v1  ;;  %v1040_v10 = vadd.f32 %v5082_v53, %v1039_v5 }
 0x24b   : > { %v1576_v13 = vmul.f32 %v1448_v3, %v1192_v24  ;;  %3940 = vtanh.f32 %v5248_v43  ;;  %v5262_v15 = vmul.f32 0.5, %v1048_v4  ;;  %v3493_v16 = vpop.f32.mrb[0].mxu1 }
 0x24c   : > { %3942 = vtanh.f32 %v5257_v9  ;;  %v5265_v17 = vmul.f32 0.5, %v1040_v10  ;;  %v1773_v18 = vadd.f32 %v3493_v16, %v5254_v7  ;;  %v1764_v61 = vpop.f32.mrb[1].mxu1  ;;  %v1650_v21 = vpack.c.bf16 %v1578_v49, %v1577_v8 }
 0x24d   : > { %v3933_v14 = vpop.eup %3932  ;;  %3944 = vtanh.f32 %v5262_v15  ;;  %v1765_v23 = vadd.f32 %v5254_v7, %v1764_v61  ;;  %v3494_v56 = vpop.f32.mrb[2].mxu1  ;;  %v1649_v27 = vpack.c.bf16 %v1576_v13, %v1575_v12 }
 0x24e   : > { %v3935_v19 = vpop.eup %3934  ;;  %v1453_v24 = vadd.f32 1.0, %v3933_v14  ;;  %3946 = vtanh.f32 %v5265_v17  ;;  %v5271_v20 = vmul.f32 0.5, %v1773_v18  ;;  %v1776_v28 = vadd.f32 %v3494_v56, %v5254_v7  ;;  %v3469_v30 = vpop.f32.mrb[120].mxu0 }
 0x24f   : > { %v1767_v31 = vpop.f32.mrb[3].mxu1  ;;  %v3937_v6 = vpop.eup %3936  ;;  %v1451_v22 = vadd.f32 1.0, %v3935_v19  ;;  %v5274_v32 = vmul.f32 0.5, %v1765_v23  ;;  %v1061_v33 = vadd.f32 %v5082_v53, %v3469_v30  ;;  %3599 = vmatprep.mubr.bf16.mxu1 %v1649_v27 }
 0x250   : > { %v1768_v34 = vadd.f32 %v5254_v7, %v1767_v31  ;;  %v1052_v11 = vpop.f32.mrb[121].mxu0  ;;  %v3939_v29 = vpop.eup %3938  ;;  %v1581_v36 = vmul.f32 %v1453_v24, %v5230_v26  ;;  %v1454_v38 = vadd.f32 1.0, %v3937_v6  ;;  %3948 = vtanh.f32 %v5271_v20  ;;  %3600 = vmatmul.mubr.bf16.gmra.mrb[108].mxu1 %v1650_v21  ;;  %v4221_v24 = vld [vmem:[%s6243_s2] ss:$0 sm:$0xff] }
 0x251   : > { %v5280_v39 = vmul.f32 0.5, %v1776_v28  ;;  %v3470_v40 = vpop.f32.mrb[122].mxu0  ;;  %v1579_v41 = vmul.f32 %v1451_v22, %v5234_v35  ;;  %v1452_v42 = vadd.f32 1.0, %v3939_v29  ;;  %3950 = vtanh.f32 %v5274_v32 }
 0x252   : > { %v5284_v45 = vmul.f32 0.5, %v1061_v33  ;;  %v1055_v46 = vpop.f32.mrb[123].mxu0  ;;  %v1582_v47 = vmul.f32 %v1454_v38, %v5239_v54  ;;  %v5288_v26 = vmul.f32 0.5, %v1768_v34  ;;  %v1053_v48 = vadd.f32 %v5082_v53, %v1052_v11 }
 0x253   : > { %3952 = vtanh.f32 %v5280_v39  ;;  %v1580_v51 = vmul.f32 %v1452_v42, %v5242_v55  ;;  %v1064_v35 = vadd.f32 %v5082_v53, %v3470_v40  ;;  %v1056_v57 = vadd.f32 %v5082_v53, %v1055_v46  ;;  %v3497_v58 = vpop.f32.mrb[4].mxu1 }
 0x254   : > { %3954 = vtanh.f32 %v5284_v45  ;;  %v5296_v25 = vmul.f32 0.5, %v1053_v48  ;;  %v1789_v54 = vadd.f32 %v3497_v58, %v5254_v7  ;;  %v1780_v59 = vpop.f32.mrb[5].mxu1  ;;  %v1652_v60 = vpack.c.bf16 %v1582_v47, %v1581_v36 }
 0x255   : > { %3956 = vtanh.f32 %v5288_v26  ;;  %v3941_v44 = vpop.eup %3940  ;;  %v5299_v37 = vmul.f32 0.5, %v1064_v35  ;;  %v5301_v52 = vmul.f32 0.5, %v1056_v57  ;;  %v1781_v55 = vadd.f32 %v5254_v7, %v1780_v59  ;;  %v3498_v62 = vpop.f32.mrb[6].mxu1  ;;  %v4222_v57 = vld [vmem:[%s4728_s6 + $0x10] sm:$0xff] }
 0x256   : > { %v1651_v63 = vpack.c.bf16 %v1580_v51, %v1579_v41  ;;  %v3943_v0 = vpop.eup %3942  ;;  %v1457_v50 = vadd.f32 1.0, %v3941_v44  ;;  %3958 = vtanh.f32 %v5296_v25  ;;  %v5305_v1 = vmul.f32 0.5, %v1789_v54  ;;  %v3473_v3 = vpop.f32.mrb[124].mxu0 }
 0x257   : > { %v1792_v2 = vadd.f32 %v3498_v62, %v5254_v7  ;;  %v1783_v4 = vpop.f32.mrb[7].mxu1  ;;  %v3945_v5 = vpop.eup %3944  ;;  %v1455_v8 = vadd.f32 1.0, %v3943_v0  ;;  %3960 = vtanh.f32 %v5299_v37  ;;  %v5309_v49 = vmul.f32 0.5, %v1781_v55 }
 0x258   : > { %v1077_v10 = vadd.f32 %v5082_v53, %v3473_v3  ;;  %v1068_v12 = vpop.f32.mrb[125].mxu0  ;;  %3603 = vmatprep.mubr.bf16.mxu1 %v1651_v63  ;;  %v3947_v13 = vpop.eup %3946  ;;  %v5313_v16 = vmul.f32 %v1457_v50, %v5248_v43  ;;  %v1458_v18 = vadd.f32 1.0, %v3945_v5  ;;  %3962 = vtanh.f32 %v5301_v52 }
 0x259   : > { %v5316_v61 = vmul.f32 0.5, %v1792_v2  ;;  %v3474_v21 = vpop.f32.mrb[126].mxu0  ;;  %3604 = vmatmul.mubr.bf16.gmra.mrb[112].mxu1 %v1652_v60  ;;  %v5319_v14 = vmul.f32 %v1455_v8, %v5257_v9  ;;  %v1456_v23 = vadd.f32 1.0, %v3947_v13  ;;  %3964 = vtanh.f32 %v5305_v1  ;;  %v4223_v60 = vld [vmem:[%s4728_s6] sm:$0xff] }
 0x25a   : > { %v5322_v53 = vmul.f32 0.5, %v1077_v10  ;;  %v1071_v56 = vpop.f32.mrb[127].mxu0  ;;  %v3949_v27 = vpop.eup %3948  ;;  %v5325_v43 = vmul.f32 %v1458_v18, %v5262_v15  ;;  %3966 = vtanh.f32 %v5309_v49  ;;  %v1784_v19 = vadd.f32 %v5254_v7, %v1783_v4  ;;  %v4225_v10 = vld [vmem:[%s4728_s6 + $0x8] sm:$0xff] }
 0x25b   : > { %v1069_v9 = vadd.f32 %v4221_v24, %v1068_v12  ;;  %v3951_v28 = vpop.eup %3950  ;;  %v5333_v30 = vmul.f32 %v1456_v23, %v5265_v17  ;;  %v2533_v31 = vadd.f32 1.0, %v3949_v27  ;;  %3968 = vtanh.f32 %v5316_v61  ;;  %v3501_v22 = vpop.f32.mrb[8].mxu1 }
 0x25c   : > { %v1080_v6 = vadd.f32 %v4221_v24, %v3474_v21  ;;  %v2531_v33 = vadd.f32 1.0, %v3951_v28  ;;  %3970 = vtanh.f32 %v5322_v53  ;;  %v5337_v34 = vmul.f32 0.5, %v1784_v19  ;;  %v1796_v29 = vpop.f32.mrb[9].mxu1 }
 0x25d   : > { %v3953_v15 = vpop.eup %3952  ;;  %v5339_v11 = vmul.f32 0.5, %v1069_v9  ;;  %v2661_v38 = vmul.f32 %v2533_v31, %v5271_v20  ;;  %v1072_v41 = vadd.f32 %v4221_v24, %v1071_v56  ;;  %v3502_v42 = vpop.f32.mrb[10].mxu1  ;;  %v1805_v51 = vadd.f32 %v3501_v22, %v5254_v7 }
 0x25e   : > { %v3955_v36 = vpop.eup %3954  ;;  %v2534_v17 = vadd.f32 1.0, %v3953_v15  ;;  %v5342_v40 = vmul.f32 0.5, %v1080_v6  ;;  %v2659_v47 = vmul.f32 %v2531_v33, %v5274_v32  ;;  %3972 = vtanh.f32 %v5337_v34  ;;  %v1799_v35 = vpop.f32.mrb[11].mxu1 }
 0x25f   : > { %v3957_v46 = vpop.eup %3956  ;;  %v1461_v48 = vadd.f32 1.0, %v3955_v36  ;;  %v2789_v58 = vadd.f32 %v4222_v57, %v2661_v38  ;;  %3974 = vtanh.f32 %v5339_v11  ;;  %v5355_v55 = vmul.f32 0.5, %v1072_v41 }
 0x260   : > { %v2662_v20 = vmul.f32 %v2534_v17, %v5280_v39  ;;  %v2532_v54 = vadd.f32 1.0, %v3957_v46  ;;  %v3959_v59 = vpop.eup %3958  ;;  %v2787_v44 = vadd.f32 %v4223_v60, %v2659_v47  ;;  %3976 = vtanh.f32 %v5342_v40  ;;  %v4224_v39 = vld [vmem:[%s4728_s6 + $0x18] sm:$0xff] }
 0x261   : > { %v5352_v32 = vmul.f32 %v1461_v48, %v5284_v45  ;;  %v3961_v62 = vpop.eup %3960  ;;  %2917 = vst [vmem:[%s5359_s16 + $0x10] sm:$0xff] %v2789_v58  ;;  %v1459_v50 = vadd.f32 1.0, %v3959_v59  ;;  %v5364_v45 = vmul.f32 0.5, %v1805_v51  ;;  %3978 = vtanh.f32 %v5355_v55 }
 0x262   : > { %v2790_v63 = vadd.f32 %v4224_v39, %v2662_v20  ;;  %v2660_v0 = vmul.f32 %v2532_v54, %v5288_v26  ;;  %v3963_v2 = vpop.eup %3962  ;;  %2915 = vst [vmem:[%s5359_s16] sm:$0xff] %v2787_v44  ;;  %v1462_v3 = vadd.f32 1.0, %v3961_v62  ;;  %v1797_v4 = vadd.f32 %v5254_v7, %v1796_v29 }
 0x263   : > { %v1808_v5 = vadd.f32 %v3502_v42, %v5254_v7  ;;  %v3965_v8 = vpop.eup %3964  ;;  %v5373_v13 = vmul.f32 %v1459_v50, %v5296_v25  ;;  %v1460_v26 = vadd.f32 1.0, %v3963_v2  ;;  %3980 = vtanh.f32 %v5364_v45  ;;  %v3505_v18 = vpop.f32.mrb[12].mxu1  ;;  %v4227_v42 = vld [vmem:[%s4728_s6 + $0x20] sm:$0xff]  ;;  %v4229_v2 = vld [vmem:[%s4728_s6 + $0x28] sm:$0xff] }
 0x264   : > { %2918 = vst [vmem:[%s5359_s16 + $0x18] sm:$0xff] %v2790_v63  ;;  %v2788_v12 = vadd.f32 %v4225_v10, %v2660_v0  ;;  %v3967_v21 = vpop.eup %3966  ;;  %v5377_v23 = vmul.f32 %v1462_v3, %v5299_v37  ;;  %v2537_v56 = vadd.f32 1.0, %v3965_v8  ;;  %v5379_v27 = vmul.f32 0.5, %v1797_v4  ;;  %v1812_v24 = vpop.f32.mrb[13].mxu1 }
 0x265   : > { %v5381_v19 = vmul.f32 0.5, %v1808_v5  ;;  %v3969_v9 = vpop.eup %3968  ;;  %v1588_v28 = vmul.f32 %v1460_v26, %v5301_v52  ;;  %v2535_v25 = vadd.f32 1.0, %v3967_v21  ;;  %v1800_v31 = vadd.f32 %v5254_v7, %v1799_v35  ;;  %v3506_v22 = vpop.f32.mrb[14].mxu1  ;;  %v4228_v35 = vld [vmem:[%s4728_s6 + $0x38] sm:$0xff] }
 0x266   : > { %2916 = vst [vmem:[%s5359_s16 + $0x8] sm:$0xff] %v2788_v12  ;;  %v1653_v6 = vpack.c.bf16 %v5333_v30, %v5319_v14  ;;  %v3971_v37 = vpop.eup %3970  ;;  %v2665_v15 = vmul.f32 %v2537_v56, %v5305_v1  ;;  %v2538_v33 = vadd.f32 1.0, %v3969_v9  ;;  %3982 = vtanh.f32 %v5379_v27  ;;  %v1815_v36 = vpop.f32.mrb[15].mxu1  ;;  %v4226_v1 = vld [vmem:[%s4728_s6 + $0x30] sm:$0xff] }
 0x267   : > { %v1654_v29 = vpack.c.bf16 %v5325_v43, %v5313_v16  ;;  %v2663_v52 = vmul.f32 %v2535_v25, %v5309_v49  ;;  %v1465_v38 = vadd.f32 1.0, %v3971_v37  ;;  %3984 = vtanh.f32 %v5381_v19 }
 0x268   : > { %v5394_v17 = vmul.f32 0.5, %v1800_v31  ;;  %3607 = vmatprep.mubr.bf16.mxu1 %v1653_v6  ;;  %v3973_v14 = vpop.eup %3972  ;;  %v2793_v30 = vadd.f32 %v4226_v1, %v2665_v15  ;;  %v2666_v41 = vmul.f32 %v2538_v33, %v5316_v61  ;;  %v1821_v16 = vadd.f32 %v3505_v18, %v5254_v7  ;;  %v4230_v6 = vld [vmem:[%s4728_s6 + $0x50] sm:$0xff] }
 0x269   : > { %3608 = vmatmul.mubr.bf16.gmra.mrb[116].mxu1 %v1654_v29  ;;  %v1813_v43 = vadd.f32 %v5254_v7, %v1812_v24  ;;  %v3975_v49 = vpop.eup %3974  ;;  %v2791_v46 = vadd.f32 %v4227_v42, %v2663_v52  ;;  %v5402_v47 = vmul.f32 %v1465_v38, %v5322_v53  ;;  %v2536_v48 = vadd.f32 1.0, %v3973_v14 }
 0x26a   : > { %3986 = vtanh.f32 %v5394_v17  ;;  %v3977_v51 = vpop.eup %3976  ;;  %2921 = vst [vmem:[%s5359_s16 + $0x30] sm:$0xff] %v2793_v30  ;;  %v2794_v61 = vadd.f32 %v4228_v35, %v2666_v41  ;;  %v1463_v57 = vadd.f32 1.0, %v3975_v49  ;;  %v5407_v58 = vmul.f32 0.5, %v1821_v16  ;;  %v4231_v30 = vld [vmem:[%s4728_s6 + $0x40] sm:$0xff]  ;;  %v4232_v49 = vld [vmem:[%s4728_s6 + $0x58] sm:$0xff] }
 0x26b   : > { %v5409_v20 = vmul.f32 0.5, %v1813_v43  ;;  %2919 = vst [vmem:[%s5359_s16 + $0x20] sm:$0xff] %v2791_v46  ;;  %v2664_v54 = vmul.f32 %v2536_v48, %v5337_v34  ;;  %v1466_v59 = vadd.f32 1.0, %v3977_v51  ;;  %v1824_v53 = vadd.f32 %v3506_v22, %v5254_v7  ;;  %v3509_v44 = vpop.f32.mrb[16].mxu1  ;;  %v3979_v62 = vpop.eup %3978 }
 0x26c   : > { %v1816_v60 = vadd.f32 %v5254_v7, %v1815_v36  ;;  %2922 = vst [vmem:[%s5359_s16 + $0x38] sm:$0xff] %v2794_v61  ;;  %v1591_v39 = vmul.f32 %v1463_v57, %v5339_v11  ;;  %3988 = vtanh.f32 %v5407_v58  ;;  %v1655_v63 = vpack.c.bf16 %v1588_v28, %v5373_v13  ;;  %v1828_v50 = vpop.f32.mrb[17].mxu1 }
 0x26d   : > { %v1656_v0 = vpack.c.bf16 %v5377_v23, %v5352_v32  ;;  %v3981_v34 = vpop.eup %3980  ;;  %v2792_v3 = vadd.f32 %v4229_v2, %v2664_v54  ;;  %v5423_v4 = vmul.f32 %v1466_v59, %v5342_v40  ;;  %v1464_v5 = vadd.f32 1.0, %v3979_v62  ;;  %v3510_v8 = vpop.f32.mrb[18].mxu1  ;;  %v4233_v54 = vld [vmem:[%s4728_s6 + $0x48] sm:$0xff] }
 0x26e   : > { %3990 = vtanh.f32 %v5409_v20  ;;  %v2541_v11 = vadd.f32 1.0, %v3981_v34  ;;  %v5426_v10 = vmul.f32 0.5, %v1824_v53  ;;  %v5428_v12 = vmul.f32 0.5, %v1816_v60  ;;  %3611 = vmatprep.mubr.bf16.mxu1 %v1655_v63  ;;  %v1831_v32 = vpop.f32.mrb[19].mxu1 }
 0x26f   : > { %v1837_v13 = vadd.f32 %v3509_v44, %v5254_v7  ;;  %2920 = vst [vmem:[%s5359_s16 + $0x28] sm:$0xff] %v2792_v3  ;;  %v1592_v26 = vmul.f32 %v1464_v5, %v5355_v55  ;;  %v1829_v40 = vadd.f32 %v5254_v7, %v1828_v50  ;;  %v1840_v18 = vadd.f32 %v3510_v8, %v5254_v7  ;;  %v4235_v3 = vld [vmem:[%s4728_s6 + $0x60] sm:$0xff] }
 0x270   : > { %v1832_v21 = vadd.f32 %v5254_v7, %v1831_v32  ;;  %v3983_v23 = vpop.eup %3982  ;;  %v2669_v56 = vmul.f32 %v2541_v11, %v5364_v45  ;;  %3992 = vtanh.f32 %v5426_v10  ;;  %v1658_v9 = vpack.c.bf16 %v5423_v4, %v5402_v47 }
 0x271   : > { %3612 = vmatmul.mubr.bf16.gmra.mrb[120].mxu1 %v1656_v0  ;;  %v5438_v24 = vmul.f32 0.5, %v1837_v13  ;;  %v3985_v28 = vpop.eup %3984  ;;  %v2539_v55 = vadd.f32 1.0, %v3983_v23  ;;  %3994 = vtanh.f32 %v5428_v12  ;;  %v5443_v25 = vmul.f32 0.5, %v1829_v40  ;;  %v4234_v0 = vld [vmem:[%s4728_s6 + $0x70] sm:$0xff] }
 0x272   : > { %v5445_v31 = vmul.f32 0.5, %v1840_v18  ;;  %v2797_v45 = vadd.f32 %v4230_v6, %v2669_v56  ;;  %v2542_v22 = vadd.f32 1.0, %v3985_v28  ;;  %v5449_v37 = vmul.f32 0.5, %v1832_v21  ;;  %v4236_v6 = vld [vmem:[%s4728_s6 + $0x78] sm:$0xff] }
 0x273   : > { %3996 = vtanh.f32 %v5438_v24  ;;  %v2667_v33 = vmul.f32 %v2539_v55, %v5379_v27  ;;  %v1657_v29 = vpack.c.bf16 %v1592_v26, %v1591_v39  ;;  %v3513_v36 = vpop.f32.mrb[20].mxu1 }
 0x274   : > { %v3987_v15 = vpop.eup %3986  ;;  %3998 = vtanh.f32 %v5443_v25  ;;  %2925 = vst [vmem:[%s5359_s16 + $0x50] sm:$0xff] %v2797_v45  ;;  %v2670_v52 = vmul.f32 %v2542_v22, %v5381_v19  ;;  %v1853_v14 = vadd.f32 %v3513_v36, %v5254_v7  ;;  %v1844_v1 = vpop.f32.mrb[21].mxu1 }
 0x275   : > { %v2540_v38 = vadd.f32 1.0, %v3987_v15  ;;  %4000 = vtanh.f32 %v5445_v31  ;;  %v2795_v41 = vadd.f32 %v4231_v30, %v2667_v33  ;;  %3615 = vmatprep.mubr.bf16.mxu1 %v1657_v29  ;;  %v1845_v27 = vadd.f32 %v5254_v7, %v1844_v1  ;;  %v3514_v16 = vpop.f32.mrb[22].mxu1  ;;  %v4237_v33 = vld [vmem:[%s4728_s6 + $0x68] sm:$0xff]  ;;  %v4239_v30 = vld [vmem:[%s4728_s6 + $0x80] sm:$0xff] }
 0x276   : > { %4002 = vtanh.f32 %v5449_v37  ;;  %v3989_v43 = vpop.eup %3988  ;;  %v2798_v19 = vadd.f32 %v4232_v49, %v2670_v52  ;;  %v5462_v46 = vmul.f32 0.5, %v1853_v14  ;;  %v1856_v47 = vadd.f32 %v3514_v16, %v5254_v7  ;;  %v1847_v48 = vpop.f32.mrb[23].mxu1  ;;  %v4238_v52 = vld [vmem:[%s4728_s6 + $0x90] sm:$0xff] }
 0x277   : > { %v2668_v42 = vmul.f32 %v2540_v38, %v5394_v17  ;;  %2923 = vst [vmem:[%s5359_s16 + $0x40] sm:$0xff] %v2795_v41  ;;  %v2545_v35 = vadd.f32 1.0, %v3989_v43  ;;  %v5466_v61 = vmul.f32 0.5, %v1845_v27  ;;  %v1848_v57 = vadd.f32 %v5254_v7, %v1847_v48  ;;  %v4240_v43 = vld [vmem:[%s4728_s6 + $0x98] sm:$0xff] }
 0x278   : > { %v3991_v51 = vpop.eup %3990  ;;  %2926 = vst [vmem:[%s5359_s16 + $0x58] sm:$0xff] %v2798_v19  ;;  %4004 = vtanh.f32 %v5462_v46  ;;  %v5472_v17 = vmul.f32 0.5, %v1856_v47  ;;  %v4241_v47 = vld [vmem:[%s4728_s6 + $0x88] sm:$0xff] }
 0x279   : > { %v2796_v59 = vadd.f32 %v4233_v54, %v2668_v42  ;;  %v2543_v53 = vadd.f32 1.0, %v3991_v51  ;;  %3616 = vmatmul.mubr.bf16.gmra.mrb[124].mxu1 %v1658_v9  ;;  %v2673_v60 = vmul.f32 %v2545_v35, %v5407_v58  ;;  %4006 = vtanh.f32 %v5466_v61 }
 0x27a   : > { %v5476_v44 = vmul.f32 0.5, %v1848_v57  ;;  %v3993_v62 = vpop.eup %3992  ;;  %4008 = vtanh.f32 %v5472_v17 }
 0x27b   : > { %2924 = vst [vmem:[%s5359_s16 + $0x48] sm:$0xff] %v2796_v59  ;;  %v2671_v39 = vmul.f32 %v2543_v53, %v5409_v20  ;;  %v3995_v63 = vpop.eup %3994  ;;  %v2801_v50 = vadd.f32 %v4234_v0, %v2673_v60  ;;  %v2546_v34 = vadd.f32 1.0, %v3993_v62  ;;  %v3517_v2 = vpop.f32.mrb[24].mxu1 }
 0x27c   : > { %4010 = vtanh.f32 %v5476_v44  ;;  %v2544_v5 = vadd.f32 1.0, %v3995_v63  ;;  %v1869_v8 = vadd.f32 %v3517_v2, %v5254_v7  ;;  %v1860_v11 = vpop.f32.mrb[25].mxu1 }
 0x27d   : > { %v3997_v58 = vpop.eup %3996  ;;  %v2799_v4 = vadd.f32 %v4235_v3, %v2671_v39  ;;  %2929 = vst [vmem:[%s5359_s16 + $0x70] sm:$0xff] %v2801_v50  ;;  %v2674_v20 = vmul.f32 %v2546_v34, %v5426_v10  ;;  %v1861_v26 = vadd.f32 %v5254_v7, %v1860_v11  ;;  %v3518_v40 = vpop.f32.mrb[26].mxu1  ;;  %v4242_v34 = vld [vmem:[%s4728_s6 + $0xb0] sm:$0xff]  ;;  %v4244_v11 = vld [vmem:[%s4728_s6 + $0xb8] sm:$0xff] }
 0x27e   : > { %v3999_v13 = vpop.eup %3998  ;;  %v2549_v32 = vadd.f32 1.0, %v3997_v58  ;;  %v2672_v21 = vmul.f32 %v2544_v5, %v5428_v12  ;;  %v5490_v56 = vmul.f32 0.5, %v1869_v8  ;;  %v1872_v9 = vadd.f32 %v3518_v40, %v5254_v7  ;;  %v1863_v28 = vpop.f32.mrb[27].mxu1 }
 0x27f   : > { %v4001_v18 = vpop.eup %4000  ;;  %2927 = vst [vmem:[%s5359_s16 + $0x60] sm:$0xff] %v2799_v4  ;;  %v2547_v23 = vadd.f32 1.0, %v3999_v13  ;;  %v2802_v10 = vadd.f32 %v4236_v6, %v2674_v20  ;;  %v5495_v15 = vmul.f32 0.5, %v1861_v26  ;;  %v1864_v27 = vadd.f32 %v5254_v7, %v1863_v28  ;;  %v4243_v4 = vld [vmem:[%s4728_s6 + $0xa0] sm:$0xff] }
 0x280   : > { %v4003_v55 = vpop.eup %4002  ;;  %v2677_v45 = vmul.f32 %v2549_v32, %v5438_v24  ;;  %v2550_v22 = vadd.f32 1.0, %v4001_v18  ;;  %v2800_v12 = vadd.f32 %v4237_v33, %v2672_v21  ;;  %4012 = vtanh.f32 %v5490_v56  ;;  %v4245_v32 = vld [vmem:[%s4728_s6 + $0xa8] sm:$0xff] }
 0x281   : > { %v2675_v29 = vmul.f32 %v2547_v23, %v5443_v25  ;;  %v2548_v36 = vadd.f32 1.0, %v4003_v55  ;;  %2930 = vst [vmem:[%s5359_s16 + $0x78] sm:$0xff] %v2802_v10  ;;  %4014 = vtanh.f32 %v5495_v15  ;;  %v5504_v24 = vmul.f32 0.5, %v1872_v9 }
 0x282   : > { %v2805_v38 = vadd.f32 %v4238_v52, %v2677_v45  ;;  %v2678_v14 = vmul.f32 %v2550_v22, %v5445_v31  ;;  %v4005_v1 = vpop.eup %4004  ;;  %2928 = vst [vmem:[%s5359_s16 + $0x68] sm:$0xff] %v2800_v12  ;;  %v5515_v35 = vmul.f32 0.5, %v1864_v27  ;;  %v4246_v52 = vld [vmem:[%s4728_s6 + $0xd0] sm:$0xff] }
 0x283   : > { %v2803_v25 = vadd.f32 %v4239_v30, %v2675_v29  ;;  %v2676_v41 = vmul.f32 %v2548_v36, %v5449_v37  ;;  %v4007_v16 = vpop.eup %4006  ;;  %v2553_v31 = vadd.f32 1.0, %v4005_v1  ;;  %4016 = vtanh.f32 %v5504_v24  ;;  %v3521_v19 = vpop.f32.mrb[28].mxu1  ;;  %v4247_v30 = vld [vmem:[%s4728_s6 + $0xc0] sm:$0xff] }
 0x284   : > { %2933 = vst [vmem:[%s5359_s16 + $0x90] sm:$0xff] %v2805_v38  ;;  %v2806_v49 = vadd.f32 %v4240_v43, %v2678_v14  ;;  %v4009_v42 = vpop.eup %4008  ;;  %v2551_v51 = vadd.f32 1.0, %v4007_v16  ;;  %v1885_v37 = vadd.f32 %v3521_v19, %v5254_v7  ;;  %v1876_v57 = vpop.f32.mrb[29].mxu1  ;;  %4018 = vtanh.f32 %v5515_v35 }
 0x285   : > { %2931 = vst [vmem:[%s5359_s16 + $0x80] sm:$0xff] %v2803_v25  ;;  %v2804_v48 = vadd.f32 %v4241_v47, %v2676_v41  ;;  %v2681_v59 = vmul.f32 %v2553_v31, %v5462_v46  ;;  %v2554_v53 = vadd.f32 1.0, %v4009_v42  ;;  %v1877_v60 = vadd.f32 %v5254_v7, %v1876_v57  ;;  %v3522_v62 = vpop.f32.mrb[30].mxu1 }
 0x286   : > { %v4011_v54 = vpop.eup %4010  ;;  %2934 = vst [vmem:[%s5359_s16 + $0x98] sm:$0xff] %v2806_v49  ;;  %v2679_v39 = vmul.f32 %v2551_v51, %v5466_v61  ;;  %v5524_v0 = vmul.f32 0.5, %v1885_v37  ;;  %v1879_v50 = vpop.f32.mrb[31].mxu1  ;;  %v1888_v3 = vadd.f32 %v3522_v62, %v5254_v7  ;;  %v4248_v49 = vld [vmem:[%s4728_s6 + $0xd8] sm:$0xff] }
 0x287   : > { %2932 = vst [vmem:[%s5359_s16 + $0x88] sm:$0xff] %v2804_v48  ;;  %v2552_v63 = vadd.f32 1.0, %v4011_v54  ;;  %v2809_v2 = vadd.f32 %v4242_v34, %v2681_v59  ;;  %v2682_v46 = vmul.f32 %v2554_v53, %v5472_v17  ;;  %v5528_v58 = vmul.f32 0.5, %v1877_v60  ;;  %v4249_v54 = vld [vmem:[%s4728_s6 + $0xc8] sm:$0xff] }
 0x288   : > { %v2807_v61 = vadd.f32 %v4243_v4, %v2679_v39  ;;  %4020 = vtanh.f32 %v5524_v0  ;;  %v1880_v8 = vadd.f32 %v5254_v7, %v1879_v50  ;;  %v5538_v17 = vmul.f32 0.5, %v1888_v3 }
 0x289   : > { %v2680_v5 = vmul.f32 %v2552_v63, %v5476_v44  ;;  %2937 = vst [vmem:[%s5359_s16 + $0xb0] sm:$0xff] %v2809_v2  ;;  %v2810_v13 = vadd.f32 %v4244_v11, %v2682_v46  ;;  %4022 = vtanh.f32 %v5528_v58  ;;  %v4250_v46 = vld [vmem:[%s4728_s6 + $0xf0] sm:$0xff] }
 0x28a   : > { %v4013_v20 = vpop.eup %4012  ;;  %2935 = vst [vmem:[%s5359_s16 + $0xa0] sm:$0xff] %v2807_v61  ;;  %v5542_v40 = vmul.f32 0.5, %v1880_v8  ;;  %4024 = vtanh.f32 %v5538_v17 }
 0x28b   : > { %v2808_v26 = vadd.f32 %v4245_v32, %v2680_v5  ;;  %v4015_v18 = vpop.eup %4014  ;;  %2938 = vst [vmem:[%s5359_s16 + $0xb8] sm:$0xff] %v2810_v13  ;;  %v2557_v44 = vadd.f32 1.0, %v4013_v20  ;;  %v3525_v21 = vpop.f32.mrb[32].mxu1  ;;  %v4251_v5 = vld [vmem:[%s4728_s6 + $0xe0] sm:$0xff] }
 0x28c   : > { %v2555_v23 = vadd.f32 1.0, %v4015_v18  ;;  %4026 = vtanh.f32 %v5542_v40  ;;  %v1901_v9 = vadd.f32 %v3525_v21, %v5254_v7  ;;  %v1892_v28 = vpop.f32.mrb[33].mxu1 }
 0x28d   : > { %2936 = vst [vmem:[%s5359_s16 + $0xa8] sm:$0xff] %v2808_v26  ;;  %v4017_v55 = vpop.eup %4016  ;;  %v2685_v6 = vmul.f32 %v2557_v44, %v5490_v56  ;;  %v1893_v10 = vadd.f32 %v5254_v7, %v1892_v28  ;;  %v3526_v45 = vpop.f32.mrb[34].mxu1  ;;  %v4252_v26 = vld [vmem:[%s4728_s6 + $0xf8] sm:$0xff]  ;;  %v4253_v44 = vld [vmem:[%s4728_s6 + $0xe8] sm:$0xff] }
 0x28e   : > { %v2683_v22 = vmul.f32 %v2555_v23, %v5495_v15  ;;  %v2558_v33 = vadd.f32 1.0, %v4017_v55  ;;  %v5552_v12 = vmul.f32 0.5, %v1901_v9  ;;  %v1904_v29 = vadd.f32 %v3526_v45, %v5254_v7  ;;  %v1895_v36 = vpop.f32.mrb[35].mxu1  ;;  %v4019_v1 = vpop.eup %4018 }
 0x28f   : > { %v2813_v38 = vadd.f32 %v4246_v52, %v2685_v6  ;;  %v5556_v14 = vmul.f32 0.5, %v1893_v10  ;;  %v1896_v56 = vadd.f32 %v5254_v7, %v1895_v36  ;;  %v2556_v27 = vadd.f32 1.0, %v4019_v1 }
 0x290   : > { %v2811_v25 = vadd.f32 %v4247_v30, %v2683_v22  ;;  %v2686_v41 = vmul.f32 %v2558_v33, %v5504_v24  ;;  %4028 = vtanh.f32 %v5552_v12  ;;  %v5562_v15 = vmul.f32 0.5, %v1904_v29  ;;  %v4254_v30 = vld [vmem:[%s4728_s6 + $0x110] sm:$0xff] }
 0x291   : > { %2941 = vst [vmem:[%s5359_s16 + $0xd0] sm:$0xff] %v2813_v38  ;;  %4030 = vtanh.f32 %v5556_v14  ;;  %v5566_v16 = vmul.f32 0.5, %v1896_v56  ;;  %v2684_v24 = vmul.f32 %v2556_v27, %v5515_v35 }
 0x292   : > { %v4021_v43 = vpop.eup %4020  ;;  %2939 = vst [vmem:[%s5359_s16 + $0xc0] sm:$0xff] %v2811_v25  ;;  %v2814_v31 = vadd.f32 %v4248_v49, %v2686_v41  ;;  %4032 = vtanh.f32 %v5562_v15 }
 0x293   : > { %v4023_v19 = vpop.eup %4022  ;;  %v2561_v42 = vadd.f32 1.0, %v4021_v43  ;;  %4034 = vtanh.f32 %v5566_v16  ;;  %v3529_v47 = vpop.f32.mrb[36].mxu1  ;;  %v2812_v59 = vadd.f32 %v4249_v54, %v2684_v24  ;;  %v4255_v43 = vld [vmem:[%s4728_s6 + $0x100] sm:$0xff] }
 0x294   : > { %2942 = vst [vmem:[%s5359_s16 + $0xd8] sm:$0xff] %v2814_v31  ;;  %v2559_v48 = vadd.f32 1.0, %v4023_v19  ;;  %v1917_v51 = vadd.f32 %v3529_v47, %v5254_v7  ;;  %v1908_v37 = vpop.f32.mrb[37].mxu1  ;;  %v4025_v57 = vpop.eup %4024  ;;  %v4256_v19 = vld [vmem:[%s4728_s6 + $0x118] sm:$0xff]  ;;  %v4257_v47 = vld [vmem:[%s4728_s6 + $0x108] sm:$0xff] }
 0x295   : > { %v2689_v53 = vmul.f32 %v2561_v42, %v5524_v0  ;;  %v1909_v60 = vadd.f32 %v5254_v7, %v1908_v37  ;;  %v3530_v35 = vpop.f32.mrb[38].mxu1  ;;  %v2562_v63 = vadd.f32 1.0, %v4025_v57  ;;  %2940 = vst [vmem:[%s5359_s16 + $0xc8] sm:$0xff] %v2812_v59 }
 0x296   : > { %v4027_v62 = vpop.eup %4026  ;;  %v2687_v39 = vmul.f32 %v2559_v48, %v5528_v58  ;;  %v5579_v50 = vmul.f32 0.5, %v1917_v51  ;;  %v1920_v34 = vadd.f32 %v3530_v35, %v5254_v7  ;;  %v1911_v2 = vpop.f32.mrb[39].mxu1 }
 0x297   : > { %v2817_v3 = vadd.f32 %v4250_v46, %v2689_v53  ;;  %v2560_v4 = vadd.f32 1.0, %v4027_v62  ;;  %v5584_v0 = vmul.f32 0.5, %v1909_v60  ;;  %v1912_v61 = vadd.f32 %v5254_v7, %v1911_v2 }
 0x298   : > { %v2815_v58 = vadd.f32 %v4251_v5, %v2687_v39  ;;  %v2690_v8 = vmul.f32 %v2562_v63, %v5538_v17  ;;  %4036 = vtanh.f32 %v5579_v50  ;;  %v5590_v11 = vmul.f32 0.5, %v1920_v34 }
 0x299   : > { %2945 = vst [vmem:[%s5359_s16 + $0xf0] sm:$0xff] %v2817_v3  ;;  %v2688_v13 = vmul.f32 %v2560_v4, %v5542_v40  ;;  %4038 = vtanh.f32 %v5584_v0  ;;  %v5595_v20 = vmul.f32 0.5, %v1912_v61  ;;  %v4258_v61 = vld [vmem:[%s4728_s6 + $0x130] sm:$0xff] }
 0x29a   : > { %v4029_v32 = vpop.eup %4028  ;;  %2943 = vst [vmem:[%s5359_s16 + $0xe0] sm:$0xff] %v2815_v58  ;;  %v2818_v18 = vadd.f32 %v4252_v26, %v2690_v8  ;;  %4040 = vtanh.f32 %v5590_v11 }
 0x29b   : > { %v4031_v17 = vpop.eup %4030  ;;  %v2816_v21 = vadd.f32 %v4253_v44, %v2688_v13  ;;  %v2565_v23 = vadd.f32 1.0, %v4029_v32  ;;  %4042 = vtanh.f32 %v5595_v20  ;;  %v3533_v9 = vpop.f32.mrb[40].mxu1  ;;  %v4259_v13 = vld [vmem:[%s4728_s6 + $0x120] sm:$0xff] }
 0x29c   : > { %v4033_v28 = vpop.eup %4032  ;;  %2946 = vst [vmem:[%s5359_s16 + $0xf8] sm:$0xff] %v2818_v18  ;;  %v2563_v40 = vadd.f32 1.0, %v4031_v17  ;;  %v1933_v55 = vadd.f32 %v3533_v9, %v5254_v7  ;;  %v1924_v6 = vpop.f32.mrb[41].mxu1  ;;  %v4260_v18 = vld [vmem:[%s4728_s6 + $0x138] sm:$0xff] }
 0x29d   : > { %v4035_v10 = vpop.eup %4034  ;;  %2944 = vst [vmem:[%s5359_s16 + $0xe8] sm:$0xff] %v2816_v21  ;;  %v2693_v45 = vmul.f32 %v2565_v23, %v5552_v12  ;;  %v2566_v22 = vadd.f32 1.0, %v4033_v28  ;;  %v1925_v33 = vadd.f32 %v5254_v7, %v1924_v6  ;;  %v3534_v29 = vpop.f32.mrb[42].mxu1 }
 0x29e   : > { %v2691_v36 = vmul.f32 %v2563_v40, %v5556_v14  ;;  %v2564_v52 = vadd.f32 1.0, %v4035_v10  ;;  %v5608_v38 = vmul.f32 0.5, %v1933_v55  ;;  %v1936_v56 = vadd.f32 %v3534_v29, %v5254_v7  ;;  %v1927_v1 = vpop.f32.mrb[43].mxu1  ;;  %v5663_v55 = vld [vmem:[%s6245_s4] ss:$0 sm:$0xff] }
 0x29f   : > { %v2821_v25 = vadd.f32 %v4254_v30, %v2693_v45  ;;  %v2694_v12 = vmul.f32 %v2566_v22, %v5562_v15  ;;  %v5613_v41 = vmul.f32 0.5, %v1925_v33  ;;  %v1928_v27 = vadd.f32 %v5254_v7, %v1927_v1 }
 0x2a0   : > { %v2819_v14 = vadd.f32 %v4255_v43, %v2691_v36  ;;  %v2692_v49 = vmul.f32 %v2564_v52, %v5566_v16  ;;  %4044 = vtanh.f32 %v5608_v38  ;;  %v5619_v31 = vmul.f32 0.5, %v1936_v56 }
 0x2a1   : > { %2949 = vst [vmem:[%s5359_s16 + $0x110] sm:$0xff] %v2821_v25  ;;  %v2822_v24 = vadd.f32 %v4256_v19, %v2694_v12  ;;  %4046 = vtanh.f32 %v5613_v41  ;;  %v5624_v15 = vmul.f32 0.5, %v1928_v27  ;;  %v4263_v12 = vld [vmem:[%s4728_s6 + $0x150] sm:$0xff] }
 0x2a2   : > { %v4037_v42 = vpop.eup %4036  ;;  %2947 = vst [vmem:[%s5359_s16 + $0x100] sm:$0xff] %v2819_v14  ;;  %v2820_v48 = vadd.f32 %v4257_v47, %v2692_v49  ;;  %4048 = vtanh.f32 %v5619_v31  ;;  %v4264_v49 = vld [vmem:[%s4728_s6 + $0x140] sm:$0xff] }
 0x2a3   : > { %v4039_v51 = vpop.eup %4038  ;;  %2950 = vst [vmem:[%s5359_s16 + $0x118] sm:$0xff] %v2822_v24  ;;  %v2569_v16 = vadd.f32 1.0, %v4037_v42  ;;  %4050 = vtanh.f32 %v5624_v15  ;;  %v3537_v37 = vpop.f32.mrb[44].mxu1  ;;  %v4265_v42 = vld [vmem:[%s4728_s6 + $0x158] sm:$0xff] }
 0x2a4   : > { %v4041_v57 = vpop.eup %4040  ;;  %2948 = vst [vmem:[%s5359_s16 + $0x108] sm:$0xff] %v2820_v48  ;;  %v2567_v54 = vadd.f32 1.0, %v4039_v51  ;;  %v1949_v59 = vadd.f32 %v3537_v37, %v5254_v7  ;;  %v1940_v53 = vpop.f32.mrb[45].mxu1  ;;  %v4266_v51 = vld [vmem:[%s4728_s6 + $0x148] sm:$0xff] }
 0x2a5   : > { %v4043_v60 = vpop.eup %4042  ;;  %v2697_v35 = vmul.f32 %v2569_v16, %v5579_v50  ;;  %v2570_v62 = vadd.f32 1.0, %v4041_v57  ;;  %v1941_v39 = vadd.f32 %v5254_v7, %v1940_v53  ;;  %v3538_v63 = vpop.f32.mrb[46].mxu1 }
 0x2a6   : > { %v2695_v34 = vmul.f32 %v2567_v54, %v5584_v0  ;;  %v2568_v2 = vadd.f32 1.0, %v4043_v60  ;;  %v5636_v46 = vmul.f32 0.5, %v1949_v59  ;;  %v1952_v3 = vadd.f32 %v3538_v63, %v5254_v7  ;;  %v1943_v4 = vpop.f32.mrb[47].mxu1 }
 0x2a7   : > { %v2825_v5 = vadd.f32 %v4258_v61, %v2697_v35  ;;  %v2698_v50 = vmul.f32 %v2570_v62, %v5590_v11  ;;  %v5641_v58 = vmul.f32 0.5, %v1941_v39  ;;  %v1944_v8 = vadd.f32 %v5254_v7, %v1943_v4  ;;  %v4261_v7 = vld [vmem:[%s4728_s6 + $0x128] sm:$0xff] }
 0x2a8   : > { %v2823_v0 = vadd.f32 %v4259_v13, %v2695_v34  ;;  %v2696_v32 = vmul.f32 %v2568_v2, %v5595_v20  ;;  %4052 = vtanh.f32 %v5636_v46  ;;  %v5647_v26 = vmul.f32 0.5, %v1952_v3 }
 0x2a9   : > { %2953 = vst [vmem:[%s5359_s16 + $0x130] sm:$0xff] %v2825_v5  ;;  %v2826_v17 = vadd.f32 %v4260_v18, %v2698_v50  ;;  %4054 = vtanh.f32 %v5641_v58  ;;  %v5652_v11 = vmul.f32 0.5, %v1944_v8  ;;  %v4267_v50 = vld [vmem:[%s4728_s6 + $0x170] sm:$0xff] }
 0x2aa   : > { %v4045_v44 = vpop.eup %4044  ;;  %2951 = vst [vmem:[%s5359_s16 + $0x120] sm:$0xff] %v2823_v0  ;;  %v2824_v21 = vadd.f32 %v4261_v7, %v2696_v32  ;;  %4056 = vtanh.f32 %v5647_v26  ;;  %v4268_v32 = vld [vmem:[%s4728_s6 + $0x160] sm:$0xff] }
 0x2ab   : > { %v4047_v23 = vpop.eup %4046  ;;  %2954 = vst [vmem:[%s5359_s16 + $0x138] sm:$0xff] %v2826_v17  ;;  %v2573_v20 = vadd.f32 1.0, %v4045_v44  ;;  %4058 = vtanh.f32 %v5652_v11  ;;  %v3541_v9 = vpop.f32.mrb[48].mxu1  ;;  %v4269_v44 = vld [vmem:[%s4728_s6 + $0x178] sm:$0xff] }
 0x2ac   : > { %v4049_v28 = vpop.eup %4048  ;;  %2952 = vst [vmem:[%s5359_s16 + $0x128] sm:$0xff] %v2824_v21  ;;  %v2571_v40 = vadd.f32 1.0, %v4047_v23  ;;  %v1965_v6 = vadd.f32 %v5663_v55, %v3541_v9  ;;  %v1956_v10 = vpop.f32.mrb[49].mxu1  ;;  %v4270_v23 = vld [vmem:[%s4728_s6 + $0x168] sm:$0xff] }
 0x2ad   : > { %v4051_v45 = vpop.eup %4050  ;;  %v2701_v22 = vmul.f32 %v2573_v20, %v5608_v38  ;;  %v2574_v33 = vadd.f32 1.0, %v4049_v28  ;;  %v1957_v29 = vadd.f32 %v5663_v55, %v1956_v10  ;;  %v3542_v36 = vpop.f32.mrb[50].mxu1 }
 0x2ae   : > { %v2699_v52 = vmul.f32 %v2571_v40, %v5613_v41  ;;  %v2572_v56 = vadd.f32 1.0, %v4051_v45  ;;  %v5669_v1 = vmul.f32 0.5, %v1965_v6  ;;  %v1968_v30 = vadd.f32 %v5663_v55, %v3542_v36  ;;  %v1959_v25 = vpop.f32.mrb[51].mxu1 }
 0x2af   : > { %v2829_v27 = vadd.f32 %v4263_v12, %v2701_v22  ;;  %v2702_v38 = vmul.f32 %v2574_v33, %v5619_v31  ;;  %v5674_v43 = vmul.f32 0.5, %v1957_v29  ;;  %v1960_v14 = vadd.f32 %v5663_v55, %v1959_v25 }
 0x2b0   : > { %v2827_v41 = vadd.f32 %v4264_v49, %v2699_v52  ;;  %v2700_v19 = vmul.f32 %v2572_v56, %v5624_v15  ;;  %4060 = vtanh.f32 %v5669_v1  ;;  %v5680_v24 = vmul.f32 0.5, %v1968_v30 }
 0x2b1   : > { %2957 = vst [vmem:[%s5359_s16 + $0x150] sm:$0xff] %v2829_v27  ;;  %v2830_v47 = vadd.f32 %v4265_v42, %v2702_v38  ;;  %4062 = vtanh.f32 %v5674_v43  ;;  %v5685_v31 = vmul.f32 0.5, %v1960_v14  ;;  %v4271_v38 = vld [vmem:[%s4728_s6 + $0x190] sm:$0xff] }
 0x2b2   : > { %v4053_v48 = vpop.eup %4052  ;;  %2955 = vst [vmem:[%s5359_s16 + $0x140] sm:$0xff] %v2827_v41  ;;  %v2828_v16 = vadd.f32 %v4266_v51, %v2700_v19  ;;  %4064 = vtanh.f32 %v5680_v24  ;;  %v4272_v19 = vld [vmem:[%s4728_s6 + $0x180] sm:$0xff] }
 0x2b3   : > { %v4055_v37 = vpop.eup %4054  ;;  %2958 = vst [vmem:[%s5359_s16 + $0x158] sm:$0xff] %v2830_v47  ;;  %v2577_v15 = vadd.f32 1.0, %v4053_v48  ;;  %4066 = vtanh.f32 %v5685_v31  ;;  %v3545_v57 = vpop.f32.mrb[52].mxu1  ;;  %v4273_v48 = vld [vmem:[%s4728_s6 + $0x198] sm:$0xff] }
 0x2b4   : > { %v4057_v54 = vpop.eup %4056  ;;  %2956 = vst [vmem:[%s5359_s16 + $0x148] sm:$0xff] %v2828_v16  ;;  %v2575_v59 = vadd.f32 1.0, %v4055_v37  ;;  %v1981_v53 = vadd.f32 %v5663_v55, %v3545_v57  ;;  %v1972_v60 = vpop.f32.mrb[53].mxu1  ;;  %v4274_v37 = vld [vmem:[%s4728_s6 + $0x188] sm:$0xff] }
 0x2b5   : > { %v4059_v35 = vpop.eup %4058  ;;  %v2705_v62 = vmul.f32 %v2577_v15, %v5636_v46  ;;  %v2578_v39 = vadd.f32 1.0, %v4057_v54  ;;  %v1973_v63 = vadd.f32 %v5663_v55, %v1972_v60  ;;  %v3546_v34 = vpop.f32.mrb[54].mxu1 }
 0x2b6   : > { %v2703_v2 = vmul.f32 %v2575_v59, %v5641_v58  ;;  %v2576_v3 = vadd.f32 1.0, %v4059_v35  ;;  %v5697_v4 = vmul.f32 0.5, %v1981_v53  ;;  %v1984_v61 = vadd.f32 %v5663_v55, %v3546_v34  ;;  %v1975_v5 = vpop.f32.mrb[55].mxu1 }
 0x2b7   : > { %v2833_v8 = vadd.f32 %v4267_v50, %v2705_v62  ;;  %v2706_v46 = vmul.f32 %v2578_v39, %v5647_v26  ;;  %v5702_v13 = vmul.f32 0.5, %v1973_v63  ;;  %v1976_v0 = vadd.f32 %v5663_v55, %v1975_v5 }
 0x2b8   : > { %v2831_v58 = vadd.f32 %v4268_v32, %v2703_v2  ;;  %v2704_v18 = vmul.f32 %v2576_v3, %v5652_v11  ;;  %4068 = vtanh.f32 %v5697_v4  ;;  %v5708_v17 = vmul.f32 0.5, %v1984_v61 }
 0x2b9   : > { %2961 = vst [vmem:[%s5359_s16 + $0x170] sm:$0xff] %v2833_v8  ;;  %v2834_v7 = vadd.f32 %v4269_v44, %v2706_v46  ;;  %4070 = vtanh.f32 %v5702_v13  ;;  %v5713_v26 = vmul.f32 0.5, %v1976_v0  ;;  %v4275_v46 = vld [vmem:[%s4728_s6 + $0x1b0] sm:$0xff] }
 0x2ba   : > { %v4061_v21 = vpop.eup %4060  ;;  %2959 = vst [vmem:[%s5359_s16 + $0x160] sm:$0xff] %v2831_v58  ;;  %v2832_v20 = vadd.f32 %v4270_v23, %v2704_v18  ;;  %4072 = vtanh.f32 %v5708_v17  ;;  %v4276_v18 = vld [vmem:[%s4728_s6 + $0x1a0] sm:$0xff] }
 0x2bb   : > { %v4063_v9 = vpop.eup %4062  ;;  %2962 = vst [vmem:[%s5359_s16 + $0x178] sm:$0xff] %v2834_v7  ;;  %v2581_v11 = vadd.f32 1.0, %v4061_v21  ;;  %4074 = vtanh.f32 %v5713_v26  ;;  %v3549_v28 = vpop.f32.mrb[56].mxu1  ;;  %v4277_v21 = vld [vmem:[%s4728_s6 + $0x1b8] sm:$0xff] }
 0x2bc   : > { %v4065_v40 = vpop.eup %4064  ;;  %2960 = vst [vmem:[%s5359_s16 + $0x168] sm:$0xff] %v2832_v20  ;;  %v2579_v6 = vadd.f32 1.0, %v4063_v9  ;;  %v1997_v10 = vadd.f32 %v5663_v55, %v3549_v28  ;;  %v1988_v45 = vpop.f32.mrb[57].mxu1  ;;  %v4278_v9 = vld [vmem:[%s4728_s6 + $0x1a8] sm:$0xff] }
 0x2bd   : > { %v4067_v22 = vpop.eup %4066  ;;  %v2709_v33 = vmul.f32 %v2581_v11, %v5669_v1  ;;  %v2582_v29 = vadd.f32 1.0, %v4065_v40  ;;  %v1989_v36 = vadd.f32 %v5663_v55, %v1988_v45  ;;  %v3550_v52 = vpop.f32.mrb[58].mxu1 }
 0x2be   : > { %v2707_v56 = vmul.f32 %v2579_v6, %v5674_v43  ;;  %v2580_v30 = vadd.f32 1.0, %v4067_v22  ;;  %v5725_v25 = vmul.f32 0.5, %v1997_v10  ;;  %v2000_v12 = vadd.f32 %v5663_v55, %v3550_v52  ;;  %v1991_v27 = vpop.f32.mrb[59].mxu1 }
 0x2bf   : > { %v2837_v14 = vadd.f32 %v4271_v38, %v2709_v33  ;;  %v2710_v1 = vmul.f32 %v2582_v29, %v5680_v24  ;;  %v5730_v49 = vmul.f32 0.5, %v1989_v36  ;;  %v1992_v41 = vadd.f32 %v5663_v55, %v1991_v27 }
 0x2c0   : > { %v2835_v43 = vadd.f32 %v4272_v19, %v2707_v56  ;;  %v2708_v42 = vmul.f32 %v2580_v30, %v5685_v31  ;;  %4076 = vtanh.f32 %v5725_v25  ;;  %v5736_v47 = vmul.f32 0.5, %v2000_v12 }
 0x2c1   : > { %2965 = vst [vmem:[%s5359_s16 + $0x190] sm:$0xff] %v2837_v14  ;;  %v2838_v51 = vadd.f32 %v4273_v48, %v2710_v1  ;;  %4078 = vtanh.f32 %v5730_v49  ;;  %v5741_v24 = vmul.f32 0.5, %v1992_v41  ;;  %v4279_v1 = vld [vmem:[%s4728_s6 + $0x1d0] sm:$0xff] }
 0x2c2   : > { %v4069_v16 = vpop.eup %4068  ;;  %2963 = vst [vmem:[%s5359_s16 + $0x180] sm:$0xff] %v2835_v43  ;;  %v2836_v15 = vadd.f32 %v4274_v37, %v2708_v42  ;;  %4080 = vtanh.f32 %v5736_v47  ;;  %v4280_v42 = vld [vmem:[%s4728_s6 + $0x1c0] sm:$0xff] }
 0x2c3   : > { %v4071_v57 = vpop.eup %4070  ;;  %2966 = vst [vmem:[%s5359_s16 + $0x198] sm:$0xff] %v2838_v51  ;;  %v2585_v31 = vadd.f32 1.0, %v4069_v16  ;;  %4082 = vtanh.f32 %v5741_v24  ;;  %v3553_v54 = vpop.f32.mrb[60].mxu1  ;;  %v4281_v16 = vld [vmem:[%s4728_s6 + $0x1d8] sm:$0xff] }
 0x2c4   : > { %v4073_v59 = vpop.eup %4072  ;;  %2964 = vst [vmem:[%s5359_s16 + $0x188] sm:$0xff] %v2836_v15  ;;  %v2583_v53 = vadd.f32 1.0, %v4071_v57  ;;  %v2013_v60 = vadd.f32 %v5663_v55, %v3553_v54  ;;  %v2004_v35 = vpop.f32.mrb[61].mxu1  ;;  %v4282_v57 = vld [vmem:[%s4728_s6 + $0x1c8] sm:$0xff] }
 0x2c5   : > { %v4075_v62 = vpop.eup %4074  ;;  %v2713_v39 = vmul.f32 %v2585_v31, %v5697_v4  ;;  %v2586_v63 = vadd.f32 1.0, %v4073_v59  ;;  %v2005_v34 = vadd.f32 %v5663_v55, %v2004_v35  ;;  %v3554_v2 = vpop.f32.mrb[62].mxu1 }
 0x2c6   : > { %v2711_v3 = vmul.f32 %v2583_v53, %v5702_v13  ;;  %v2584_v61 = vadd.f32 1.0, %v4075_v62  ;;  %v5753_v5 = vmul.f32 0.5, %v2013_v60  ;;  %v2016_v50 = vadd.f32 %v5663_v55, %v3554_v2  ;;  %v2007_v8 = vpop.f32.mrb[63].mxu1 }
 0x2c7   : > { %v2841_v0 = vadd.f32 %v4275_v46, %v2713_v39  ;;  %v2714_v4 = vmul.f32 %v2586_v63, %v5708_v17  ;;  %v5758_v32 = vmul.f32 0.5, %v2005_v34  ;;  %v2008_v58 = vadd.f32 %v5663_v55, %v2007_v8 }
 0x2c8   : > { %v2839_v13 = vadd.f32 %v4276_v18, %v2711_v3  ;;  %v2712_v44 = vmul.f32 %v2584_v61, %v5713_v26  ;;  %4084 = vtanh.f32 %v5753_v5  ;;  %v5764_v7 = vmul.f32 0.5, %v2016_v50 }
 0x2c9   : > { %2969 = vst [vmem:[%s5359_s16 + $0x1b0] sm:$0xff] %v2841_v0  ;;  %v2842_v23 = vadd.f32 %v4277_v21, %v2714_v4  ;;  %4086 = vtanh.f32 %v5758_v32  ;;  %v5769_v17 = vmul.f32 0.5, %v2008_v58  ;;  %v4283_v4 = vld [vmem:[%s4728_s6 + $0x1f0] sm:$0xff] }
 0x2ca   : > { %v4077_v20 = vpop.eup %4076  ;;  %2967 = vst [vmem:[%s5359_s16 + $0x1a0] sm:$0xff] %v2839_v13  ;;  %v2840_v11 = vadd.f32 %v4278_v9, %v2712_v44  ;;  %4088 = vtanh.f32 %v5764_v7  ;;  %v4284_v44 = vld [vmem:[%s4728_s6 + $0x1e0] sm:$0xff] }
 0x2cb   : > { %v4079_v28 = vpop.eup %4078  ;;  %2970 = vst [vmem:[%s5359_s16 + $0x1b8] sm:$0xff] %v2842_v23  ;;  %v2589_v26 = vadd.f32 1.0, %v4077_v20  ;;  %4090 = vtanh.f32 %v5769_v17  ;;  %v3557_v40 = vpop.f32.mrb[64].mxu1  ;;  %v4285_v20 = vld [vmem:[%s4728_s6 + $0x1f8] sm:$0xff] }
 0x2cc   : > { %v4081_v6 = vpop.eup %4080  ;;  %2968 = vst [vmem:[%s5359_s16 + $0x1a8] sm:$0xff] %v2840_v11  ;;  %v2587_v10 = vadd.f32 1.0, %v4079_v28  ;;  %v2029_v45 = vadd.f32 %v5663_v55, %v3557_v40  ;;  %v2020_v22 = vpop.f32.mrb[65].mxu1  ;;  %v4286_v28 = vld [vmem:[%s4728_s6 + $0x1e8] sm:$0xff] }
 0x2cd   : > { %v4083_v33 = vpop.eup %4082  ;;  %v2717_v29 = vmul.f32 %v2589_v26, %v5725_v25  ;;  %v2590_v36 = vadd.f32 1.0, %v4081_v6  ;;  %v2021_v52 = vadd.f32 %v5663_v55, %v2020_v22  ;;  %v3558_v56 = vpop.f32.mrb[66].mxu1 }
 0x2ce   : > { %v2715_v30 = vmul.f32 %v2587_v10, %v5730_v49  ;;  %v2588_v12 = vadd.f32 1.0, %v4083_v33  ;;  %v5781_v27 = vmul.f32 0.5, %v2029_v45  ;;  %v2032_v38 = vadd.f32 %v5663_v55, %v3558_v56  ;;  %v2023_v14 = vpop.f32.mrb[67].mxu1 }
 0x2cf   : > { %v2845_v41 = vadd.f32 %v4279_v1, %v2717_v29  ;;  %v2718_v25 = vmul.f32 %v2590_v36, %v5736_v47  ;;  %v5786_v19 = vmul.f32 0.5, %v2021_v52  ;;  %v2024_v43 = vadd.f32 %v5663_v55, %v2023_v14 }
 0x2d0   : > { %v2843_v49 = vadd.f32 %v4280_v42, %v2715_v30  ;;  %v2716_v48 = vmul.f32 %v2588_v12, %v5741_v24  ;;  %4092 = vtanh.f32 %v5781_v27  ;;  %v5792_v51 = vmul.f32 0.5, %v2032_v38 }
 0x2d1   : > { %2973 = vst [vmem:[%s5359_s16 + $0x1d0] sm:$0xff] %v2845_v41  ;;  %v2846_v37 = vadd.f32 %v4281_v16, %v2718_v25  ;;  %4094 = vtanh.f32 %v5786_v19  ;;  %v5797_v47 = vmul.f32 0.5, %v2024_v43  ;;  %v4287_v25 = vld [vmem:[%s4728_s6 + $0x210] sm:$0xff] }
 0x2d2   : > { %v4085_v15 = vpop.eup %4084  ;;  %2971 = vst [vmem:[%s5359_s16 + $0x1c0] sm:$0xff] %v2843_v49  ;;  %v2844_v31 = vadd.f32 %v4282_v57, %v2716_v48  ;;  %4096 = vtanh.f32 %v5792_v51  ;;  %v4288_v48 = vld [vmem:[%s4728_s6 + $0x200] sm:$0xff] }
 0x2d3   : > { %v4087_v54 = vpop.eup %4086  ;;  %2974 = vst [vmem:[%s5359_s16 + $0x1d8] sm:$0xff] %v2846_v37  ;;  %v2593_v24 = vadd.f32 1.0, %v4085_v15  ;;  %4098 = vtanh.f32 %v5797_v47  ;;  %v3561_v59 = vpop.f32.mrb[68].mxu1  ;;  %v4289_v15 = vld [vmem:[%s4728_s6 + $0x218] sm:$0xff] }
 0x2d4   : > { %v4089_v53 = vpop.eup %4088  ;;  %2972 = vst [vmem:[%s5359_s16 + $0x1c8] sm:$0xff] %v2844_v31  ;;  %v2591_v60 = vadd.f32 1.0, %v4087_v54  ;;  %v2045_v35 = vadd.f32 %v5663_v55, %v3561_v59  ;;  %v2036_v62 = vpop.f32.mrb[69].mxu1  ;;  %v4290_v54 = vld [vmem:[%s4728_s6 + $0x208] sm:$0xff] }
 0x2d5   : > { %v4091_v39 = vpop.eup %4090  ;;  %v2721_v63 = vmul.f32 %v2593_v24, %v5753_v5  ;;  %v2594_v34 = vadd.f32 1.0, %v4089_v53  ;;  %v2037_v2 = vadd.f32 %v5663_v55, %v2036_v62  ;;  %v3562_v3 = vpop.f32.mrb[70].mxu1 }
 0x2d6   : > { %v2719_v61 = vmul.f32 %v2591_v60, %v5758_v32  ;;  %v2592_v50 = vadd.f32 1.0, %v4091_v39  ;;  %v5809_v8 = vmul.f32 0.5, %v2045_v35  ;;  %v2048_v46 = vadd.f32 %v5663_v55, %v3562_v3  ;;  %v2039_v0 = vpop.f32.mrb[71].mxu1 }
 0x2d7   : > { %v2849_v58 = vadd.f32 %v4283_v4, %v2721_v63  ;;  %v2722_v5 = vmul.f32 %v2594_v34, %v5764_v7  ;;  %v5814_v18 = vmul.f32 0.5, %v2037_v2  ;;  %v2040_v13 = vadd.f32 %v5663_v55, %v2039_v0 }
 0x2d8   : > { %v2847_v32 = vadd.f32 %v4284_v44, %v2719_v61  ;;  %v2720_v21 = vmul.f32 %v2592_v50, %v5769_v17  ;;  %4100 = vtanh.f32 %v5809_v8  ;;  %v5820_v23 = vmul.f32 0.5, %v2048_v46 }
 0x2d9   : > { %2977 = vst [vmem:[%s5359_s16 + $0x1f0] sm:$0xff] %v2849_v58  ;;  %v2850_v9 = vadd.f32 %v4285_v20, %v2722_v5  ;;  %4102 = vtanh.f32 %v5814_v18  ;;  %v5825_v7 = vmul.f32 0.5, %v2040_v13  ;;  %v4291_v5 = vld [vmem:[%s4728_s6 + $0x230] sm:$0xff] }
 0x2da   : > { %v4093_v11 = vpop.eup %4092  ;;  %2975 = vst [vmem:[%s5359_s16 + $0x1e0] sm:$0xff] %v2847_v32  ;;  %v2848_v26 = vadd.f32 %v4286_v28, %v2720_v21  ;;  %4104 = vtanh.f32 %v5820_v23  ;;  %v4292_v21 = vld [vmem:[%s4728_s6 + $0x220] sm:$0xff] }
 0x2db   : > { %v4095_v40 = vpop.eup %4094  ;;  %2978 = vst [vmem:[%s5359_s16 + $0x1f8] sm:$0xff] %v2850_v9  ;;  %v2597_v17 = vadd.f32 1.0, %v4093_v11  ;;  %4106 = vtanh.f32 %v5825_v7  ;;  %v3565_v6 = vpop.f32.mrb[72].mxu1  ;;  %v4293_v11 = vld [vmem:[%s4728_s6 + $0x238] sm:$0xff] }
 0x2dc   : > { %v4097_v10 = vpop.eup %4096  ;;  %2976 = vst [vmem:[%s5359_s16 + $0x1e8] sm:$0xff] %v2848_v26  ;;  %v2595_v45 = vadd.f32 1.0, %v4095_v40  ;;  %v2061_v22 = vadd.f32 %v5663_v55, %v3565_v6  ;;  %v2052_v33 = vpop.f32.mrb[73].mxu1  ;;  %v4294_v40 = vld [vmem:[%s4728_s6 + $0x228] sm:$0xff] }
 0x2dd   : > { %v4099_v29 = vpop.eup %4098  ;;  %v2725_v36 = vmul.f32 %v2597_v17, %v5781_v27  ;;  %v2598_v52 = vadd.f32 1.0, %v4097_v10  ;;  %v2053_v56 = vadd.f32 %v5663_v55, %v2052_v33  ;;  %v3566_v30 = vpop.f32.mrb[74].mxu1 }
 0x2de   : > { %v2723_v12 = vmul.f32 %v2595_v45, %v5786_v19  ;;  %v2596_v38 = vadd.f32 1.0, %v4099_v29  ;;  %v5837_v14 = vmul.f32 0.5, %v2061_v22  ;;  %v2064_v1 = vadd.f32 %v5663_v55, %v3566_v30  ;;  %v2055_v41 = vpop.f32.mrb[75].mxu1 }
 0x2df   : > { %v2853_v43 = vadd.f32 %v4287_v25, %v2725_v36  ;;  %v2726_v27 = vmul.f32 %v2598_v52, %v5792_v51  ;;  %v5842_v42 = vmul.f32 0.5, %v2053_v56  ;;  %v2056_v49 = vadd.f32 %v5663_v55, %v2055_v41 }
 0x2e0   : > { %v2851_v19 = vadd.f32 %v4288_v48, %v2723_v12  ;;  %v2724_v16 = vmul.f32 %v2596_v38, %v5797_v47  ;;  %4108 = vtanh.f32 %v5837_v14  ;;  %v5848_v37 = vmul.f32 0.5, %v2064_v1 }
 0x2e1   : > { %2981 = vst [vmem:[%s5359_s16 + $0x210] sm:$0xff] %v2853_v43  ;;  %v2854_v57 = vadd.f32 %v4289_v15, %v2726_v27  ;;  %4110 = vtanh.f32 %v5842_v42  ;;  %v5853_v51 = vmul.f32 0.5, %v2056_v49  ;;  %v4295_v27 = vld [vmem:[%s4728_s6 + $0x250] sm:$0xff] }
 0x2e2   : > { %v4101_v31 = vpop.eup %4100  ;;  %2979 = vst [vmem:[%s5359_s16 + $0x200] sm:$0xff] %v2851_v19  ;;  %v2852_v24 = vadd.f32 %v4290_v54, %v2724_v16  ;;  %4112 = vtanh.f32 %v5848_v37  ;;  %v4296_v16 = vld [vmem:[%s4728_s6 + $0x240] sm:$0xff] }
 0x2e3   : > { %v4103_v59 = vpop.eup %4102  ;;  %2982 = vst [vmem:[%s5359_s16 + $0x218] sm:$0xff] %v2854_v57  ;;  %v2601_v47 = vadd.f32 1.0, %v4101_v31  ;;  %4114 = vtanh.f32 %v5853_v51  ;;  %v3569_v53 = vpop.f32.mrb[76].mxu1  ;;  %v4297_v31 = vld [vmem:[%s4728_s6 + $0x258] sm:$0xff] }
 0x2e4   : > { %v4105_v60 = vpop.eup %4104  ;;  %2980 = vst [vmem:[%s5359_s16 + $0x208] sm:$0xff] %v2852_v24  ;;  %v2599_v35 = vadd.f32 1.0, %v4103_v59  ;;  %v2077_v62 = vadd.f32 %v5663_v55, %v3569_v53  ;;  %v2068_v39 = vpop.f32.mrb[77].mxu1  ;;  %v4298_v59 = vld [vmem:[%s4728_s6 + $0x248] sm:$0xff] }
 0x2e5   : > { %v4107_v63 = vpop.eup %4106  ;;  %v2729_v34 = vmul.f32 %v2601_v47, %v5809_v8  ;;  %v2602_v2 = vadd.f32 1.0, %v4105_v60  ;;  %v2069_v3 = vadd.f32 %v5663_v55, %v2068_v39  ;;  %v3570_v61 = vpop.f32.mrb[78].mxu1 }
 0x2e6   : > { %v2727_v50 = vmul.f32 %v2599_v35, %v5814_v18  ;;  %v2600_v46 = vadd.f32 1.0, %v4107_v63  ;;  %v5865_v0 = vmul.f32 0.5, %v2077_v62  ;;  %v2080_v4 = vadd.f32 %v5663_v55, %v3570_v61  ;;  %v2071_v58 = vpop.f32.mrb[79].mxu1 }
 0x2e7   : > { %v2857_v13 = vadd.f32 %v4291_v5, %v2729_v34  ;;  %v2730_v8 = vmul.f32 %v2602_v2, %v5820_v23  ;;  %v5870_v44 = vmul.f32 0.5, %v2069_v3  ;;  %v2072_v32 = vadd.f32 %v5663_v55, %v2071_v58 }
 0x2e8   : > { %v2855_v18 = vadd.f32 %v4292_v21, %v2727_v50  ;;  %v2728_v20 = vmul.f32 %v2600_v46, %v5825_v7  ;;  %4116 = vtanh.f32 %v5865_v0  ;;  %v5876_v9 = vmul.f32 0.5, %v2080_v4 }
 0x2e9   : > { %2985 = vst [vmem:[%s5359_s16 + $0x230] sm:$0xff] %v2857_v13  ;;  %v2858_v28 = vadd.f32 %v4293_v11, %v2730_v8  ;;  %4118 = vtanh.f32 %v5870_v44  ;;  %v5881_v23 = vmul.f32 0.5, %v2072_v32  ;;  %v4299_v8 = vld [vmem:[%s4728_s6 + $0x270] sm:$0xff] }
 0x2ea   : > { %v4109_v26 = vpop.eup %4108  ;;  %2983 = vst [vmem:[%s5359_s16 + $0x220] sm:$0xff] %v2855_v18  ;;  %v2856_v17 = vadd.f32 %v4294_v40, %v2728_v20  ;;  %4120 = vtanh.f32 %v5876_v9  ;;  %v4300_v20 = vld [vmem:[%s4728_s6 + $0x260] sm:$0xff] }
 0x2eb   : > { %v4111_v6 = vpop.eup %4110  ;;  %2986 = vst [vmem:[%s5359_s16 + $0x238] sm:$0xff] %v2858_v28  ;;  %v2605_v7 = vadd.f32 1.0, %v4109_v26  ;;  %4122 = vtanh.f32 %v5881_v23  ;;  %v3573_v10 = vpop.f32.mrb[80].mxu1  ;;  %v4301_v26 = vld [vmem:[%s4728_s6 + $0x278] sm:$0xff] }
 0x2ec   : > { %v4113_v45 = vpop.eup %4112  ;;  %2984 = vst [vmem:[%s5359_s16 + $0x228] sm:$0xff] %v2856_v17  ;;  %v2603_v22 = vadd.f32 1.0, %v4111_v6  ;;  %v2093_v33 = vadd.f32 %v5663_v55, %v3573_v10  ;;  %v2084_v29 = vpop.f32.mrb[81].mxu1  ;;  %v4302_v6 = vld [vmem:[%s4728_s6 + $0x268] sm:$0xff] }
 0x2ed   : > { %v4115_v36 = vpop.eup %4114  ;;  %v2733_v52 = vmul.f32 %v2605_v7, %v5837_v14  ;;  %v2606_v56 = vadd.f32 1.0, %v4113_v45  ;;  %v2085_v30 = vadd.f32 %v5663_v55, %v2084_v29  ;;  %v3574_v12 = vpop.f32.mrb[82].mxu1 }
 0x2ee   : > { %v2731_v38 = vmul.f32 %v2603_v22, %v5842_v42  ;;  %v2604_v1 = vadd.f32 1.0, %v4115_v36  ;;  %v5893_v41 = vmul.f32 0.5, %v2093_v33  ;;  %v2096_v25 = vadd.f32 %v5663_v55, %v3574_v12  ;;  %v2087_v43 = vpop.f32.mrb[83].mxu1 }
 0x2ef   : > { %v2861_v49 = vadd.f32 %v4295_v27, %v2733_v52  ;;  %v2734_v14 = vmul.f32 %v2606_v56, %v5848_v37  ;;  %v5898_v48 = vmul.f32 0.5, %v2085_v30  ;;  %v2088_v19 = vadd.f32 %v5663_v55, %v2087_v43 }
 0x2f0   : > { %v2859_v42 = vadd.f32 %v4296_v16, %v2731_v38  ;;  %v2732_v15 = vmul.f32 %v2604_v1, %v5853_v51  ;;  %4124 = vtanh.f32 %v5893_v41  ;;  %v5904_v57 = vmul.f32 0.5, %v2096_v25 }
 0x2f1   : > { %2989 = vst [vmem:[%s5359_s16 + $0x250] sm:$0xff] %v2861_v49  ;;  %v2862_v54 = vadd.f32 %v4297_v31, %v2734_v14  ;;  %4126 = vtanh.f32 %v5898_v48  ;;  %v5909_v37 = vmul.f32 0.5, %v2088_v19  ;;  %v4303_v14 = vld [vmem:[%s4728_s6 + $0x290] sm:$0xff] }
 0x2f2   : > { %v4117_v24 = vpop.eup %4116  ;;  %2987 = vst [vmem:[%s5359_s16 + $0x240] sm:$0xff] %v2859_v42  ;;  %v2860_v47 = vadd.f32 %v4298_v59, %v2732_v15  ;;  %4128 = vtanh.f32 %v5904_v57  ;;  %v4304_v15 = vld [vmem:[%s4728_s6 + $0x280] sm:$0xff] }
 0x2f3   : > { %v4119_v53 = vpop.eup %4118  ;;  %2990 = vst [vmem:[%s5359_s16 + $0x258] sm:$0xff] %v2862_v54  ;;  %v2609_v51 = vadd.f32 1.0, %v4117_v24  ;;  %4130 = vtanh.f32 %v5909_v37  ;;  %v3577_v60 = vpop.f32.mrb[84].mxu1  ;;  %v4305_v24 = vld [vmem:[%s4728_s6 + $0x298] sm:$0xff] }
 0x2f4   : > { %v4121_v35 = vpop.eup %4120  ;;  %2988 = vst [vmem:[%s5359_s16 + $0x248] sm:$0xff] %v2860_v47  ;;  %v2607_v62 = vadd.f32 1.0, %v4119_v53  ;;  %v2109_v39 = vadd.f32 %v5663_v55, %v3577_v60  ;;  %v2100_v63 = vpop.f32.mrb[85].mxu1  ;;  %v4306_v53 = vld [vmem:[%s4728_s6 + $0x288] sm:$0xff] }
 0x2f5   : > { %v4123_v34 = vpop.eup %4122  ;;  %v2737_v2 = vmul.f32 %v2609_v51, %v5865_v0  ;;  %v2610_v3 = vadd.f32 1.0, %v4121_v35  ;;  %v2101_v61 = vadd.f32 %v5663_v55, %v2100_v63  ;;  %v3578_v50 = vpop.f32.mrb[86].mxu1 }
 0x2f6   : > { %v2735_v46 = vmul.f32 %v2607_v62, %v5870_v44  ;;  %v2608_v4 = vadd.f32 1.0, %v4123_v34  ;;  %v5921_v58 = vmul.f32 0.5, %v2109_v39  ;;  %v2112_v5 = vadd.f32 %v5663_v55, %v3578_v50  ;;  %v2103_v13 = vpop.f32.mrb[87].mxu1 }
 0x2f7   : > { %v2865_v32 = vadd.f32 %v4299_v8, %v2737_v2  ;;  %v2738_v0 = vmul.f32 %v2610_v3, %v5876_v9  ;;  %v5926_v21 = vmul.f32 0.5, %v2101_v61  ;;  %v2104_v18 = vadd.f32 %v5663_v55, %v2103_v13 }
 0x2f8   : > { %v2863_v44 = vadd.f32 %v4300_v20, %v2735_v46  ;;  %v2736_v11 = vmul.f32 %v2608_v4, %v5881_v23  ;;  %4132 = vtanh.f32 %v5921_v58  ;;  %v5932_v28 = vmul.f32 0.5, %v2112_v5 }
 0x2f9   : > { %2993 = vst [vmem:[%s5359_s16 + $0x270] sm:$0xff] %v2865_v32  ;;  %v2866_v40 = vadd.f32 %v4301_v26, %v2738_v0  ;;  %4134 = vtanh.f32 %v5926_v21  ;;  %v5937_v9 = vmul.f32 0.5, %v2104_v18  ;;  %v4307_v0 = vld [vmem:[%s4728_s6 + $0x2b0] sm:$0xff] }
 0x2fa   : > { %v4125_v17 = vpop.eup %4124  ;;  %2991 = vst [vmem:[%s5359_s16 + $0x260] sm:$0xff] %v2863_v44  ;;  %v2864_v7 = vadd.f32 %v4302_v6, %v2736_v11  ;;  %4136 = vtanh.f32 %v5932_v28  ;;  %v4308_v11 = vld [vmem:[%s4728_s6 + $0x2a0] sm:$0xff] }
 0x2fb   : > { %v4127_v10 = vpop.eup %4126  ;;  %2994 = vst [vmem:[%s5359_s16 + $0x278] sm:$0xff] %v2866_v40  ;;  %v2613_v23 = vadd.f32 1.0, %v4125_v17  ;;  %4138 = vtanh.f32 %v5937_v9  ;;  %v3581_v45 = vpop.f32.mrb[88].mxu1  ;;  %v4309_v17 = vld [vmem:[%s4728_s6 + $0x2b8] sm:$0xff] }
 0x2fc   : > { %v4129_v22 = vpop.eup %4128  ;;  %2992 = vst [vmem:[%s5359_s16 + $0x268] sm:$0xff] %v2864_v7  ;;  %v2611_v33 = vadd.f32 1.0, %v4127_v10  ;;  %v2125_v29 = vadd.f32 %v5663_v55, %v3581_v45  ;;  %v2116_v36 = vpop.f32.mrb[89].mxu1  ;;  %v4310_v10 = vld [vmem:[%s4728_s6 + $0x2a8] sm:$0xff] }
 0x2fd   : > { %v4131_v52 = vpop.eup %4130  ;;  %v2741_v56 = vmul.f32 %v2613_v23, %v5893_v41  ;;  %v2614_v30 = vadd.f32 1.0, %v4129_v22  ;;  %v2117_v12 = vadd.f32 %v5663_v55, %v2116_v36  ;;  %v3582_v38 = vpop.f32.mrb[90].mxu1 }
 0x2fe   : > { %v2739_v1 = vmul.f32 %v2611_v33, %v5898_v48  ;;  %v2612_v25 = vadd.f32 1.0, %v4131_v52  ;;  %v5949_v43 = vmul.f32 0.5, %v2125_v29  ;;  %v2128_v27 = vadd.f32 %v5663_v55, %v3582_v38  ;;  %v2119_v49 = vpop.f32.mrb[91].mxu1 }
 0x2ff   : > { %v2869_v19 = vadd.f32 %v4303_v14, %v2741_v56  ;;  %v2742_v41 = vmul.f32 %v2614_v30, %v5904_v57  ;;  %v5954_v16 = vmul.f32 0.5, %v2117_v12  ;;  %v2120_v42 = vadd.f32 %v5663_v55, %v2119_v49 }
 0x300   : > { %v2867_v48 = vadd.f32 %v4304_v15, %v2739_v1  ;;  %v2740_v31 = vmul.f32 %v2612_v25, %v5909_v37  ;;  %4140 = vtanh.f32 %v5949_v43  ;;  %v5960_v54 = vmul.f32 0.5, %v2128_v27 }
 0x301   : > { %2997 = vst [vmem:[%s5359_s16 + $0x290] sm:$0xff] %v2869_v19  ;;  %v2870_v59 = vadd.f32 %v4305_v24, %v2742_v41  ;;  %4142 = vtanh.f32 %v5954_v16  ;;  %v5965_v57 = vmul.f32 0.5, %v2120_v42  ;;  %v4311_v41 = vld [vmem:[%s4728_s6 + $0x2d0] sm:$0xff] }
 0x302   : > { %v4133_v47 = vpop.eup %4132  ;;  %2995 = vst [vmem:[%s5359_s16 + $0x280] sm:$0xff] %v2867_v48  ;;  %v2868_v51 = vadd.f32 %v4306_v53, %v2740_v31  ;;  %4144 = vtanh.f32 %v5960_v54  ;;  %v4312_v31 = vld [vmem:[%s4728_s6 + $0x2c0] sm:$0xff] }
 0x303   : > { %v4135_v60 = vpop.eup %4134  ;;  %2998 = vst [vmem:[%s5359_s16 + $0x298] sm:$0xff] %v2870_v59  ;;  %v2617_v37 = vadd.f32 1.0, %v4133_v47  ;;  %4146 = vtanh.f32 %v5965_v57  ;;  %v3585_v35 = vpop.f32.mrb[92].mxu1  ;;  %v4313_v47 = vld [vmem:[%s4728_s6 + $0x2d8] sm:$0xff] }
 0x304   : > { %v4137_v62 = vpop.eup %4136  ;;  %2996 = vst [vmem:[%s5359_s16 + $0x288] sm:$0xff] %v2868_v51  ;;  %v2615_v39 = vadd.f32 1.0, %v4135_v60  ;;  %v2141_v63 = vadd.f32 %v5663_v55, %v3585_v35  ;;  %v2132_v34 = vpop.f32.mrb[93].mxu1  ;;  %v4314_v60 = vld [vmem:[%s4728_s6 + $0x2c8] sm:$0xff] }
 0x305   : > { %v4139_v2 = vpop.eup %4138  ;;  %v2745_v3 = vmul.f32 %v2617_v37, %v5921_v58  ;;  %v2618_v61 = vadd.f32 1.0, %v4137_v62  ;;  %v2133_v50 = vadd.f32 %v5663_v55, %v2132_v34  ;;  %v3586_v46 = vpop.f32.mrb[94].mxu1 }
 0x306   : > { %v2743_v4 = vmul.f32 %v2615_v39, %v5926_v21  ;;  %v2616_v5 = vadd.f32 1.0, %v4139_v2  ;;  %v5977_v13 = vmul.f32 0.5, %v2141_v63  ;;  %v2144_v8 = vadd.f32 %v5663_v55, %v3586_v46  ;;  %v2135_v32 = vpop.f32.mrb[95].mxu1 }
 0x307   : > { %v2873_v18 = vadd.f32 %v4307_v0, %v2745_v3  ;;  %v2746_v58 = vmul.f32 %v2618_v61, %v5932_v28  ;;  %v5982_v20 = vmul.f32 0.5, %v2133_v50  ;;  %v2136_v44 = vadd.f32 %v5663_v55, %v2135_v32 }
 0x308   : > { %v2871_v21 = vadd.f32 %v4308_v11, %v2743_v4  ;;  %v2744_v26 = vmul.f32 %v2616_v5, %v5937_v9  ;;  %4148 = vtanh.f32 %v5977_v13  ;;  %v5988_v40 = vmul.f32 0.5, %v2144_v8 }
 0x309   : > { %3001 = vst [vmem:[%s5359_s16 + $0x2b0] sm:$0xff] %v2873_v18  ;;  %v2874_v6 = vadd.f32 %v4309_v17, %v2746_v58  ;;  %4150 = vtanh.f32 %v5982_v20  ;;  %v5993_v28 = vmul.f32 0.5, %v2136_v44  ;;  %v4315_v58 = vld [vmem:[%s4728_s6 + $0x2f0] sm:$0xff] }
 0x30a   : > { %v4141_v7 = vpop.eup %4140  ;;  %2999 = vst [vmem:[%s5359_s16 + $0x2a0] sm:$0xff] %v2871_v21  ;;  %v2872_v23 = vadd.f32 %v4310_v10, %v2744_v26  ;;  %4152 = vtanh.f32 %v5988_v40  ;;  %v4316_v26 = vld [vmem:[%s4728_s6 + $0x2e0] sm:$0xff] }
 0x30b   : > { %v4143_v45 = vpop.eup %4142  ;;  %3002 = vst [vmem:[%s5359_s16 + $0x2b8] sm:$0xff] %v2874_v6  ;;  %v2621_v9 = vadd.f32 1.0, %v4141_v7  ;;  %4154 = vtanh.f32 %v5993_v28  ;;  %v3589_v22 = vpop.f32.mrb[96].mxu1  ;;  %v4317_v7 = vld [vmem:[%s4728_s6 + $0x2f8] sm:$0xff] }
 0x30c   : > { %v4145_v33 = vpop.eup %4144  ;;  %3000 = vst [vmem:[%s5359_s16 + $0x2a8] sm:$0xff] %v2872_v23  ;;  %v2619_v29 = vadd.f32 1.0, %v4143_v45  ;;  %v2157_v36 = vadd.f32 %v5663_v55, %v3589_v22  ;;  %v2148_v52 = vpop.f32.mrb[97].mxu1  ;;  %v4318_v45 = vld [vmem:[%s4728_s6 + $0x2e8] sm:$0xff] }
 0x30d   : > { %v4147_v56 = vpop.eup %4146  ;;  %v2749_v30 = vmul.f32 %v2621_v9, %v5949_v43  ;;  %v2622_v12 = vadd.f32 1.0, %v4145_v33  ;;  %v2149_v38 = vadd.f32 %v5663_v55, %v2148_v52  ;;  %v3590_v1 = vpop.f32.mrb[98].mxu1 }
 0x30e   : > { %v2747_v25 = vmul.f32 %v2619_v29, %v5954_v16  ;;  %v2620_v27 = vadd.f32 1.0, %v4147_v56  ;;  %v6005_v49 = vmul.f32 0.5, %v2157_v36  ;;  %v2160_v14 = vadd.f32 %v5663_v55, %v3590_v1  ;;  %v2151_v19 = vpop.f32.mrb[99].mxu1 }
 0x30f   : > { %v2877_v42 = vadd.f32 %v4311_v41, %v2749_v30  ;;  %v2750_v43 = vmul.f32 %v2622_v12, %v5960_v54  ;;  %v6010_v15 = vmul.f32 0.5, %v2149_v38  ;;  %v2152_v48 = vadd.f32 %v5663_v55, %v2151_v19  ;;  %v6066_v41 = vld [vmem:[%s6245_s4] ss:$0 sm:$0xff] }
 0x310   : > { %v2875_v16 = vadd.f32 %v4312_v31, %v2747_v25  ;;  %v2748_v24 = vmul.f32 %v2620_v27, %v5965_v57  ;;  %4156 = vtanh.f32 %v6005_v49  ;;  %v6016_v59 = vmul.f32 0.5, %v2160_v14 }
 0x311   : > { %3005 = vst [vmem:[%s5359_s16 + $0x2d0] sm:$0xff] %v2877_v42  ;;  %v2878_v53 = vadd.f32 %v4313_v47, %v2750_v43  ;;  %4158 = vtanh.f32 %v6010_v15  ;;  %v6021_v54 = vmul.f32 0.5, %v2152_v48 }
 0x312   : > { %v4149_v51 = vpop.eup %4148  ;;  %3003 = vst [vmem:[%s5359_s16 + $0x2c0] sm:$0xff] %v2875_v16  ;;  %v2876_v37 = vadd.f32 %v4314_v60, %v2748_v24  ;;  %4160 = vtanh.f32 %v6016_v59  ;;  %v4321_v16 = vld [vmem:[%s4728_s6 + $0x300] sm:$0xff] }
 0x313   : > { %v4151_v35 = vpop.eup %4150  ;;  %3006 = vst [vmem:[%s5359_s16 + $0x2d8] sm:$0xff] %v2878_v53  ;;  %v2625_v57 = vadd.f32 1.0, %v4149_v51  ;;  %4162 = vtanh.f32 %v6021_v54  ;;  %v3593_v62 = vpop.f32.mrb[100].mxu1  ;;  %v4322_v51 = vld [vmem:[%s4728_s6 + $0x318] sm:$0xff] }
 0x314   : > { %v4153_v39 = vpop.eup %4152  ;;  %3004 = vst [vmem:[%s5359_s16 + $0x2c8] sm:$0xff] %v2876_v37  ;;  %v2623_v63 = vadd.f32 1.0, %v4151_v35  ;;  %v2173_v34 = vadd.f32 %v5663_v55, %v3593_v62  ;;  %v2164_v2 = vpop.f32.mrb[101].mxu1  ;;  %v4323_v35 = vld [vmem:[%s4728_s6 + $0x308] sm:$0xff] }
 0x315   : > { %v4155_v3 = vpop.eup %4154  ;;  %v2753_v61 = vmul.f32 %v2625_v57, %v5977_v13  ;;  %v2626_v50 = vadd.f32 1.0, %v4153_v39  ;;  %v2165_v46 = vadd.f32 %v5663_v55, %v2164_v2  ;;  %v3594_v4 = vpop.f32.mrb[102].mxu1 }
 0x316   : > { %v2751_v5 = vmul.f32 %v2623_v63, %v5982_v20  ;;  %v2624_v8 = vadd.f32 1.0, %v4155_v3  ;;  %v6033_v32 = vmul.f32 0.5, %v2173_v34  ;;  %v2176_v0 = vadd.f32 %v5663_v55, %v3594_v4  ;;  %v2167_v18 = vpop.f32.mrb[103].mxu1 }
 0x317   : > { %v2881_v44 = vadd.f32 %v4315_v58, %v2753_v61  ;;  %v2754_v13 = vmul.f32 %v2626_v50, %v5988_v40  ;;  %v6038_v11 = vmul.f32 0.5, %v2165_v46  ;;  %v2168_v21 = vadd.f32 %v5663_v55, %v2167_v18 }
 0x318   : > { %v2879_v20 = vadd.f32 %v4316_v26, %v2751_v5  ;;  %v2752_v17 = vmul.f32 %v2624_v8, %v5993_v28  ;;  %4164 = vtanh.f32 %v6033_v32  ;;  %v6044_v6 = vmul.f32 0.5, %v2176_v0 }
 0x319   : > { %3009 = vst [vmem:[%s5359_s16 + $0x2f0] sm:$0xff] %v2881_v44  ;;  %v2882_v10 = vadd.f32 %v4317_v7, %v2754_v13  ;;  %4166 = vtanh.f32 %v6038_v11  ;;  %v6049_v40 = vmul.f32 0.5, %v2168_v21  ;;  %v4324_v13 = vld [vmem:[%s4728_s6 + $0x330] sm:$0xff] }
 0x31a   : > { %v4157_v23 = vpop.eup %4156  ;;  %3007 = vst [vmem:[%s5359_s16 + $0x2e0] sm:$0xff] %v2879_v20  ;;  %v2880_v9 = vadd.f32 %v4318_v45, %v2752_v17  ;;  %4168 = vtanh.f32 %v6044_v6  ;;  %v4325_v17 = vld [vmem:[%s4728_s6 + $0x320] sm:$0xff] }
 0x31b   : > { %v4159_v22 = vpop.eup %4158  ;;  %3010 = vst [vmem:[%s5359_s16 + $0x2f8] sm:$0xff] %v2882_v10  ;;  %v2629_v28 = vadd.f32 1.0, %v4157_v23  ;;  %4170 = vtanh.f32 %v6049_v40  ;;  %v3597_v33 = vpop.f32.mrb[104].mxu1  ;;  %v4326_v23 = vld [vmem:[%s4728_s6 + $0x338] sm:$0xff] }
 0x31c   : > { %v4161_v29 = vpop.eup %4160  ;;  %3008 = vst [vmem:[%s5359_s16 + $0x2e8] sm:$0xff] %v2880_v9  ;;  %v2627_v36 = vadd.f32 1.0, %v4159_v22  ;;  %v2189_v52 = vadd.f32 %v5663_v55, %v3597_v33  ;;  %v2180_v56 = vpop.f32.mrb[105].mxu1  ;;  %v4327_v22 = vld [vmem:[%s4728_s6 + $0x328] sm:$0xff] }
 0x31d   : > { %v4163_v30 = vpop.eup %4162  ;;  %v2757_v12 = vmul.f32 %v2629_v28, %v6005_v49  ;;  %v2630_v38 = vadd.f32 1.0, %v4161_v29  ;;  %v2181_v1 = vadd.f32 %v5663_v55, %v2180_v56  ;;  %v3598_v25 = vpop.f32.mrb[106].mxu1  ;;  %v4320_v49 = vld [vmem:[%s4728_s6 + $0x310] sm:$0xff] }
 0x31e   : > { %v2755_v27 = vmul.f32 %v2627_v36, %v6010_v15  ;;  %v2628_v14 = vadd.f32 1.0, %v4163_v30  ;;  %v6061_v19 = vmul.f32 0.5, %v2189_v52  ;;  %v2192_v42 = vadd.f32 %v6066_v41, %v3598_v25  ;;  %v2183_v43 = vpop.f32.mrb[107].mxu1 }
 0x31f   : > { %v2885_v48 = vadd.f32 %v4320_v49, %v2757_v12  ;;  %v2758_v55 = vmul.f32 %v2630_v38, %v6016_v59  ;;  %v6071_v15 = vmul.f32 0.5, %v2181_v1  ;;  %v2184_v31 = vadd.f32 %v6066_v41, %v2183_v43 }
 0x320   : > { %v2883_v24 = vadd.f32 %v4321_v16, %v2755_v27  ;;  %v2756_v47 = vmul.f32 %v2628_v14, %v6021_v54  ;;  %4172 = vtanh.f32 %v6061_v19  ;;  %v6077_v53 = vmul.f32 0.5, %v2192_v42 }
 0x321   : > { %3013 = vst [vmem:[%s5359_s16 + $0x310] sm:$0xff] %v2885_v48  ;;  %v2886_v60 = vadd.f32 %v4322_v51, %v2758_v55  ;;  %4174 = vtanh.f32 %v6071_v15  ;;  %v6082_v59 = vmul.f32 0.5, %v2184_v31  ;;  %v4328_v55 = vld [vmem:[%s4728_s6 + $0x350] sm:$0xff] }
 0x322   : > { %v4165_v37 = vpop.eup %4164  ;;  %3011 = vst [vmem:[%s5359_s16 + $0x300] sm:$0xff] %v2883_v24  ;;  %v2884_v57 = vadd.f32 %v4323_v35, %v2756_v47  ;;  %4176 = vtanh.f32 %v6077_v53  ;;  %v4329_v47 = vld [vmem:[%s4728_s6 + $0x340] sm:$0xff] }
 0x323   : > { %v4167_v62 = vpop.eup %4166  ;;  %3014 = vst [vmem:[%s5359_s16 + $0x318] sm:$0xff] %v2886_v60  ;;  %v2633_v54 = vadd.f32 1.0, %v4165_v37  ;;  %4178 = vtanh.f32 %v6082_v59  ;;  %v3601_v39 = vpop.f32.mrb[108].mxu1  ;;  %v4330_v37 = vld [vmem:[%s4728_s6 + $0x358] sm:$0xff] }
 0x324   : > { %v4169_v63 = vpop.eup %4168  ;;  %3012 = vst [vmem:[%s5359_s16 + $0x308] sm:$0xff] %v2884_v57  ;;  %v2631_v34 = vadd.f32 1.0, %v4167_v62  ;;  %v2205_v2 = vadd.f32 %v6066_v41, %v3601_v39  ;;  %v2196_v3 = vpop.f32.mrb[109].mxu1 }
 0x325   : > { %v4171_v61 = vpop.eup %4170  ;;  %v2761_v50 = vmul.f32 %v2633_v54, %v6033_v32  ;;  %v2634_v46 = vadd.f32 1.0, %v4169_v63  ;;  %v2197_v4 = vadd.f32 %v6066_v41, %v2196_v3  ;;  %v3602_v5 = vpop.f32.mrb[110].mxu1 }
 0x326   : > { %v2759_v8 = vmul.f32 %v2631_v34, %v6038_v11  ;;  %v2632_v0 = vadd.f32 1.0, %v4171_v61  ;;  %v6094_v18 = vmul.f32 0.5, %v2205_v2  ;;  %v2208_v58 = vadd.f32 %v6066_v41, %v3602_v5  ;;  %v2199_v44 = vpop.f32.mrb[111].mxu1 }
 0x327   : > { %v2889_v21 = vadd.f32 %v4324_v13, %v2761_v50  ;;  %v2762_v32 = vmul.f32 %v2634_v46, %v6044_v6  ;;  %v6099_v26 = vmul.f32 0.5, %v2197_v4  ;;  %v2200_v20 = vadd.f32 %v6066_v41, %v2199_v44  ;;  %v4332_v4 = vld [vmem:[%s4728_s6 + $0x370] sm:$0xff]  ;;  %v4334_v13 = vld [vmem:[%s4728_s6 + $0x378] sm:$0xff] }
 0x328   : > { %v2887_v11 = vadd.f32 %v4325_v17, %v2759_v8  ;;  %v2760_v7 = vmul.f32 %v2632_v0, %v6049_v40  ;;  %4180 = vtanh.f32 %v6094_v18  ;;  %v6105_v10 = vmul.f32 0.5, %v2208_v58  ;;  %v4333_v0 = vld [vmem:[%s4728_s6 + $0x360] sm:$0xff] }
 0x329   : > { %3017 = vst [vmem:[%s5359_s16 + $0x330] sm:$0xff] %v2889_v21  ;;  %v2890_v45 = vadd.f32 %v4326_v23, %v2762_v32  ;;  %4182 = vtanh.f32 %v6099_v26  ;;  %v6110_v6 = vmul.f32 0.5, %v2200_v20 }
 0x32a   : > { %v4173_v9 = vpop.eup %4172  ;;  %3015 = vst [vmem:[%s5359_s16 + $0x320] sm:$0xff] %v2887_v11  ;;  %v2888_v28 = vadd.f32 %v4327_v22, %v2760_v7  ;;  %4184 = vtanh.f32 %v6105_v10 }
 0x32b   : > { %v4175_v33 = vpop.eup %4174  ;;  %3018 = vst [vmem:[%s5359_s16 + $0x338] sm:$0xff] %v2890_v45  ;;  %v2637_v40 = vadd.f32 1.0, %v4173_v9  ;;  %4186 = vtanh.f32 %v6110_v6 }
 0x32c   : > { %v3605_v29 = vpop.f32.mrb[112].mxu1  ;;  %v4177_v36 = vpop.eup %4176  ;;  %3016 = vst [vmem:[%s5359_s16 + $0x328] sm:$0xff] %v2888_v28  ;;  %v2635_v52 = vadd.f32 1.0, %v4175_v33 }
 0x32d   : > { %v2221_v56 = vadd.f32 %v6066_v41, %v3605_v29  ;;  %v2212_v30 = vpop.f32.mrb[113].mxu1  ;;  %v4179_v12 = vpop.eup %4178  ;;  %v2765_v38 = vmul.f32 %v2637_v40, %v6061_v19  ;;  %v2638_v1 = vadd.f32 1.0, %v4177_v36 }
 0x32e   : > { %v2213_v25 = vadd.f32 %v6066_v41, %v2212_v30  ;;  %v3606_v27 = vpop.f32.mrb[114].mxu1  ;;  %v2763_v14 = vmul.f32 %v2635_v52, %v6071_v15  ;;  %v2636_v42 = vadd.f32 1.0, %v4179_v12  ;;  %v4336_v30 = vld [vmem:[%s4728_s6 + $0x390] sm:$0xff] }
 0x32f   : > { %v2389_v43 = vmul.f32 0.5, %v2221_v56  ;;  %v2224_v49 = vadd.f32 %v6066_v41, %v3606_v27  ;;  %v2215_v48 = vpop.f32.mrb[115].mxu1  ;;  %v2893_v31 = vadd.f32 %v4328_v55, %v2765_v38  ;;  %v2766_v16 = vmul.f32 %v2638_v1, %v6077_v53  ;;  %v4331_v53 = vld [vmem:[%s4728_s6 + $0x348] sm:$0xff]  ;;  %v4337_v27 = vld [vmem:[%s4728_s6 + $0x380] sm:$0xff] }
 0x330   : > { %v2387_v19 = vmul.f32 0.5, %v2213_v25  ;;  %v2216_v24 = vadd.f32 %v6066_v41, %v2215_v48  ;;  %v2891_v51 = vadd.f32 %v4329_v47, %v2763_v14  ;;  %v2764_v15 = vmul.f32 %v2636_v42, %v6082_v59 }
 0x331   : > { %4188 = vtanh.f32 %v2389_v43  ;;  %v2390_v60 = vmul.f32 0.5, %v2224_v49  ;;  %3021 = vst [vmem:[%s5359_s16 + $0x350] sm:$0xff] %v2893_v31  ;;  %v2894_v35 = vadd.f32 %v4330_v37, %v2766_v16  ;;  %v4338_v49 = vld [vmem:[%s4728_s6 + $0x398] sm:$0xff]  ;;  %v4339_v31 = vld [vmem:[%s4728_s6 + $0x388] sm:$0xff] }
 0x332   : > { %4190 = vtanh.f32 %v2387_v19  ;;  %v2388_v57 = vmul.f32 0.5, %v2216_v24  ;;  %v4181_v62 = vpop.eup %4180  ;;  %3019 = vst [vmem:[%s5359_s16 + $0x340] sm:$0xff] %v2891_v51  ;;  %v2892_v54 = vadd.f32 %v4331_v53, %v2764_v15 }
 0x333   : > { %4192 = vtanh.f32 %v2390_v60  ;;  %v4183_v39 = vpop.eup %4182  ;;  %3022 = vst [vmem:[%s5359_s16 + $0x358] sm:$0xff] %v2894_v35  ;;  %v2641_v63 = vadd.f32 1.0, %v4181_v62 }
 0x334   : > { %4194 = vtanh.f32 %v2388_v57  ;;  %v4185_v59 = vpop.eup %4184  ;;  %3020 = vst [vmem:[%s5359_s16 + $0x348] sm:$0xff] %v2892_v54  ;;  %v2639_v34 = vadd.f32 1.0, %v4183_v39 }
 0x335   : > { %v4187_v2 = vpop.eup %4186  ;;  %v2769_v3 = vmul.f32 %v2641_v63, %v6094_v18  ;;  %v2642_v61 = vadd.f32 1.0, %v4185_v59  ;;  %v4335_v18 = vld [vmem:[%s4728_s6 + $0x368] sm:$0xff] }
 0x336   : > { %v2767_v50 = vmul.f32 %v2639_v34, %v6099_v26  ;;  %v2640_v46 = vadd.f32 1.0, %v4187_v2 }
 0x337   : > { %v2897_v5 = vadd.f32 %v4332_v4, %v2769_v3  ;;  %v2770_v8 = vmul.f32 %v2642_v61, %v6105_v10 }
 0x338   : > { %v2895_v58 = vadd.f32 %v4333_v0, %v2767_v50  ;;  %v2768_v44 = vmul.f32 %v2640_v46, %v6110_v6 }
 0x339   : > { %3025 = vst [vmem:[%s5359_s16 + $0x370] sm:$0xff] %v2897_v5  ;;  %v2898_v21 = vadd.f32 %v4334_v13, %v2770_v8 }
 0x33a   : > { %3023 = vst [vmem:[%s5359_s16 + $0x360] sm:$0xff] %v2895_v58  ;;  %v2896_v20 = vadd.f32 %v4335_v18, %v2768_v44  ;;  %v4340_v18 = vld [vmem:[%s4728_s6 + $0x3b0] sm:$0xff] }
 0x33b   : > { %v4189_v32 = vpop.eup %4188  ;;  %3026 = vst [vmem:[%s5359_s16 + $0x378] sm:$0xff] %v2898_v21 }
 0x33c   : > { %v4191_v17 = vpop.eup %4190  ;;  %v2645_v26 = vadd.f32 1.0, %v4189_v32  ;;  %v3609_v11 = vpop.f32.mrb[116].mxu1  ;;  %3024 = vst [vmem:[%s5359_s16 + $0x368] sm:$0xff] %v2896_v20 }
 0x33d   : > { %v4193_v7 = vpop.eup %4192  ;;  %v2643_v10 = vadd.f32 1.0, %v4191_v17  ;;  %v2237_v23 = vadd.f32 %v6066_v41, %v3609_v11  ;;  %v2228_v45 = vpop.f32.mrb[117].mxu1 }
 0x33e   : > { %v4195_v6 = vpop.eup %4194  ;;  %v2773_v9 = vmul.f32 %v2645_v26, %v2389_v43  ;;  %v2646_v22 = vadd.f32 1.0, %v4193_v7  ;;  %v2229_v28 = vadd.f32 %v6066_v41, %v2228_v45  ;;  %v3610_v33 = vpop.f32.mrb[118].mxu1  ;;  %v4341_v7 = vld [vmem:[%s4728_s6 + $0x3a0] sm:$0xff] }
 0x33f   : > { %v2771_v40 = vmul.f32 %v2643_v10, %v2387_v19  ;;  %v2644_v29 = vadd.f32 1.0, %v4195_v6  ;;  %v2393_v36 = vmul.f32 0.5, %v2237_v23  ;;  %v2240_v52 = vadd.f32 %v6066_v41, %v3610_v33  ;;  %v2231_v56 = vpop.f32.mrb[119].mxu1  ;;  %v4342_v6 = vld [vmem:[%s4728_s6 + $0x3b8] sm:$0xff]  ;;  %v4343_v33 = vld [vmem:[%s4728_s6 + $0x3a8] sm:$0xff] }
 0x340   : > { %v2901_v12 = vadd.f32 %v4336_v30, %v2773_v9  ;;  %v2774_v38 = vmul.f32 %v2646_v22, %v2390_v60  ;;  %v2391_v1 = vmul.f32 0.5, %v2229_v28  ;;  %v2232_v25 = vadd.f32 %v6066_v41, %v2231_v56 }
 0x341   : > { %v2899_v14 = vadd.f32 %v4337_v27, %v2771_v40  ;;  %v2772_v42 = vmul.f32 %v2644_v29, %v2388_v57  ;;  %4196 = vtanh.f32 %v2393_v36  ;;  %v2394_v43 = vmul.f32 0.5, %v2240_v52 }
 0x342   : > { %3029 = vst [vmem:[%s5359_s16 + $0x390] sm:$0xff] %v2901_v12  ;;  %v2902_v48 = vadd.f32 %v4338_v49, %v2774_v38  ;;  %4198 = vtanh.f32 %v2391_v1  ;;  %v2392_v55 = vmul.f32 0.5, %v2232_v25  ;;  %v4344_v25 = vld [vmem:[%s4728_s6 + $0x3d0] sm:$0xff] }
 0x343   : > { %3027 = vst [vmem:[%s5359_s16 + $0x380] sm:$0xff] %v2899_v14  ;;  %v2900_v16 = vadd.f32 %v4339_v31, %v2772_v42  ;;  %4200 = vtanh.f32 %v2394_v43  ;;  %v4345_v42 = vld [vmem:[%s4728_s6 + $0x3c0] sm:$0xff] }
 0x344   : > { %3030 = vst [vmem:[%s5359_s16 + $0x398] sm:$0xff] %v2902_v48  ;;  %4202 = vtanh.f32 %v2392_v55  ;;  %v3613_v19 = vpop.f32.mrb[120].mxu1  ;;  %v4346_v48 = vld [vmem:[%s4728_s6 + $0x3d8] sm:$0xff] }
 0x345   : > { %3028 = vst [vmem:[%s5359_s16 + $0x388] sm:$0xff] %v2900_v16  ;;  %v2253_v24 = vadd.f32 %v6066_v41, %v3613_v19  ;;  %v2244_v47 = vpop.f32.mrb[121].mxu1  ;;  %v4347_v16 = vld [vmem:[%s4728_s6 + $0x3c8] sm:$0xff] }
 0x346   : > { %v2245_v51 = vadd.f32 %v6066_v41, %v2244_v47  ;;  %v3614_v15 = vpop.f32.mrb[122].mxu1 }
 0x347   : > { %v2397_v60 = vmul.f32 0.5, %v2253_v24  ;;  %v2256_v37 = vadd.f32 %v6066_v41, %v3614_v15  ;;  %v2247_v35 = vpop.f32.mrb[123].mxu1 }
 0x348   : > { %v2395_v57 = vmul.f32 0.5, %v2245_v51  ;;  %v2248_v62 = vadd.f32 %v6066_v41, %v2247_v35 }
 0x349   : > { %4204 = vtanh.f32 %v2397_v60  ;;  %v2398_v53 = vmul.f32 0.5, %v2256_v37 }
 0x34a   : > { %4206 = vtanh.f32 %v2395_v57  ;;  %v2396_v54 = vmul.f32 0.5, %v2248_v62 }
 0x34b   : > { %v4197_v39 = vpop.eup %4196  ;;  %4208 = vtanh.f32 %v2398_v53 }
 0x34c   : > { %v4199_v63 = vpop.eup %4198  ;;  %v2649_v59 = vadd.f32 1.0, %v4197_v39  ;;  %4210 = vtanh.f32 %v2396_v54  ;;  %v3617_v34 = vpop.f32.mrb[124].mxu1 }
 0x34d   : > { %v4201_v2 = vpop.eup %4200  ;;  %v2647_v3 = vadd.f32 1.0, %v4199_v63  ;;  %v2269_v61 = vadd.f32 %v6066_v41, %v3617_v34  ;;  %v2260_v50 = vpop.f32.mrb[125].mxu1  ;;  %v4349_v63 = vld [vmem:[%s4728_s6 + $0x3e0] sm:$0xff] }
 0x34e   : > { %v4203_v46 = vpop.eup %4202  ;;  %v2777_v4 = vmul.f32 %v2649_v59, %v2393_v36  ;;  %v2650_v5 = vadd.f32 1.0, %v4201_v2  ;;  %v2261_v8 = vadd.f32 %v6066_v41, %v2260_v50  ;;  %v3618_v0 = vpop.f32.mrb[126].mxu1  ;;  %v4350_v2 = vld [vmem:[%s4728_s6 + $0x3f8] sm:$0xff] }
 0x34f   : > { %v2775_v58 = vmul.f32 %v2647_v3, %v2391_v1  ;;  %v2648_v44 = vadd.f32 1.0, %v4203_v46  ;;  %v2401_v13 = vmul.f32 0.5, %v2269_v61  ;;  %v2272_v21 = vadd.f32 %v6066_v41, %v3618_v0  ;;  %v2263_v32 = vpop.f32.mrb[127].mxu1  ;;  %v4351_v61 = vld [vmem:[%s4728_s6 + $0x3e8] sm:$0xff] }
 0x350   : > { %v2905_v20 = vadd.f32 %v4340_v18, %v2777_v4  ;;  %v2778_v17 = vmul.f32 %v2650_v5, %v2394_v43  ;;  %v2399_v26 = vmul.f32 0.5, %v2261_v8  ;;  %v2264_v11 = vadd.f32 %v6066_v41, %v2263_v32 }
 0x351   : > { %v2903_v10 = vadd.f32 %v4341_v7, %v2775_v58  ;;  %v2776_v23 = vmul.f32 %v2648_v44, %v2392_v55  ;;  %4212 = vtanh.f32 %v2401_v13  ;;  %v2402_v45 = vmul.f32 0.5, %v2272_v21 }
 0x352   : > { %3033 = vst [vmem:[%s5359_s16 + $0x3b0] sm:$0xff] %v2905_v20  ;;  %v2906_v9 = vadd.f32 %v4342_v6, %v2778_v17  ;;  %4214 = vtanh.f32 %v2399_v26  ;;  %v2400_v22 = vmul.f32 0.5, %v2264_v11 }
 0x353   : > { %v4205_v28 = vpop.eup %4204  ;;  %3031 = vst [vmem:[%s5359_s16 + $0x3a0] sm:$0xff] %v2903_v10  ;;  %v2904_v40 = vadd.f32 %v4343_v33, %v2776_v23  ;;  %4216 = vtanh.f32 %v2402_v45 }
 0x354   : > { %v4207_v41 = vpop.eup %4206  ;;  %3034 = vst [vmem:[%s5359_s16 + $0x3b8] sm:$0xff] %v2906_v9  ;;  %v2653_v29 = vadd.f32 1.0, %v4205_v28  ;;  %4218 = vtanh.f32 %v2400_v22 }
 0x355   : > { %v4209_v36 = vpop.eup %4208  ;;  %3032 = vst [vmem:[%s5359_s16 + $0x3a8] sm:$0xff] %v2904_v40  ;;  %v2651_v52 = vadd.f32 1.0, %v4207_v41 }
 0x356   : > { %v4211_v56 = vpop.eup %4210  ;;  %v2781_v30 = vmul.f32 %v2653_v29, %v2397_v60  ;;  %v2654_v12 = vadd.f32 1.0, %v4209_v36 }
 0x357   : > { %v2779_v38 = vmul.f32 %v2651_v52, %v2395_v57  ;;  %v2652_v1 = vadd.f32 1.0, %v4211_v56 }
 0x358   : > { %v2909_v27 = vadd.f32 %v4344_v25, %v2781_v30  ;;  %v2782_v14 = vmul.f32 %v2654_v12, %v2398_v53  ;;  %v4348_v53 = vld [vmem:[%s4728_s6 + $0x3f0] sm:$0xff] }
 0x359   : > { %v2907_v43 = vadd.f32 %v4345_v42, %v2779_v38  ;;  %v2780_v49 = vmul.f32 %v2652_v1, %v2396_v54 }
 0x35a   : > { %3037 = vst [vmem:[%s5359_s16 + $0x3d0] sm:$0xff] %v2909_v27  ;;  %v2910_v55 = vadd.f32 %v4346_v48, %v2782_v14 }
 0x35b   : > { %v4213_v31 = vpop.eup %4212  ;;  %3035 = vst [vmem:[%s5359_s16 + $0x3c0] sm:$0xff] %v2907_v43  ;;  %v2908_v19 = vadd.f32 %v4347_v16, %v2780_v49 }
 0x35c   : > { %v4215_v24 = vpop.eup %4214  ;;  %3038 = vst [vmem:[%s5359_s16 + $0x3d8] sm:$0xff] %v2910_v55  ;;  %v2657_v47 = vadd.f32 1.0, %v4213_v31 }
 0x35d   : > { %v4217_v51 = vpop.eup %4216  ;;  %3036 = vst [vmem:[%s5359_s16 + $0x3c8] sm:$0xff] %v2908_v19  ;;  %v2655_v15 = vadd.f32 1.0, %v4215_v24 }
 0x35e   : > { %v4219_v60 = vpop.eup %4218  ;;  %v2785_v37 = vmul.f32 %v2657_v47, %v2401_v13  ;;  %v2658_v35 = vadd.f32 1.0, %v4217_v51 }
 0x35f   : > { %v2783_v57 = vmul.f32 %v2655_v15, %v2399_v26  ;;  %v2656_v62 = vadd.f32 1.0, %v4219_v60 }
 0x360   : > { %v2913_v54 = vadd.f32 %v4348_v53, %v2785_v37  ;;  %v2786_v39 = vmul.f32 %v2658_v35, %v2402_v45 }
 0x361   : > { %v2911_v59 = vadd.f32 %v4349_v63, %v2783_v57  ;;  %v2784_v34 = vmul.f32 %v2656_v62, %v2400_v22 }
 0x362   : > { %3041 = vst [vmem:[%s5359_s16 + $0x3f0] sm:$0xff] %v2913_v54  ;;  %v2914_v3 = vadd.f32 %v4350_v2, %v2786_v39 }
 0x363   : > { %3039 = vst [vmem:[%s5359_s16 + $0x3e0] sm:$0xff] %v2911_v59  ;;  %v2912_v50 = vadd.f32 %v4351_v61, %v2784_v34 }
 0x364   : > { %3042 = vst [vmem:[%s5359_s16 + $0x3f8] sm:$0xff] %v2914_v3 }
 0x365   : > { %3040 = vst [vmem:[%s5359_s16 + $0x3e8] sm:$0xff] %v2912_v50 }
 0x366   : > { %4451 = shalt.err (!%p4448_p2)
}
 0x367   : > { %s4452_s6 = scalar_lea.hbm %s6191_s10, 16384  ;;  %s4456_s12 = scalar_lea.hbm %s6246_s5, 32768 }
 0x368   : > { %p4453_p13 = scmp.ne.s32.totalorder %s6191_s10, %s4452_s6  ;;  %p4457_p4 = scmp.lt.u32.totalorder %s6191_s10, %s6246_s5 }
 0x369   : > { %p4458_p5 = scmp.lt.u32.totalorder %s4456_s12, %s4452_s6  ;;  %p4460_p11 = scmp.lt.u32.totalorder %s4452_s6, %s6191_s10 }
 0x36a   : > { %p4454_p6 = pnand %p4453_p13, %p6260_p0 }
 0x36b   : > { %p4459_p8 = por %p4458_p5, %p4457_p4 }
 0x36c   : > { %p4455_p10 = pneg %p4454_p6 }
 0x36d   : > { %p4461_p1 = por %p4460_p11, %p4459_p8 }
 0x36f   : > { %p4462_p3 = pnand %p4461_p1, %p4455_p10 }
 0x371   : > { %4465 = shalt.err (!%p4462_p3)
}
 0x372   : > { %s4518_s7 = smov 128   ;;  %s4519_s26 = smov 8  }
 0x373   : > { %3629 = dma.vmem_to_hbm [thread:$0]  (%p6260_p0), %s6193_s24, 16384, %s6191_s10, %s3044_s22, %s4518_s7, %s4518_s7, %s4519_s26  }
 0x374 PF: > { %s3072_s8 = sand.u32 1, %s4496_s18   ;;  %p6261_p7 = scmp.ne.s32.totalorder %s6251_s25, 0 }
 0x375   : > { %p6262_p9 = scmp.ge.s32.totalorder %s4508_s21, 2  ;;  %s3073_s11 = scalar_lea.sflag [#allocation4], %s3072_s8 }
 0x377   : > { %p3643_p12 = pnand %p6262_p9, %p6261_p7 }
 0x379   : > { %4491 = dma.done.wait (!%p3643_p12), %s3073_s11, 16384  }
 0x37a   : > { %4493 = vsyncadd (!%p3643_p12), %s3073_s11, 4294950912  ;;  %p19_p2 = scmp.ge.s32.totalorder %s4660_s14, 4   ;;  %s6263_s18 = smov %s4500_s19 }
 0x37b   : > { %s6264_s19 = smov %s4504_s20  ;;  %s6265_s20 = smov %s4676_s27 }
 0x37c   : > { %s6266_s21 = smov %s4660_s14  ;;  %21 = sbr.rel (!%p19_p2) target bundleno = 6 (0x6), region = 93 }
 0x383   :  { %3078 = vsyncpa [#allocation3], 1 }
 0x384   :  { %3080 = vsyncpa [#allocation3 + $0x1], 1 }
 0x385   :  { %3081 = vsyncpa [#allocation6], 1 }
 0x386   :  { %3082 = vsyncpa [#allocation4], 1 }
 0x387   :  { %3084 = vsyncpa [#allocation4 + $0x1], 1 }

</bundles_post_ra>
